<compile_context>
chip_gen: v6e
topology: v6e:2x2x1
jax: 0.10.0
libtpu: 0.0.40
codegen_flags: <defaults>
</compile_context>

<pallas_src>
import functools

import numpy as np

import jax
import jax.numpy as jnp
from jax.experimental import pallas as pl
from jax.experimental.pallas import tpu as pltpu


# ------------------------------ fused kernel --------------------------------

def _convnet_kernel(x_ref, w1u_ref, b1_ref, w2u_ref, b2_ref,
                    f1_ref, g1_ref, f2_ref, g2_ref, f3_ref, g3_ref,
                    o_ref):
    tb = x_ref.shape[0]
    x = x_ref[...]                                           # (tb, 28, 28) bf16

    # ---- conv1 (1->6, 5x5, valid): 5 row-tap MXU matmuls, input row-shifted ----
    # w1u_ref[i] is (28, 256); column = half*128 + w*6 + c encodes output column
    # ow = 2*w + half and channel c (columns 72..127 / 200..255 are zero padding).
    acc = jnp.dot(x[:, 0:24, :].reshape(tb * 24, 28), w1u_ref[0],
                  preferred_element_type=jnp.float32)
    for i in range(1, 5):
        acc = acc + jnp.dot(x[:, i:i + 24, :].reshape(tb * 24, 28), w1u_ref[i],
                            preferred_element_type=jnp.float32)
    acc = jnp.maximum(acc + b1_ref[...], 0.0)                # (tb*24, 256) f32

    # ---- maxpool 2x2 #1: fold the oh row-pair into lanes, then two half-maxes --
    z1 = acc.reshape(tb * 12, 512)                           # [oh even | oh odd]
    a1 = jnp.maximum(z1[:, 0:256], z1[:, 256:512])           # pool H -> (tb*12, 256)
    p1 = jnp.maximum(a1[:, 0:128], a1[:, 128:256])           # pool W -> (tb*12, 128)
    p1 = p1.astype(jnp.bfloat16).reshape(tb, 12, 128)        # lane = w*6 + c

    # ---- conv2 (6->16, 5x5, valid): 5 row-tap matmuls on lane-packed pool1 -----
    # w2u_ref[i] is (128, 256); column = half*128 + wp*16 + cout (ow = 2*wp+half).
    acc2 = jnp.dot(p1[:, 0:8, :].reshape(tb * 8, 128), w2u_ref[0],
                   preferred_element_type=jnp.float32)
    for i in range(1, 5):
        acc2 = acc2 + jnp.dot(p1[:, i:i + 8, :].reshape(tb * 8, 128), w2u_ref[i],
                              preferred_element_type=jnp.float32)
    y2 = jnp.maximum(acc2 + b2_ref[...], 0.0)                # (tb*8, 256) f32

    # ---- maxpool 2x2 #2 (same tile-aligned half-max structure) -----------------
    z2 = y2.reshape(tb * 4, 512)
    a2 = jnp.maximum(z2[:, 0:256], z2[:, 256:512])           # pool H -> (tb*4, 256)
    m = jnp.maximum(a2[:, 0:128], a2[:, 128:256])            # pool W -> (tb*4, 128)
    flat = m.reshape(tb, 512).astype(jnp.bfloat16)           # fc1 rows pre-scattered

    # ---- fully connected head (bf16 operands, f32 accumulation) ----------------
    h = jnp.dot(flat, f1_ref[...], preferred_element_type=jnp.float32) + g1_ref[...]
    h = jnp.maximum(h, 0.0).astype(jnp.bfloat16)
    h = jnp.dot(h, f2_ref[...], preferred_element_type=jnp.float32) + g2_ref[...]
    h = jnp.maximum(h, 0.0).astype(jnp.bfloat16)
    out = jnp.dot(h, f3_ref[...], preferred_element_type=jnp.float32) + g3_ref[...]
    o_ref[...] = out.astype(o_ref.dtype)


# ------------------------------- parameters ---------------------------------

def init_params(key):
    ks = jax.random.split(key, 10)
    scale = 0.1

    def w(k, shape):
        return scale * jax.random.normal(k, shape, dtype=jnp.float32)

    return {
        # conv weights stored PyTorch-style (Cout, Cin, kh, kw)
        "conv1_w": w(ks[0], (6, 1, 5, 5)),
        "conv1_b": w(ks[1], (6,)),
        "conv2_w": w(ks[2], (16, 6, 5, 5)),
        "conv2_b": w(ks[3], (16,)),
        # linear weights stored as (in, out)
        "fc1_w": w(ks[4], (16 * 4 * 4, 120)),
        "fc1_b": w(ks[5], (120,)),
        "fc2_w": w(ks[6], (120, 84)),
        "fc2_b": w(ks[7], (84,)),
        "fc3_w": w(ks[8], (84, 10)),
        "fc3_b": w(ks[9], (10,)),
    }


def prepare_params(params):
    """One-time preprocessing (host-side numpy):
       - conv1 -> 5 row-tap unfold matrices (28, 256), output columns pre-split
         into even/odd-ow 128-lane halves so W-pooling is a tile-aligned max,
       - conv2 -> 5 row-tap unfold matrices (128, 256) on the lane-packed pool1
         layout (row = w*6 + cin), same even/odd-ow column split,
       - fc1 rows re-scattered into the kernel's (hp, wp*16+cout) flatten order
         (dead lanes get zero rows), so no in-kernel gather is needed,
       - all matmul operands cast to bf16, biases stay f32."""
    w1 = np.asarray(params["conv1_w"], np.float32)           # (6, 1, 5, 5)
    b1 = np.asarray(params["conv1_b"], np.float32)           # (6,)
    w2 = np.asarray(params["conv2_w"], np.float32)           # (16, 6, 5, 5)
    b2 = np.asarray(params["conv2_b"], np.float32)           # (16,)
    fc1_w = np.asarray(params["fc1_w"], np.float32)          # (256, 120)
    fc1_b = np.asarray(params["fc1_b"], np.float32)
    fc2_w = np.asarray(params["fc2_w"], np.float32)
    fc2_b = np.asarray(params["fc2_b"], np.float32)
    fc3_w = np.asarray(params["fc3_w"], np.float32)
    fc3_b = np.asarray(params["fc3_b"], np.float32)

    # conv1 unfold: w1u[i, xw, half*128 + w*6 + c] = w1[c, 0, i, xw - (2w+half)]
    w1u = np.zeros((5, 28, 256), np.float32)
    b1t = np.zeros((1, 256), np.float32)
    for half in range(2):
        for w in range(12):
            ow = 2 * w + half
            for c in range(6):
                col = half * 128 + w * 6 + c
                b1t[0, col] = b1[c]
                for i in range(5):
                    for j in range(5):
                        w1u[i, ow + j, col] = w1[c, 0, i, j]

    # conv2 unfold: w2u[i, w*6+cin, half*128 + wp*16 + cout] = w2[cout, cin, i, w-(2wp+half)]
    w2u = np.zeros((5, 128, 256), np.float32)
    b2t = np.zeros((1, 256), np.float32)
    for half in range(2):
        for wp in range(4):
            ow = 2 * wp + half
            for cout in range(16):
                col = half * 128 + wp * 16 + cout
                b2t[0, col] = b2[cout]
                for i in range(5):
                    for j in range(5):
                        w = ow + j                           # 0..11
                        for cin in range(6):
                            w2u[i, w * 6 + cin, col] = w2[cout, cin, i, j]

    # fc1 rows: kernel flat index = hp*128 + wp*16 + cout; PyTorch flat = cout*16 + hp*4 + wp.
    f1p = np.zeros((512, 120), np.float32)
    for hp in range(4):
        for wp in range(4):
            for cout in range(16):
                f1p[hp * 128 + wp * 16 + cout, :] = fc1_w[cout * 16 + hp * 4 + wp, :]

    bf16 = jnp.bfloat16
    return (jnp.asarray(w1u, bf16), jnp.asarray(b1t, jnp.float32),
            jnp.asarray(w2u, bf16), jnp.asarray(b2t, jnp.float32),
            jnp.asarray(f1p, bf16), jnp.asarray(fc1_b.reshape(1, -1), jnp.float32),
            jnp.asarray(fc2_w, bf16), jnp.asarray(fc2_b.reshape(1, -1), jnp.float32),
            jnp.asarray(fc3_w, bf16), jnp.asarray(fc3_b.reshape(1, -1), jnp.float32))


# --------------------------------- forward ----------------------------------

def _round_up(v, m):
    return (v + m - 1) // m * m


@functools.partial(jax.jit, static_argnames=("batch_tile",))
def convnet_forward(prepared, x_nchw, *, batch_tile=128):
    """Fused forward pass. x_nchw: (N, 1, 28, 28) -> logits (N, 10)."""
    (w1u, b1t, w2u, b2t, f1p, g1, f2, g2, f3, g3) = prepared

    n = x_nchw.shape[0]
    assert x_nchw.shape[1:] == (1, 28, 28), x_nchw.shape
    x = x_nchw.astype(jnp.bfloat16).reshape(n, 28, 28)       # Cin == 1, bf16 MXU operand

    # Clamp the tile for tiny (serving-sized) batches to avoid padded wasted work.
    tb = min(batch_tile, _round_up(n, 8))
    assert tb % 8 == 0, tb
    pad = (-n) % tb
    if pad:
        x = jnp.pad(x, ((0, pad), (0, 0), (0, 0)))
    npad = n + pad

    const2 = lambda b: (0, 0)
    const3 = lambda b: (0, 0, 0)

    out = pl.pallas_call(
        _convnet_kernel,
        out_shape=jax.ShapeDtypeStruct((npad, 10), jnp.float32),
        grid=(npad // tb,),
        in_specs=[
            pl.BlockSpec((tb, 28, 28), lambda b: (b, 0, 0)),  # input tile (bf16)
            pl.BlockSpec((5, 28, 256), const3),               # conv1 unfold mats
            pl.BlockSpec((1, 256), const2),                   # conv1 bias (lane-expanded)
            pl.BlockSpec((5, 128, 256), const3),              # conv2 unfold mats
            pl.BlockSpec((1, 256), const2),                   # conv2 bias (lane-expanded)
            pl.BlockSpec((512, 120), const2),                 # fc1 (rows re-scattered)
            pl.BlockSpec((1, 120), const2),
            pl.BlockSpec((120, 84), const2),                  # fc2
            pl.BlockSpec((1, 84), const2),
            pl.BlockSpec((84, 10), const2),                   # fc3
            pl.BlockSpec((1, 10), const2),
        ],
        out_specs=pl.BlockSpec((tb, 10), lambda b: (b, 0)),
        compiler_params=pltpu.CompilerParams(
            dimension_semantics=("parallel",),           # split batch tiles across TCs (v7x)
            vmem_limit_bytes=48 * 1024 * 1024,           # ~15-20 MB used at tb=128
        ),
    )(x, w1u, b1t, w2u, b2t, f1p, g1, f2, g2, f3, g3)
    return out[:n]


# ------------------------- pure-JAX reference (check) ------------------------

def _reference_forward(params, x_nchw):
    x = x_nchw.astype(jnp.float32)

    def conv(inp, w, b):
        y = jax.lax.conv_general_dilated(
            inp, w, window_strides=(1, 1), padding="VALID",
            dimension_numbers=("NCHW", "OIHW", "NCHW"))
        return jax.nn.relu(y + b[None, :, None, None])

    def pool(inp):
        return jax.lax.reduce_window(
            inp, -jnp.inf, jax.lax.max,
            window_dimensions=(1, 1, 2, 2), window_strides=(1, 1, 2, 2),
            padding="VALID")

    y = pool(conv(x, params["conv1_w"], params["conv1_b"]))
    y = pool(conv(y, params["conv2_w"], params["conv2_b"]))
    flat = y.reshape(y.shape[0], 16 * 4 * 4)
    h = jax.nn.relu(flat @ params["fc1_w"] + params["fc1_b"])
    h = jax.nn.relu(h @ params["fc2_w"] + params["fc2_b"])
    return h @ params["fc3_w"] + params["fc3_b"]


# ----------------------------------- main ------------------------------------

if __name__ == "__main__":
    key = jax.random.PRNGKey(0)
    k_param, k_x = jax.random.split(key)
    params = init_params(k_param)
    prepared = prepare_params(params)

    # MNIST-style input implied by the module: (batch, 1, 28, 28)
    x = jax.random.normal(k_x, (2, 1, 28, 28), dtype=jnp.float32)

    logits = convnet_forward(prepared, x)
    jax.block_until_ready(logits)
    assert logits.shape == (2, 10), logits.shape

    ref = _reference_forward(params, x)
    # bf16 MXU operands with f32 accumulation -> slightly looser tolerance than f32.
    assert bool(jnp.allclose(logits, ref, atol=3e-2, rtol=3e-2)), (
        "Pallas kernel disagrees with pure-JAX reference")

    print("KERNEL_OK")
</pallas_src>

<mosaic_0001>
module attributes {stable_mosaic.version = 11 : i64} {
  func.func @_convnet_kernel(%arg0: i32, %arg1: memref<8x28x28xbf16, #tpu.memory_space<vmem>>, %arg2: memref<5x28x256xbf16, #tpu.memory_space<vmem>>, %arg3: memref<1x256xf32, #tpu.memory_space<vmem>>, %arg4: memref<5x128x256xbf16, #tpu.memory_space<vmem>>, %arg5: memref<1x256xf32, #tpu.memory_space<vmem>>, %arg6: memref<512x120xbf16, #tpu.memory_space<vmem>>, %arg7: memref<1x120xf32, #tpu.memory_space<vmem>>, %arg8: memref<120x84xbf16, #tpu.memory_space<vmem>>, %arg9: memref<1x84xf32, #tpu.memory_space<vmem>>, %arg10: memref<84x10xbf16, #tpu.memory_space<vmem>>, %arg11: memref<1x10xf32, #tpu.memory_space<vmem>>, %arg12: memref<8x10xf32, #tpu.memory_space<vmem>>) attributes {dimension_semantics = [#tpu.dimension_semantics<parallel>], iteration_bounds = array<i64: 1>, scalar_prefetch = 0 : i64, scratch_operands = 0 : i64, tpu.core_type = #tpu.core_type<tc>, window_params = [{transform_indices = @transform_0, window_bounds = array<i64: 8, 28, 28>}, {pipeline_mode = #tpu.pipeline_mode<synchronous>, transform_indices = @transform_1, window_bounds = array<i64: 5, 28, 256>}, {pipeline_mode = #tpu.pipeline_mode<synchronous>, transform_indices = @transform_2, window_bounds = array<i64: 1, 256>}, {pipeline_mode = #tpu.pipeline_mode<synchronous>, transform_indices = @transform_3, window_bounds = array<i64: 5, 128, 256>}, {pipeline_mode = #tpu.pipeline_mode<synchronous>, transform_indices = @transform_4, window_bounds = array<i64: 1, 256>}, {pipeline_mode = #tpu.pipeline_mode<synchronous>, transform_indices = @transform_5, window_bounds = array<i64: 512, 120>}, {pipeline_mode = #tpu.pipeline_mode<synchronous>, transform_indices = @transform_6, window_bounds = array<i64: 1, 120>}, {pipeline_mode = #tpu.pipeline_mode<synchronous>, transform_indices = @transform_7, window_bounds = array<i64: 120, 84>}, {pipeline_mode = #tpu.pipeline_mode<synchronous>, transform_indices = @transform_8, window_bounds = array<i64: 1, 84>}, {pipeline_mode = #tpu.pipeline_mode<synchronous>, transform_indices = @transform_9, window_bounds = array<i64: 84, 10>}, {pipeline_mode = #tpu.pipeline_mode<synchronous>, transform_indices = @transform_10, window_bounds = array<i64: 1, 10>}, {transform_indices = @transform_11, window_bounds = array<i64: 8, 10>}]} {
    %c0 = arith.constant 0 : index
    %c0_0 = arith.constant 0 : index
    %c0_1 = arith.constant 0 : index
    %0 = vector.load %arg1[%c0, %c0_0, %c0_1] : memref<8x28x28xbf16, #tpu.memory_space<vmem>>, vector<8x28x28xbf16>
    %1 = vector.extract_strided_slice %0 {offsets = [0, 0, 0], sizes = [8, 24, 28], strides = [1, 1, 1]} : vector<8x28x28xbf16> to vector<8x24x28xbf16>
    %2 = vector.shape_cast %1 : vector<8x24x28xbf16> to vector<192x28xbf16>
    %c0_2 = arith.constant 0 : index
    %c0_3 = arith.constant 0 : index
    %c0_4 = arith.constant 0 : index
    %3 = vector.load %arg2[%c0_2, %c0_3, %c0_4] : memref<5x28x256xbf16, #tpu.memory_space<vmem>>, vector<1x28x256xbf16>
    %4 = vector.shape_cast %3 : vector<1x28x256xbf16> to vector<28x256xbf16>
    %cst = arith.constant dense<0.000000e+00> : vector<192x256xf32>
    %5 = tpu.matmul %2, %4, %cst {dimension_numbers = #tpu.dot_dimension_numbers<[1], [0], [0], [1], [0, 0, 1, 1], [], []>} : vector<192x28xbf16>, vector<28x256xbf16>, vector<192x256xf32> -> vector<192x256xf32>
    %6 = vector.extract_strided_slice %0 {offsets = [0, 1, 0], sizes = [8, 24, 28], strides = [1, 1, 1]} : vector<8x28x28xbf16> to vector<8x24x28xbf16>
    %7 = vector.shape_cast %6 : vector<8x24x28xbf16> to vector<192x28xbf16>
    %c1 = arith.constant 1 : index
    %c0_5 = arith.constant 0 : index
    %c0_6 = arith.constant 0 : index
    %8 = vector.load %arg2[%c1, %c0_5, %c0_6] : memref<5x28x256xbf16, #tpu.memory_space<vmem>>, vector<1x28x256xbf16>
    %9 = vector.shape_cast %8 : vector<1x28x256xbf16> to vector<28x256xbf16>
    %cst_7 = arith.constant dense<0.000000e+00> : vector<192x256xf32>
    %10 = tpu.matmul %7, %9, %cst_7 {dimension_numbers = #tpu.dot_dimension_numbers<[1], [0], [0], [1], [0, 0, 1, 1], [], []>} : vector<192x28xbf16>, vector<28x256xbf16>, vector<192x256xf32> -> vector<192x256xf32>
    %11 = arith.addf %5, %10 : vector<192x256xf32>
    %12 = vector.extract_strided_slice %0 {offsets = [0, 2, 0], sizes = [8, 24, 28], strides = [1, 1, 1]} : vector<8x28x28xbf16> to vector<8x24x28xbf16>
    %13 = vector.shape_cast %12 : vector<8x24x28xbf16> to vector<192x28xbf16>
    %c2 = arith.constant 2 : index
    %c0_8 = arith.constant 0 : index
    %c0_9 = arith.constant 0 : index
    %14 = vector.load %arg2[%c2, %c0_8, %c0_9] : memref<5x28x256xbf16, #tpu.memory_space<vmem>>, vector<1x28x256xbf16>
    %15 = vector.shape_cast %14 : vector<1x28x256xbf16> to vector<28x256xbf16>
    %cst_10 = arith.constant dense<0.000000e+00> : vector<192x256xf32>
    %16 = tpu.matmul %13, %15, %cst_10 {dimension_numbers = #tpu.dot_dimension_numbers<[1], [0], [0], [1], [0, 0, 1, 1], [], []>} : vector<192x28xbf16>, vector<28x256xbf16>, vector<192x256xf32> -> vector<192x256xf32>
    %17 = arith.addf %11, %16 : vector<192x256xf32>
    %18 = vector.extract_strided_slice %0 {offsets = [0, 3, 0], sizes = [8, 24, 28], strides = [1, 1, 1]} : vector<8x28x28xbf16> to vector<8x24x28xbf16>
    %19 = vector.shape_cast %18 : vector<8x24x28xbf16> to vector<192x28xbf16>
    %c3 = arith.constant 3 : index
    %c0_11 = arith.constant 0 : index
    %c0_12 = arith.constant 0 : index
    %20 = vector.load %arg2[%c3, %c0_11, %c0_12] : memref<5x28x256xbf16, #tpu.memory_space<vmem>>, vector<1x28x256xbf16>
    %21 = vector.shape_cast %20 : vector<1x28x256xbf16> to vector<28x256xbf16>
    %cst_13 = arith.constant dense<0.000000e+00> : vector<192x256xf32>
    %22 = tpu.matmul %19, %21, %cst_13 {dimension_numbers = #tpu.dot_dimension_numbers<[1], [0], [0], [1], [0, 0, 1, 1], [], []>} : vector<192x28xbf16>, vector<28x256xbf16>, vector<192x256xf32> -> vector<192x256xf32>
    %23 = arith.addf %17, %22 : vector<192x256xf32>
    %24 = vector.extract_strided_slice %0 {offsets = [0, 4, 0], sizes = [8, 24, 28], strides = [1, 1, 1]} : vector<8x28x28xbf16> to vector<8x24x28xbf16>
    %25 = vector.shape_cast %24 : vector<8x24x28xbf16> to vector<192x28xbf16>
    %c4 = arith.constant 4 : index
    %c0_14 = arith.constant 0 : index
    %c0_15 = arith.constant 0 : index
    %26 = vector.load %arg2[%c4, %c0_14, %c0_15] : memref<5x28x256xbf16, #tpu.memory_space<vmem>>, vector<1x28x256xbf16>
    %27 = vector.shape_cast %26 : vector<1x28x256xbf16> to vector<28x256xbf16>
    %cst_16 = arith.constant dense<0.000000e+00> : vector<192x256xf32>
    %28 = tpu.matmul %25, %27, %cst_16 {dimension_numbers = #tpu.dot_dimension_numbers<[1], [0], [0], [1], [0, 0, 1, 1], [], []>} : vector<192x28xbf16>, vector<28x256xbf16>, vector<192x256xf32> -> vector<192x256xf32>
    %29 = arith.addf %23, %28 : vector<192x256xf32>
    %c0_17 = arith.constant 0 : index
    %c0_18 = arith.constant 0 : index
    %30 = vector.load %arg3[%c0_17, %c0_18] : memref<1x256xf32, #tpu.memory_space<vmem>>, vector<1x256xf32>
    %31 = vector.broadcast %30 : vector<1x256xf32> to vector<192x256xf32>
    %32 = arith.addf %29, %31 : vector<192x256xf32>
    %cst_19 = arith.constant 0.000000e+00 : f32
    %33 = vector.broadcast %cst_19 : f32 to vector<192x256xf32>
    %34 = arith.maximumf %32, %33 : vector<192x256xf32>
    %35 = vector.shape_cast %34 : vector<192x256xf32> to vector<96x512xf32>
    %36 = vector.extract_strided_slice %35 {offsets = [0, 0], sizes = [96, 256], strides = [1, 1]} : vector<96x512xf32> to vector<96x256xf32>
    %37 = vector.extract_strided_slice %35 {offsets = [0, 256], sizes = [96, 256], strides = [1, 1]} : vector<96x512xf32> to vector<96x256xf32>
    %38 = arith.maximumf %36, %37 : vector<96x256xf32>
    %39 = vector.extract_strided_slice %38 {offsets = [0, 0], sizes = [96, 128], strides = [1, 1]} : vector<96x256xf32> to vector<96x128xf32>
    %40 = vector.extract_strided_slice %38 {offsets = [0, 128], sizes = [96, 128], strides = [1, 1]} : vector<96x256xf32> to vector<96x128xf32>
    %41 = arith.maximumf %39, %40 : vector<96x128xf32>
    %42 = arith.truncf %41 : vector<96x128xf32> to vector<96x128xbf16>
    %43 = vector.shape_cast %42 : vector<96x128xbf16> to vector<8x12x128xbf16>
    %44 = vector.extract_strided_slice %43 {offsets = [0, 0, 0], sizes = [8, 8, 128], strides = [1, 1, 1]} : vector<8x12x128xbf16> to vector<8x8x128xbf16>
    %45 = vector.shape_cast %44 : vector<8x8x128xbf16> to vector<64x128xbf16>
    %c0_20 = arith.constant 0 : index
    %c0_21 = arith.constant 0 : index
    %c0_22 = arith.constant 0 : index
    %46 = vector.load %arg4[%c0_20, %c0_21, %c0_22] : memref<5x128x256xbf16, #tpu.memory_space<vmem>>, vector<1x128x256xbf16>
    %47 = vector.shape_cast %46 : vector<1x128x256xbf16> to vector<128x256xbf16>
    %cst_23 = arith.constant dense<0.000000e+00> : vector<64x256xf32>
    %48 = tpu.matmul %45, %47, %cst_23 {dimension_numbers = #tpu.dot_dimension_numbers<[1], [0], [0], [1], [0, 0, 1, 1], [], []>} : vector<64x128xbf16>, vector<128x256xbf16>, vector<64x256xf32> -> vector<64x256xf32>
    %49 = vector.extract_strided_slice %43 {offsets = [0, 1, 0], sizes = [8, 8, 128], strides = [1, 1, 1]} : vector<8x12x128xbf16> to vector<8x8x128xbf16>
    %50 = vector.shape_cast %49 : vector<8x8x128xbf16> to vector<64x128xbf16>
    %c1_24 = arith.constant 1 : index
    %c0_25 = arith.constant 0 : index
    %c0_26 = arith.constant 0 : index
    %51 = vector.load %arg4[%c1_24, %c0_25, %c0_26] : memref<5x128x256xbf16, #tpu.memory_space<vmem>>, vector<1x128x256xbf16>
    %52 = vector.shape_cast %51 : vector<1x128x256xbf16> to vector<128x256xbf16>
    %cst_27 = arith.constant dense<0.000000e+00> : vector<64x256xf32>
    %53 = tpu.matmul %50, %52, %cst_27 {dimension_numbers = #tpu.dot_dimension_numbers<[1], [0], [0], [1], [0, 0, 1, 1], [], []>} : vector<64x128xbf16>, vector<128x256xbf16>, vector<64x256xf32> -> vector<64x256xf32>
    %54 = arith.addf %48, %53 : vector<64x256xf32>
    %55 = vector.extract_strided_slice %43 {offsets = [0, 2, 0], sizes = [8, 8, 128], strides = [1, 1, 1]} : vector<8x12x128xbf16> to vector<8x8x128xbf16>
    %56 = vector.shape_cast %55 : vector<8x8x128xbf16> to vector<64x128xbf16>
    %c2_28 = arith.constant 2 : index
    %c0_29 = arith.constant 0 : index
    %c0_30 = arith.constant 0 : index
    %57 = vector.load %arg4[%c2_28, %c0_29, %c0_30] : memref<5x128x256xbf16, #tpu.memory_space<vmem>>, vector<1x128x256xbf16>
    %58 = vector.shape_cast %57 : vector<1x128x256xbf16> to vector<128x256xbf16>
    %cst_31 = arith.constant dense<0.000000e+00> : vector<64x256xf32>
    %59 = tpu.matmul %56, %58, %cst_31 {dimension_numbers = #tpu.dot_dimension_numbers<[1], [0], [0], [1], [0, 0, 1, 1], [], []>} : vector<64x128xbf16>, vector<128x256xbf16>, vector<64x256xf32> -> vector<64x256xf32>
    %60 = arith.addf %54, %59 : vector<64x256xf32>
    %61 = vector.extract_strided_slice %43 {offsets = [0, 3, 0], sizes = [8, 8, 128], strides = [1, 1, 1]} : vector<8x12x128xbf16> to vector<8x8x128xbf16>
    %62 = vector.shape_cast %61 : vector<8x8x128xbf16> to vector<64x128xbf16>
    %c3_32 = arith.constant 3 : index
    %c0_33 = arith.constant 0 : index
    %c0_34 = arith.constant 0 : index
    %63 = vector.load %arg4[%c3_32, %c0_33, %c0_34] : memref<5x128x256xbf16, #tpu.memory_space<vmem>>, vector<1x128x256xbf16>
    %64 = vector.shape_cast %63 : vector<1x128x256xbf16> to vector<128x256xbf16>
    %cst_35 = arith.constant dense<0.000000e+00> : vector<64x256xf32>
    %65 = tpu.matmul %62, %64, %cst_35 {dimension_numbers = #tpu.dot_dimension_numbers<[1], [0], [0], [1], [0, 0, 1, 1], [], []>} : vector<64x128xbf16>, vector<128x256xbf16>, vector<64x256xf32> -> vector<64x256xf32>
    %66 = arith.addf %60, %65 : vector<64x256xf32>
    %67 = vector.extract_strided_slice %43 {offsets = [0, 4, 0], sizes = [8, 8, 128], strides = [1, 1, 1]} : vector<8x12x128xbf16> to vector<8x8x128xbf16>
    %68 = vector.shape_cast %67 : vector<8x8x128xbf16> to vector<64x128xbf16>
    %c4_36 = arith.constant 4 : index
    %c0_37 = arith.constant 0 : index
    %c0_38 = arith.constant 0 : index
    %69 = vector.load %arg4[%c4_36, %c0_37, %c0_38] : memref<5x128x256xbf16, #tpu.memory_space<vmem>>, vector<1x128x256xbf16>
    %70 = vector.shape_cast %69 : vector<1x128x256xbf16> to vector<128x256xbf16>
    %cst_39 = arith.constant dense<0.000000e+00> : vector<64x256xf32>
    %71 = tpu.matmul %68, %70, %cst_39 {dimension_numbers = #tpu.dot_dimension_numbers<[1], [0], [0], [1], [0, 0, 1, 1], [], []>} : vector<64x128xbf16>, vector<128x256xbf16>, vector<64x256xf32> -> vector<64x256xf32>
    %72 = arith.addf %66, %71 : vector<64x256xf32>
    %c0_40 = arith.constant 0 : index
    %c0_41 = arith.constant 0 : index
    %73 = vector.load %arg5[%c0_40, %c0_41] : memref<1x256xf32, #tpu.memory_space<vmem>>, vector<1x256xf32>
    %74 = vector.broadcast %73 : vector<1x256xf32> to vector<64x256xf32>
    %75 = arith.addf %72, %74 : vector<64x256xf32>
    %cst_42 = arith.constant 0.000000e+00 : f32
    %76 = vector.broadcast %cst_42 : f32 to vector<64x256xf32>
    %77 = arith.maximumf %75, %76 : vector<64x256xf32>
    %78 = vector.shape_cast %77 : vector<64x256xf32> to vector<32x512xf32>
    %79 = vector.extract_strided_slice %78 {offsets = [0, 0], sizes = [32, 256], strides = [1, 1]} : vector<32x512xf32> to vector<32x256xf32>
    %80 = vector.extract_strided_slice %78 {offsets = [0, 256], sizes = [32, 256], strides = [1, 1]} : vector<32x512xf32> to vector<32x256xf32>
    %81 = arith.maximumf %79, %80 : vector<32x256xf32>
    %82 = vector.extract_strided_slice %81 {offsets = [0, 0], sizes = [32, 128], strides = [1, 1]} : vector<32x256xf32> to vector<32x128xf32>
    %83 = vector.extract_strided_slice %81 {offsets = [0, 128], sizes = [32, 128], strides = [1, 1]} : vector<32x256xf32> to vector<32x128xf32>
    %84 = arith.maximumf %82, %83 : vector<32x128xf32>
    %85 = vector.shape_cast %84 : vector<32x128xf32> to vector<8x512xf32>
    %86 = arith.truncf %85 : vector<8x512xf32> to vector<8x512xbf16>
    %c0_43 = arith.constant 0 : index
    %c0_44 = arith.constant 0 : index
    %87 = vector.load %arg6[%c0_43, %c0_44] : memref<512x120xbf16, #tpu.memory_space<vmem>>, vector<512x120xbf16>
    %cst_45 = arith.constant dense<0.000000e+00> : vector<8x120xf32>
    %88 = tpu.matmul %86, %87, %cst_45 {dimension_numbers = #tpu.dot_dimension_numbers<[1], [0], [0], [1], [0, 0, 1, 1], [], []>} : vector<8x512xbf16>, vector<512x120xbf16>, vector<8x120xf32> -> vector<8x120xf32>
    %c0_46 = arith.constant 0 : index
    %c0_47 = arith.constant 0 : index
    %89 = vector.load %arg7[%c0_46, %c0_47] : memref<1x120xf32, #tpu.memory_space<vmem>>, vector<1x120xf32>
    %90 = vector.broadcast %89 : vector<1x120xf32> to vector<8x120xf32>
    %91 = arith.addf %88, %90 : vector<8x120xf32>
    %cst_48 = arith.constant 0.000000e+00 : f32
    %92 = vector.broadcast %cst_48 : f32 to vector<8x120xf32>
    %93 = arith.maximumf %91, %92 : vector<8x120xf32>
    %94 = arith.truncf %93 : vector<8x120xf32> to vector<8x120xbf16>
    %c0_49 = arith.constant 0 : index
    %c0_50 = arith.constant 0 : index
    %95 = vector.load %arg8[%c0_49, %c0_50] : memref<120x84xbf16, #tpu.memory_space<vmem>>, vector<120x84xbf16>
    %cst_51 = arith.constant dense<0.000000e+00> : vector<8x84xf32>
    %96 = tpu.matmul %94, %95, %cst_51 {dimension_numbers = #tpu.dot_dimension_numbers<[1], [0], [0], [1], [0, 0, 1, 1], [], []>} : vector<8x120xbf16>, vector<120x84xbf16>, vector<8x84xf32> -> vector<8x84xf32>
    %c0_52 = arith.constant 0 : index
    %c0_53 = arith.constant 0 : index
    %97 = vector.load %arg9[%c0_52, %c0_53] : memref<1x84xf32, #tpu.memory_space<vmem>>, vector<1x84xf32>
    %98 = vector.broadcast %97 : vector<1x84xf32> to vector<8x84xf32>
    %99 = arith.addf %96, %98 : vector<8x84xf32>
    %cst_54 = arith.constant 0.000000e+00 : f32
    %100 = vector.broadcast %cst_54 : f32 to vector<8x84xf32>
    %101 = arith.maximumf %99, %100 : vector<8x84xf32>
    %102 = arith.truncf %101 : vector<8x84xf32> to vector<8x84xbf16>
    %c0_55 = arith.constant 0 : index
    %c0_56 = arith.constant 0 : index
    %103 = vector.load %arg10[%c0_55, %c0_56] : memref<84x10xbf16, #tpu.memory_space<vmem>>, vector<84x10xbf16>
    %cst_57 = arith.constant dense<0.000000e+00> : vector<8x10xf32>
    %104 = tpu.matmul %102, %103, %cst_57 {dimension_numbers = #tpu.dot_dimension_numbers<[1], [0], [0], [1], [0, 0, 1, 1], [], []>} : vector<8x84xbf16>, vector<84x10xbf16>, vector<8x10xf32> -> vector<8x10xf32>
    %c0_58 = arith.constant 0 : index
    %c0_59 = arith.constant 0 : index
    %105 = vector.load %arg11[%c0_58, %c0_59] : memref<1x10xf32, #tpu.memory_space<vmem>>, vector<1x10xf32>
    %106 = vector.broadcast %105 : vector<1x10xf32> to vector<8x10xf32>
    %107 = arith.addf %104, %106 : vector<8x10xf32>
    %c0_60 = arith.constant 0 : index
    %c0_61 = arith.constant 0 : index
    %108 = vector.load %arg12[%c0_60, %c0_61] : memref<8x10xf32, #tpu.memory_space<vmem>>, vector<8x10xf32>
    tpu.vector_store %arg12[%c0_60, %c0_61], %107 {strides = array<i32>} : memref<8x10xf32, #tpu.memory_space<vmem>>, vector<8x10xf32>,
    return
  }
  func.func @transform_0(%arg0: i32) -> (i32, i32, i32) {
    %c0_i32 = arith.constant 0 : i32
    %c0_i32_0 = arith.constant 0 : i32
    %c0_i32_1 = arith.constant 0 : i32
    return %arg0, %c0_i32, %c0_i32_0 : i32, i32, i32
  }
  func.func @transform_1(%arg0: i32) -> (i32, i32, i32) {
    %c0_i32 = arith.constant 0 : i32
    %c0_i32_0 = arith.constant 0 : i32
    %c0_i32_1 = arith.constant 0 : i32
    %c0_i32_2 = arith.constant 0 : i32
    return %c0_i32, %c0_i32_0, %c0_i32_1 : i32, i32, i32
  }
  func.func @transform_2(%arg0: i32) -> (i32, i32) {
    %c0_i32 = arith.constant 0 : i32
    %c0_i32_0 = arith.constant 0 : i32
    %c0_i32_1 = arith.constant 0 : i32
    return %c0_i32, %c0_i32_0 : i32, i32
  }
  func.func @transform_3(%arg0: i32) -> (i32, i32, i32) {
    %c0_i32 = arith.constant 0 : i32
    %c0_i32_0 = arith.constant 0 : i32
    %c0_i32_1 = arith.constant 0 : i32
    %c0_i32_2 = arith.constant 0 : i32
    return %c0_i32, %c0_i32_0, %c0_i32_1 : i32, i32, i32
  }
  func.func @transform_4(%arg0: i32) -> (i32, i32) {
    %c0_i32 = arith.constant 0 : i32
    %c0_i32_0 = arith.constant 0 : i32
    %c0_i32_1 = arith.constant 0 : i32
    return %c0_i32, %c0_i32_0 : i32, i32
  }
  func.func @transform_5(%arg0: i32) -> (i32, i32) {
    %c0_i32 = arith.constant 0 : i32
    %c0_i32_0 = arith.constant 0 : i32
    %c0_i32_1 = arith.constant 0 : i32
    return %c0_i32, %c0_i32_0 : i32, i32
  }
  func.func @transform_6(%arg0: i32) -> (i32, i32) {
    %c0_i32 = arith.constant 0 : i32
    %c0_i32_0 = arith.constant 0 : i32
    %c0_i32_1 = arith.constant 0 : i32
    return %c0_i32, %c0_i32_0 : i32, i32
  }
  func.func @transform_7(%arg0: i32) -> (i32, i32) {
    %c0_i32 = arith.constant 0 : i32
    %c0_i32_0 = arith.constant 0 : i32
    %c0_i32_1 = arith.constant 0 : i32
    return %c0_i32, %c0_i32_0 : i32, i32
  }
  func.func @transform_8(%arg0: i32) -> (i32, i32) {
    %c0_i32 = arith.constant 0 : i32
    %c0_i32_0 = arith.constant 0 : i32
    %c0_i32_1 = arith.constant 0 : i32
    return %c0_i32, %c0_i32_0 : i32, i32
  }
  func.func @transform_9(%arg0: i32) -> (i32, i32) {
    %c0_i32 = arith.constant 0 : i32
    %c0_i32_0 = arith.constant 0 : i32
    %c0_i32_1 = arith.constant 0 : i32
    return %c0_i32, %c0_i32_0 : i32, i32
  }
  func.func @transform_10(%arg0: i32) -> (i32, i32) {
    %c0_i32 = arith.constant 0 : i32
    %c0_i32_0 = arith.constant 0 : i32
    %c0_i32_1 = arith.constant 0 : i32
    return %c0_i32, %c0_i32_0 : i32, i32
  }
  func.func @transform_11(%arg0: i32) -> (i32, i32) {
    %c0_i32 = arith.constant 0 : i32
    %c0_i32_0 = arith.constant 0 : i32
    return %arg0, %c0_i32 : i32, i32
  }
}

</mosaic_0001>

<bundles_post_ra>
// kernel: convnet_forward.1
= control target key start
LH: loop header
LB: loop body
LE: loop exit
PB: predicated region body
PF: predicated region fallthrough
CT: control target
= control target key end

     0   :  { %16 = vsyncpa [#allocation3], 0  ;;  %s6909_s17 = smov [#allocation2]   ;;  %s9914_s0 = inlined_call_operand.vmem [shape: bf16[8,28,28], index: 0, kind: input, shape index: {}]   ;;  %s9915_s1 = inlined_call_operand.hbm [shape: bf16[5,28,256], index: 1, kind: input, shape index: {}]   ;;  %s9916_s2 = inlined_call_operand.vmem [shape: f32[1,256], index: 2, kind: input, shape index: {}]   ;;  %s9917_s3 = inlined_call_operand.vmem [shape: bf16[5,128,256], index: 3, kind: input, shape index: {}]   ;;  %s9918_s4 = inlined_call_operand.vmem [shape: f32[1,256], index: 4, kind: input, shape index: {}]   ;;  %s9919_s5 = inlined_call_operand.vmem [shape: bf16[512,120], index: 5, kind: input, shape index: {}]   ;;  %s9920_s6 = inlined_call_operand.vmem [shape: f32[1,120], index: 6, kind: input, shape index: {}]   ;;  %s9921_s7 = inlined_call_operand.vmem [shape: bf16[120,84], index: 7, kind: input, shape index: {}]   ;;  %s9922_s8 = inlined_call_operand.vmem [shape: f32[1,84], index: 8, kind: input, shape index: {}]   ;;  %s9923_s9 = inlined_call_operand.vmem [shape: bf16[84,10], index: 9, kind: input, shape index: {}]   ;;  %s9924_s10 = inlined_call_operand.vmem [shape: f32[1,10], index: 10, kind: input, shape index: {}]   ;;  %s9925_s11 = inlined_call_operand.vmem [shape: f32[8,10], index: 11, kind: output, shape index: {}]  }
   0x1   :  { %s24_s18 = sshll.u32 %s6909_s17, 4  ;;  %s25_s18 = int_to_ptr.vmem [resolvable:$true] %s24_s18 }
   0x2   :  { %s6895_s19 = scalar_lea.vmem %s25_s18, 2560  ;;  %p6900_p1 = scmp.lt.s32.totalorder %s25_s18, %s25_s18 }
   0x3   :  { %p6896_p0 = scmp.ne.s32.totalorder %s25_s18, %s6895_s19  ;;  %p6901_p2 = scmp.lt.s32.totalorder %s6895_s19, %s6895_s19 }
   0x5   :  { %p6902_p3 = por %p6901_p2, %p6900_p1 }
   0x7   :  { %p6903_p4 = pnand %p6902_p3, %p6896_p0 }
   0x9   :  { %6906 = shalt.err (!%p6903_p4)
}
   0xa   :  { %s6910_s20 = smov 128   ;;  %s6911_s21 = smov 8  }
   0xb   :  { %30 = dma.hbm_to_vmem [thread:$0]  %s9915_s1, 2560, %s25_s18, [#allocation3], %s6910_s20, %s6910_s20, %s6911_s21  }
   0xc   :  { %6907 = dma.done.wait [#allocation3], 2560  }
   0xd   :  { %6908 = vsyncadd [#allocation3], 4294964736  ;;  %v9958_v0 = vmov 0   ;;  %vm460_vm0 = vcmask 1045504   ;;  %vm89_vm1 = vsmask.f32 3328 }
   0xe   :  { %499 = vmatprep.mubr.bf16.mxu0 %v9958_v0  ;;  %772 = vmatprep.mubr.bf16.mxu1 %v9958_v0  ;;  %v6647_v1 = vld [vmem:[#allocation2 + $0x34] ss:$8 sps:$4 sm:$0x3f]   ;;  %v6649_v2 = vld [vmem:[#allocation2 + $0x30] ss:$8 sps:$4 sm:$0x3f]  }
   0xf   :  { %6180 = vmatprep.subr.msk.bf16.mxu0 %vm460_vm0, %v6647_v1  ;;  %v6650_v3 = vld [vmem:[#allocation2 + $0x14] ss:$8 sps:$4 sm:$0x3f]   ;;  %v6652_v4 = vld [vmem:[#allocation2 + $0x10] ss:$8 sps:$4 sm:$0x3f]  }
  0x10   :  { %vm90_vm2 = vsmask.f32 7440  ;;  %v462_v5 = vsel %vm460_vm0, %v6649_v2, 0  ;;  %v6653_v6 = vld [vmem:[#allocation2 + $0x24] ss:$8 sps:$4 sm:$0xff]   ;;  %6209 = vmatprep.subr.msk.bf16.mxu1 %vm460_vm0, %v6650_v3  ;;  %v735_v7 = vsel %vm460_vm0, %v6652_v4, 0 }
  0x11   :  { %480 = vmatpush1.bf16.msra.mxu0 %v462_v5  ;;  %v6655_v8 = vld [vmem:[#allocation2 + $0x20] ss:$8 sps:$4 sm:$0xff]   ;;  %753 = vmatpush1.bf16.msra.mxu1 %v735_v7  ;;  %v6656_v9 = vld [vmem:[#allocation2 + $0x4] ss:$8 sps:$4 sm:$0xff]   ;;  %vm423_vm3 = vcmask 228352   ;;  %vm7017_vm4 = vmor %vm89_vm1, %vm90_vm2  ;;  %vm901_vm8 = vcmask 1042432  }
  0x12   :  { %481 = vmatprep.subr.bf16.mxu0 %v6653_v6  ;;  %v6658_v10 = vld [vmem:[#allocation2] ss:$8 sps:$4 sm:$0xff]   ;;  %v6659_v11 = vld [vmem:[#allocation2 + $0x54] ss:$8 sps:$4 sm:$0x3f]   ;;  %754 = vmatprep.subr.bf16.mxu1 %v6656_v9  ;;  %vm902_vm9 = vcmask 1046532  }
  0x13   :  { %v53_v12 = vld [vmem:[%s9914_s0] sm:$0xf]  ;;  %v54_v13 = vld [vmem:[%s9914_s0 + $0x4] sm:$0xf]  ;;  %v6996_v14 = vld [vmem:[%s9914_s0 + $0x8] sm:$0xf] }
  0x14   :  { %v93_v15 = vshrl.u32 %v53_v12, 16  ;;  %v96_v16 = vshll.u32 %v53_v12, 16  ;;  %v102_v17 = vshll.u32 %v54_v13, 16  ;;  %v106_v18 = vshrl.u32 %v54_v13, 16  ;;  %v7003_v26 = vld [vmem:[%s9914_s0 + $0xc] sm:$0x3]  ;;  %vm7635_vm10 = vmor %vm901_vm8, %vm902_vm9 }
  0x15   :  { %482 = vmatpush1.bf16.msra.mxu0 %v6655_v8  ;;  %755 = vmatpush1.bf16.msra.mxu1 %v6658_v10  ;;  %v112_v19 = vshll.u32 %v6996_v14, 16  ;;  %v6193_v20 = vcombine.low %v53_v12, %v54_v13  ;;  %v6662_v21 = vld [vmem:[#allocation2 + $0x50] ss:$8 sps:$4 sm:$0x3f]   ;;  %v116_v37 = vshrl.u32 %v6996_v14, 16  ;;  %v122_v38 = vshll.u32 %v7003_v26, 16 }
  0x16   :  { %6246 = vmatprep.subr.msk.bf16.mxu0 %vm460_vm0, %v6659_v11  ;;  %v95_v22 = vrot.slane %v93_v15, 4  ;;  %v98_v23 = vrot.slane %v96_v16, 5  ;;  %v104_v24 = vrot.slane %v102_v17, 5  ;;  %v108_v25 = vrot.slane %v106_v18, 4  ;;  %v7012_v30 = vld [vmem:[%s9914_s0 + $0x10] sm:$0xf] }
  0x17   :  { %v7005_v27 = vrot.slane %v93_v15, 5  ;;  %v7007_v28 = vrot.slane %v96_v16, 6  ;;  %v1293_v29 = vrot.slane %v106_v18, 5  ;;  %v114_v33 = vrot.slane %v112_v19, 5  ;;  %v7031_v42 = vld [vmem:[%s9914_s0 + $0x14] sm:$0xf] }
  0x18   :  { %v99_v31 = vor.u32 %v98_v23, %v95_v22  ;;  %v109_v32 = vor.u32 %v108_v25, %v104_v24  ;;  %v1294_v34 = vrot.slane %v102_v17, 6  ;;  %6210 = vmatmul.mubr.msk.bf16.vlgmr.msra.gmra.mxu1 %vm423_vm3, %v6193_v20  ;;  %v127_v43 = vshrl.u32 %v7012_v30, 16  ;;  %v7039_v48 = vld [vmem:[%s9914_s0 + $0x18] sm:$0xf]  ;;  %v7055_v57 = vld [vmem:[%s9914_s0 + $0x1c] sm:$0x3] }
  0x19   :  { %v1291_v36 = vor.u32 %v7007_v28, %v7005_v27  ;;  %782 = vmatprep.mubr.bf16.mxu1 %v9958_v0  ;;  %v1299_v44 = vrot.slane %v112_v19, 6  ;;  %v1080_v45 = vsel %vm460_vm0, %v6662_v21, 0  ;;  %v118_v46 = vrot.slane %v116_v37, 4  ;;  %v7060_v58 = vld [vmem:[%s9914_s0 + $0x20] sm:$0xf] }
  0x1a   :  { %v100_v39 = vrot.slane %v99_v31, 4  ;;  %v110_v40 = vrot.slane %v109_v32, 4  ;;  %v7026_v41 = vor.u32 %v1294_v34, %v1293_v29  ;;  %v130_v47 = vshll.u32 %v7012_v30, 16  ;;  %v7069_v63 = vld [vmem:[%s9914_s0 + $0x24] sm:$0xf] }
  0x1b   :  { %v124_v51 = vrot.slane %v122_v38, 5  ;;  %v129_v52 = vrot.slane %v127_v43, 4  ;;  %v119_v54 = vor.u32 %v118_v46, %v114_v33  ;;  %v136_v56 = vshll.u32 %v7031_v42, 16  ;;  %v6670_v5 = vld [vmem:[#allocation2 + $0x44] ss:$8 sps:$4 sm:$0xff]  }
  0x1c   :  { %v105_v49 = vsel %vm7017_vm4, %v100_v39, %v104_v24  ;;  %v115_v50 = vsel %vm7017_vm4, %v110_v40, %v114_v33  ;;  %v132_v55 = vrot.slane %v130_v47, 5  ;;  %v1298_v59 = vrot.slane %v116_v37, 5  ;;  %v6668_v10 = vld [vmem:[#allocation2 + $0x40] ss:$8 sps:$4 sm:$0xff]   ;;  %v7115_v37 = vld [vmem:[%s9914_s0 + $0x30] sm:$0xf] }
  0x1d   :  { %v6164_v53 = vcombine.low %v105_v49, %v115_v50  ;;  %v6194_v60 = vcombine.low %v6996_v14, %v7012_v30  ;;  %v140_v61 = vshrl.u32 %v7031_v42, 16  ;;  %v146_v62 = vshll.u32 %v7039_v48, 16  ;;  %v7100_v24 = vld [vmem:[%s9914_s0 + $0x28] sm:$0xf] }
  0x1e   :  { %v120_v1 = vrot.slane %v119_v54, 4  ;;  %v133_v2 = vor.u32 %v132_v55, %v129_v52  ;;  %v138_v3 = vrot.slane %v136_v56, 5  ;;  %v150_v4 = vshrl.u32 %v7039_v48, 16  ;;  %v7135_v52 = vld [vmem:[%s9914_s0 + $0x34] sm:$0xf] }
  0x1f   :  { %6181 = vmatmul.mubr.msk.bf16.vlgmr.msra.gmra.mxu0 %vm423_vm3, %v6164_v53  ;;  %v7076_v6 = vor.u32 %v1299_v44, %v1298_v59  ;;  %v142_v7 = vrot.slane %v140_v61, 4  ;;  %v148_v8 = vrot.slane %v146_v62, 5  ;;  %v156_v9 = vshll.u32 %v7055_v57, 16  ;;  %v7144_v59 = vld [vmem:[%s9914_s0 + $0x38] sm:$0xf] }
  0x20   :  { %1098 = vmatpush1.bf16.msra.mxu0 %v1080_v45  ;;  %509 = vmatprep.mubr.bf16.mxu0 %v9958_v0  ;;  %v125_v11 = vsel %vm7017_vm4, %v120_v1, %v124_v51  ;;  %v134_v12 = vrot.slane %v133_v2, 4  ;;  %v152_v13 = vrot.slane %v150_v4, 4  ;;  %v161_v16 = vshrl.u32 %v7060_v58, 16  ;;  %v7130_v51 = vld [vmem:[%s9914_s0 + $0x2c] sm:$0x3] }
  0x21   :  { %6211 = vmatmul.mubr.msk.bf16.gmra.mxu1 %vm423_vm3, %v6194_v60  ;;  %1099 = vmatprep.subr.bf16.mxu0 %v6670_v5  ;;  %v143_v14 = vor.u32 %v142_v7, %v138_v3  ;;  %v158_v15 = vrot.slane %v156_v9, 5  ;;  %v9951_v17 = vshll.u32 %v7060_v58, 16  ;;  %v9948_v20 = vshll.u32 %v7069_v63, 16  ;;  %v6677_v7 = vld [vmem:[#allocation2 + $0x74] ss:$8 sps:$4 sm:$0x3f]  }
  0x22   :  { %792 = vmatprep.mubr.bf16.mxu1 %v9958_v0  ;;  %v139_v18 = vsel %vm7017_vm4, %v134_v12, %v138_v3  ;;  %v153_v19 = vor.u32 %v152_v13, %v148_v8  ;;  %v9950_v21 = vshrl.u32 %v7069_v63, 16  ;;  %v163_v25 = vrot.slane %v161_v16, 4  ;;  %6275 = vmatprep.subr.msk.bf16.mxu1 %vm460_vm0, %v6677_v7  ;;  %v7210_v7 = vld [vmem:[%s9914_s0 + $0x50] sm:$0xf] }
  0x23   :  { %v6165_v22 = vcombine.low %v125_v11, %v139_v18  ;;  %v144_v23 = vrot.slane %v143_v14, 4  ;;  %v166_v29 = vrot.slane %v9951_v17, 5  ;;  %v6195_v32 = vcombine.low %v7031_v42, %v7039_v48  ;;  %v7324_v17 = vld [vmem:[%s9914_s0 + $0x68] sm:$0xf] }
  0x24   :  { %1100 = vmatpush1.bf16.msra.mxu0 %v6668_v10  ;;  %v154_v31 = vrot.slane %v153_v19, 4  ;;  %v172_v33 = vrot.slane %v9948_v20, 5  ;;  %v176_v34 = vrot.slane %v9950_v21, 4  ;;  %v9943_v40 = vshrl.u32 %v7100_v24, 16 }
  0x25   :  { %v167_v39 = vor.u32 %v166_v29, %v163_v25  ;;  %v9942_v45 = vshll.u32 %v7100_v24, 16  ;;  %v149_v46 = vsel %vm7017_vm4, %v144_v23, %v148_v8  ;;  %v9935_v50 = vshrl.u32 %v7115_v37, 16  ;;  %v7170_v23 = vld [vmem:[%s9914_s0 + $0x40] sm:$0xf] }
  0x26   :  { %v177_v44 = vor.u32 %v176_v34, %v172_v33  ;;  %v159_v49 = vsel %vm7017_vm4, %v154_v31, %v158_v15  ;;  %v9934_v53 = vshll.u32 %v7115_v37, 16  ;;  %v186_v55 = vrot.slane %v9943_v40, 4  ;;  %v6683_v25 = vld [vmem:[#allocation2 + $0x94] ss:$8 sps:$4 sm:$0x3f]  }
  0x27   :  { %6182 = vmatmul.mubr.msk.bf16.gmra.mxu0 %vm423_vm3, %v6165_v22  ;;  %v168_v54 = vrot.slane %v167_v39, 4  ;;  %v6166_v60 = vcombine.low %v149_v46, %v159_v49  ;;  %v182_v2 = vrot.slane %v9942_v45, 5  ;;  %v197_v3 = vrot.slane %v9935_v50, 4  ;;  %v7185_v34 = vld [vmem:[%s9914_s0 + $0x44] sm:$0xf]  ;;  %6312 = vmatprep.subr.msk.bf16.mxu0 %vm460_vm0, %v6683_v25 }
  0x28   :  { %519 = vmatprep.mubr.bf16.mxu0 %v9958_v0  ;;  %v178_v1 = vrot.slane %v177_v44, 4  ;;  %v200_v5 = vrot.slane %v9934_v53, 5  ;;  %v6196_v8 = vcombine.low %v7060_v58, %v7069_v63  ;;  %v9941_v12 = vshll.u32 %v7130_v51, 16 }
  0x29   :  { %6212 = vmatmul.mubr.msk.bf16.gmra.mxu1 %vm423_vm3, %v6195_v32  ;;  %v173_v10 = vsel %vm7017_vm4, %v168_v54, %v172_v33  ;;  %v187_v11 = vor.u32 %v186_v55, %v182_v2  ;;  %v9932_v13 = vshll.u32 %v7135_v52, 16  ;;  %v9933_v15 = vshrl.u32 %v7135_v52, 16  ;;  %v7180_v33 = vld [vmem:[%s9914_s0 + $0x3c] sm:$0x3] }
  0x2a   :  { %802 = vmatprep.mubr.bf16.mxu1 %v9958_v0  ;;  %v183_v14 = vsel %vm7017_vm4, %v178_v1, %v182_v2  ;;  %v9930_v18 = vshll.u32 %v7144_v59, 16  ;;  %v9931_v19 = vshrl.u32 %v7144_v59, 16  ;;  %v201_v22 = vor.u32 %v200_v5, %v197_v3  ;;  %v7205_v5 = vld [vmem:[%s9914_s0 + $0x48] sm:$0xf] }
  0x2b   :  { %v6167_v29 = vcombine.low %v173_v10, %v183_v14  ;;  %v192_v31 = vrot.slane %v9941_v12, 5  ;;  %v206_v32 = vrot.slane %v9932_v13, 5  ;;  %v188_v39 = vrot.slane %v187_v11, 4 }
  0x2c   :  { %v210_v44 = vrot.slane %v9933_v15, 4  ;;  %v7191_v46 = vrot.slane %v9930_v18, 5  ;;  %v220_v49 = vrot.slane %v9931_v19, 4  ;;  %v202_v54 = vrot.slane %v201_v22, 4 }
  0x2d   :  { %v9929_v55 = vshrl.u32 %v7170_v23, 16  ;;  %v6197_v1 = vcombine.low %v7100_v24, %v7115_v37  ;;  %v9927_v2 = vshll.u32 %v7185_v34, 16  ;;  %v9928_v3 = vshrl.u32 %v7185_v34, 16 }
  0x2e   :  { %vm1286_vm5 = vsmask.f32 2304  ;;  %v211_v10 = vor.u32 %v210_v44, %v206_v32  ;;  %v9940_v11 = vshll.u32 %v7180_v33, 16  ;;  %vm1287_vm6 = vsmask.f32 6416 }
  0x2f   :  { %6183 = vmatmul.mubr.msk.bf16.gmra.mxu0 %vm423_vm3, %v6166_v60  ;;  %v9926_v60 = vshll.u32 %v7170_v23, 16  ;;  %v207_v14 = vsel %vm7017_vm4, %v202_v54, %v206_v32  ;;  %v221_v22 = vor.u32 %v220_v49, %v7191_v46  ;;  %v231_v25 = vrot.slane %v9929_v55, 4  ;;  %vm7283_vm7 = vmor %vm1286_vm5, %vm1287_vm6 }
  0x30   :  { %529 = vmatprep.mubr.bf16.mxu0 %v9958_v0  ;;  %v9939_v44 = vshrl.u32 %v7205_v5, 16  ;;  %v9937_v32 = vshrl.u32 %v7210_v7, 16  ;;  %v9936_v49 = vshll.u32 %v7210_v7, 16  ;;  %v212_v55 = vrot.slane %v211_v10, 4 }
  0x31   :  { %6213 = vmatmul.mubr.msk.bf16.gmra.mxu1 %vm423_vm3, %v6196_v8  ;;  %v193_v8 = vsel %vm7017_vm4, %v188_v39, %v192_v31  ;;  %v7227_v31 = vrot.slane %v9927_v2, 5  ;;  %v244_v39 = vrot.slane %v9928_v3, 4  ;;  %v7244_v2 = vld [vmem:[%s9914_s0 + $0x54] sm:$0xf]  ;;  %v7249_v3 = vld [vmem:[%s9914_s0 + $0x58] sm:$0xf] }
  0x32   :  { %812 = vmatprep.mubr.bf16.mxu1 %v9958_v0  ;;  %v6168_v54 = vcombine.low %v193_v8, %v207_v14  ;;  %v222_v18 = vrot.slane %v221_v22, 4  ;;  %v226_v8 = vrot.slane %v9940_v11, 5  ;;  %v6198_v14 = vcombine.low %v7135_v52, %v7144_v59 }
  0x33   :  { %v245_v13 = vor.u32 %v244_v39, %v7227_v31  ;;  %v254_v15 = vrot.slane %v9939_v44, 4  ;;  %v265_v53 = vrot.slane %v9937_v32, 4  ;;  %v268_v50 = vrot.slane %v9936_v49, 5  ;;  %v7271_v39 = vld [vmem:[%s9914_s0 + $0x60] sm:$0xf] }
  0x34   :  { %v9946_v10 = vshrl.u32 %v7244_v2, 16  ;;  %v217_v49 = vsel %vm7017_vm4, %v212_v55, %v7191_v46  ;;  %v7783_v44 = vld [vmem:[%s9914_s0 + $0x28] sm:$0xf]  ;;  %vm1751_vm11 = vcmask 1041408   ;;  %vm1752_vm12 = vcmask 1045508  }
  0x35   :  { %v246_v12 = vrot.slane %v245_v13, 4  ;;  %v269_v46 = vor.u32 %v268_v50, %v265_v53  ;;  %v6199_v50 = vcombine.low %v7170_v23, %v7185_v34  ;;  %vm7963_vm13 = vmor %vm1751_vm11, %vm1752_vm12  ;;  %vm3502_vm14 = vsmask.f32 1280 }
  0x36   :  { %vm3503_vm15 = vsmask.f32 3336  ;;  %vm3507_vm1 = vsmask.f32 7448  ;;  %vm4489_vm2 = vsmask.f32 256 }
  0x37   :  { %6184 = vmatmul.mubr.msk.bf16.gmra.mxu0 %vm423_vm3, %v6167_v29  ;;  %v234_v29 = vrot.slane %v9926_v60, 5  ;;  %v9938_v60 = vshll.u32 %v7205_v5, 16  ;;  %v270_v20 = vrot.slane %v269_v46, 4  ;;  %v6680_v46 = vld [vmem:[#allocation2 + $0x60] ss:$8 sps:$4 sm:$0xff]   ;;  %vm3504_vm5 = vmor %vm3502_vm14, %vm3503_vm15  ;;  %vm4169_vm14 = vcmask 1042434  }
  0x38   :  { %539 = vmatprep.mubr.bf16.mxu0 %v9958_v0  ;;  %vm4494_vm6 = vsmask.f32 6424 }
  0x39   :  { %6214 = vmatmul.mubr.msk.bf16.gmra.mxu1 %vm423_vm3, %v6197_v1  ;;  %v7239_v1 = vld [vmem:[%s9914_s0 + $0x4c] sm:$0x3]  ;;  %v235_v19 = vor.u32 %v234_v29, %v231_v25  ;;  %v250_v22 = vrot.slane %v9938_v60, 5  ;;  %v9944_v25 = vshll.u32 %v7249_v3, 16  ;;  %v9945_v29 = vshrl.u32 %v7249_v3, 16 }
  0x3a   :  { %822 = vmatprep.mubr.bf16.mxu1 %v9958_v0  ;;  %v9947_v32 = vshll.u32 %v7239_v1, 16  ;;  %v9949_v60 = vshll.u32 %v7244_v2, 16 }
  0x3b   :  { %v236_v11 = vrot.slane %v235_v19, 4  ;;  %v255_v45 = vor.u32 %v254_v15, %v250_v22  ;;  %v7298_v40 = vrot.slane %v9944_v25, 5  ;;  %v288_v13 = vrot.slane %v9945_v29, 4  ;;  %v6679_v15 = vld [vmem:[#allocation2 + $0x70] ss:$8 sps:$4 sm:$0x3f]  }
  0x3c   :  { %v260_v53 = vrot.slane %v9947_v32, 5  ;;  %v274_v19 = vrot.slane %v9949_v60, 5  ;;  %v251_v25 = vsel %vm7017_vm4, %v246_v12, %v250_v22  ;;  %v6682_v32 = vld [vmem:[#allocation2 + $0x64] ss:$8 sps:$4 sm:$0xff]  }
  0x3d   :  { %v256_v29 = vrot.slane %v255_v45, 4  ;;  %v289_v45 = vor.u32 %v288_v13, %v7298_v40 }
  0x3f   :  { %6185 = vmatmul.mubr.msk.bf16.gmra.mxu0 %vm423_vm3, %v6168_v54  ;;  %v227_v54 = vsel %vm7017_vm4, %v222_v18, %v226_v8  ;;  %v278_v18 = vrot.slane %v9946_v10, 4  ;;  %v7294_v8 = vld [vmem:[%s9914_s0 + $0x5c] sm:$0x3]  ;;  %v9952_v10 = vshll.u32 %v7271_v39, 16 }
  0x40   :  { %549 = vmatprep.mubr.bf16.mxu0 %v9958_v0  ;;  %v6169_v55 = vcombine.low %v217_v49, %v227_v54  ;;  %v7311_v49 = vld [vmem:[%s9914_s0 + $0x64] sm:$0xf]  ;;  %v241_v54 = vsel %vm7017_vm4, %v236_v11, %v7227_v31  ;;  %v292_v21 = vshll.u32 %v7294_v8, 16  ;;  %v1292_v11 = vrot.slane %v1291_v36, 4  ;;  %v7344_v36 = vld [vmem:[%s9914_s0 + $0x6c] sm:$0x3] }
  0x41   :  { %6215 = vmatmul.mubr.msk.bf16.gmra.mxu1 %vm423_vm3, %v6198_v14  ;;  %v9953_v14 = vshrl.u32 %v7271_v39, 16  ;;  %v279_v60 = vor.u32 %v278_v18, %v274_v19  ;;  %v1297_v31 = vrot.slane %v7026_v41, 4  ;;  %v6170_v12 = vcombine.low %v241_v54, %v251_v25 }
  0x42   :  { %832 = vmatprep.mubr.bf16.mxu1 %v9958_v0  ;;  %v261_v18 = vsel %vm7017_vm4, %v256_v29, %v260_v53  ;;  %v302_v27 = vrot.slane %v9952_v10, 5  ;;  %v9957_v28 = vshll.u32 %v7311_v49, 16  ;;  %v1545_v25 = vsel %vm460_vm0, %v6679_v15, 0  ;;  %v7357_v10 = vld [vmem:[%s9914_s0 + $0x70] sm:$0xf] }
  0x43   :  { %v299_v22 = vrot.slane %v9953_v14, 4  ;;  %v280_v13 = vrot.slane %v279_v60, 4  ;;  %v294_v29 = vrot.slane %v292_v21, 5  ;;  %1563 = vmatpush1.bf16.msra.mxu1 %v1545_v25  ;;  %v290_v53 = vrot.slane %v289_v45, 4 }
  0x44   :  { %v9954_v54 = vshll.u32 %v7324_v17, 16  ;;  %1564 = vmatprep.subr.bf16.mxu1 %v6682_v32  ;;  %v1301_v60 = vsel %vm7283_vm7, %v1297_v31, %v7076_v6  ;;  %v6200_v15 = vcombine.low %v7205_v5, %v7210_v7  ;;  %v7371_v25 = vrot.slane %v9957_v28, 5 }
  0x45   :  { %v303_v45 = vor.u32 %v302_v27, %v299_v22  ;;  %v9956_v31 = vshll.u32 %v7344_v36, 16  ;;  %v285_v22 = vsel %vm7017_vm4, %v280_v13, %v7298_v40  ;;  %v295_v27 = vsel %vm7017_vm4, %v290_v53, %v294_v29 }
  0x46   :  { %v1309_v40 = vrot.slane %v127_v43, 5  ;;  %v1310_v29 = vrot.slane %v130_v47, 6  ;;  %v1313_v53 = vrot.slane %v140_v61, 5  ;;  %v1302_v43 = vrot.slane %v7076_v6, 4 }
  0x47   :  { %6186 = vmatmul.mubr.msk.bf16.gmra.mxu0 %vm423_vm3, %v6169_v55  ;;  %v275_v55 = vsel %vm7017_vm4, %v270_v20, %v274_v19  ;;  %v1296_v20 = vsel %vm7283_vm7, %v1292_v11, %v7026_v41  ;;  %v6201_v19 = vcombine.low %v7244_v2, %v7249_v3  ;;  %v6202_v41 = vcombine.low %v7271_v39, %v7311_v49 }
  0x48   :  { %559 = vmatprep.mubr.bf16.mxu0 %v9958_v0  ;;  %v7373_v32 = vcombine.low %v1296_v20, %v1301_v60  ;;  %v6171_v14 = vcombine.low %v261_v18, %v275_v55  ;;  %v9955_v11 = vshrl.u32 %v7324_v17, 16  ;;  %1565 = vmatpush1.bf16.msra.mxu1 %v6680_v46  ;;  %v7389_v55 = vrot.slane %v9954_v54, 5 }
  0x49   :  { %6216 = vmatmul.mubr.msk.bf16.gmra.mxu1 %vm423_vm3, %v6199_v50  ;;  %v310_v50 = vshrl.u32 %v7311_v49, 16  ;;  %v331_v46 = vshrl.u32 %v7357_v10, 16  ;;  %v1306_v20 = vrot.slane %v122_v38, 6  ;;  %v7399_v13 = vrot.slane %v303_v45, 4 }
  0x4a   :  { %842 = vmatprep.mubr.bf16.mxu1 %v9958_v0  ;;  %v1314_v60 = vrot.slane %v136_v56, 6  ;;  %v7415_v38 = vrot.slane %v9955_v11, 4  ;;  %v7419_v30 = vrot.slane %v9956_v31, 5  ;;  %v1311_v42 = vor.u32 %v1310_v29, %v1309_v40 }
  0x4b   :  { %v312_v18 = vrot.slane %v310_v50, 4  ;;  %v1318_v61 = vrot.slane %v150_v4, 5  ;;  %v7429_v54 = vrot.slane %v331_v46, 4  ;;  %v1323_v31 = vshrl.u32 %v7055_v57, 16 }
  0x4c   :  { %v1315_v56 = vor.u32 %v1314_v60, %v1313_v53  ;;  %v1312_v28 = vrot.slane %v1311_v42, 4  ;;  %v1326_v40 = vrot.slane %v156_v9, 6  ;;  %v6172_v29 = vcombine.low %v285_v22, %v295_v27 }
  0x4d   :  { %v313_v45 = vor.u32 %v312_v18, %v7371_v25  ;;  %v334_v4 = vshll.u32 %v7357_v10, 16  ;;  %v9967_v53 = vshll.u32 %v7060_v58, 16  ;;  %v9969_v42 = vshll.u32 %v7069_v63, 16 }
  0x4e   :  { %v1317_v6 = vrot.slane %v1315_v56, 4  ;;  %v1316_v57 = vsel %vm7283_vm7, %v1312_v28, %v1315_v56  ;;  %v1329_v28 = vrot.slane %v161_v16, 5  ;;  %v9970_v58 = vshrl.u32 %v7100_v24, 16 }
  0x4f   :  { %6187 = vmatmul.mubr.msk.bf16.gmra.mxu0 %vm423_vm3, %v6170_v12  ;;  %v1303_v12 = vshrl.u32 %v7003_v26, 16  ;;  %v7411_v26 = vld [vmem:[%s9914_s0 + $0x74] sm:$0xf]  ;;  %v1330_v60 = vrot.slane %v9967_v53, 6  ;;  %v1334_v56 = vrot.slane %v9969_v42, 6  ;;  %v1343_v53 = vshrl.u32 %v7130_v51, 16 }
  0x50   :  { %569 = vmatprep.mubr.bf16.mxu0 %v9958_v0  ;;  %v340_v18 = vshll.u32 %v7411_v26, 16  ;;  %v1338_v16 = vrot.slane %v9970_v58, 5  ;;  %v9973_v42 = vshrl.u32 %v7115_v37, 16 }
  0x51   :  { %6217 = vmatmul.mubr.msk.bf16.gmra.mxu1 %vm423_vm3, %v6200_v15  ;;  %v1305_v47 = vrot.slane %v1303_v12, 5  ;;  %v1319_v15 = vrot.slane %v146_v62, 6  ;;  %v1325_v62 = vrot.slane %v1323_v31, 5 }
  0x52   :  { %852 = vmatprep.mubr.bf16.mxu1 %v9958_v0 }
  0x53   :  { %v1307_v11 = vor.u32 %v1306_v20, %v1305_v47  ;;  %v1320_v12 = vor.u32 %v1319_v15, %v1318_v61  ;;  %v7442_v20 = vld [vmem:[%s9914_s0 + $0x78] sm:$0xf]  ;;  %v1327_v27 = vor.u32 %v1326_v40, %v1325_v62  ;;  %v1331_v15 = vor.u32 %v1330_v60, %v1329_v28 }
  0x54   :  { %v6203_v40 = vcombine.low %v7324_v17, %v7357_v10  ;;  %v354_v28 = vshrl.u32 %v7442_v20, 16  ;;  %v9972_v60 = vshll.u32 %v7130_v51, 16  ;;  %v1345_v51 = vrot.slane %v1343_v53, 5 }
  0x55   :  { %v1308_v48 = vsel %vm7283_vm7, %v1302_v43, %v1307_v11  ;;  %v7448_v9 = vsel %vm7283_vm7, %v1317_v6, %v1320_v12  ;;  %v1322_v22 = vrot.slane %v1320_v12, 4  ;;  %v314_v11 = vrot.slane %v313_v45, 4 }
  0x56   :  { %v7455_v31 = vcombine.low %v1308_v48, %v1316_v57  ;;  %v9968_v43 = vshrl.u32 %v7069_v63, 16  ;;  %v9971_v45 = vshll.u32 %v7100_v24, 16  ;;  %v7484_v12 = vrot.slane %v340_v18, 5 }
  0x57   :  { %6188 = vmatmul.mubr.msk.bf16.gmra.mxu0 %vm423_vm3, %v6171_v14  ;;  %v309_v14 = vsel %vm7017_vm4, %v7399_v13, %v7371_v25  ;;  %v323_v25 = vor.u32 %v7415_v38, %v7389_v55  ;;  %v344_v13 = vshrl.u32 %v7411_v26, 16  ;;  %v336_v38 = vrot.slane %v334_v4, 5 }
  0x58   :  { %579 = vmatprep.mubr.bf16.mxu0 %v9958_v0  ;;  %v1333_v47 = vrot.slane %v9968_v43, 5  ;;  %v1339_v6 = vrot.slane %v9971_v45, 6  ;;  %v350_v48 = vshll.u32 %v7442_v20, 16  ;;  %v319_v62 = vsel %vm7017_vm4, %v314_v11, %v7389_v55 }
  0x59   :  { %6218 = vmatmul.mubr.msk.bf16.gmra.mxu1 %vm423_vm3, %v6201_v19  ;;  %v7472_v19 = vsel %vm7283_vm7, %v1322_v22, %v1327_v27  ;;  %v1332_v57 = vrot.slane %v1331_v15, 4  ;;  %v346_v27 = vrot.slane %v344_v13, 4  ;;  %v1346_v43 = vrot.slane %v9972_v60, 6 }
  0x5a   :  { %862 = vmatprep.mubr.bf16.mxu1 %v9958_v0  ;;  %v1335_v63 = vor.u32 %v1334_v56, %v1333_v47  ;;  %v1340_v24 = vor.u32 %v1339_v6, %v1338_v16  ;;  %v1349_v56 = vrot.slane %v9973_v42, 5  ;;  %v337_v58 = vor.u32 %v336_v38, %v7429_v54  ;;  %v7518_v6 = vld [vmem:[%s9914_s0 + $0x7c] sm:$0x3] }
  0x5b   :  { %v9974_v15 = vshll.u32 %v7115_v37, 16  ;;  %v6173_v45 = vcombine.low %v309_v14, %v319_v62  ;;  %v9975_v54 = vshrl.u32 %v7135_v52, 16  ;;  %v7527_v37 = vrot.slane %v350_v48, 5 }
  0x5c   :  { %v1337_v22 = vrot.slane %v1335_v63, 4  ;;  %v1336_v47 = vsel %vm7283_vm7, %v1332_v57, %v1335_v63  ;;  %v1342_v11 = vrot.slane %v1340_v24, 4  ;;  %v324_v63 = vrot.slane %v323_v25, 4 }
  0x5d   :  { %v1353_v38 = vrot.slane %v9975_v54, 5  ;;  %v9976_v57 = vshll.u32 %v7135_v52, 16  ;;  %v1347_v14 = vor.u32 %v1346_v43, %v1345_v51  ;;  %v9978_v60 = vshll.u32 %v7144_v59, 16 }
  0x5e   :  { %v1341_v55 = vsel %vm7283_vm7, %v1337_v22, %v1340_v24  ;;  %v9977_v24 = vshrl.u32 %v7144_v59, 16  ;;  %v1363_v52 = vshrl.u32 %v7180_v33, 16  ;;  %v347_v42 = vor.u32 %v346_v27, %v7484_v12 }
  0x5f   :  { %6189 = vmatmul.mubr.msk.bf16.gmra.mxu0 %vm423_vm3, %v6172_v29  ;;  %v7507_v16 = vcombine.low %v1336_v47, %v1341_v55  ;;  %v1350_v29 = vrot.slane %v9974_v15, 6  ;;  %v1354_v22 = vrot.slane %v9976_v57, 6  ;;  %v1359_v47 = vrot.slane %v9978_v60, 6 }
  0x60   :  { %589 = vmatprep.mubr.bf16.mxu0 %v9958_v0  ;;  %v1358_v53 = vrot.slane %v9977_v24, 5  ;;  %v338_v55 = vrot.slane %v337_v58, 4  ;;  %v1348_v15 = vsel %vm7283_vm7, %v1342_v11, %v1347_v14  ;;  %v1365_v43 = vrot.slane %v1363_v52, 5 }
  0x61   :  { %6219 = vmatmul.mubr.msk.bf16.gmra.mxu1 %vm423_vm3, %v6202_v41  ;;  %v356_v41 = vrot.slane %v354_v28, 4  ;;  %v1351_v25 = vor.u32 %v1350_v29, %v1349_v56  ;;  %v1355_v62 = vor.u32 %v1354_v22, %v1353_v38  ;;  %v9979_v56 = vshll.u32 %v7180_v33, 16 }
  0x62   :  { %872 = vmatprep.mubr.bf16.mxu1 %v9958_v0  ;;  %v1360_v61 = vor.u32 %v1359_v47, %v1358_v53  ;;  %v360_v29 = vshll.u32 %v7518_v6, 16  ;;  %v329_v27 = vsel %vm7017_vm4, %v324_v63, %v7419_v30  ;;  %v343_v33 = vsel %vm7017_vm4, %v338_v55, %v7484_v12 }
  0x63   :  { %v1352_v54 = vrot.slane %v1351_v25, 4  ;;  %v1357_v57 = vrot.slane %v1355_v62, 4  ;;  %v1366_v51 = vrot.slane %v9979_v56, 6  ;;  %v348_v22 = vrot.slane %v347_v42, 4 }
  0x64   :  { %v1362_v38 = vrot.slane %v1360_v61, 4  ;;  %v9980_v30 = vshrl.u32 %v7170_v23, 16  ;;  %v9981_v25 = vshll.u32 %v7170_v23, 16  ;;  %v9983_v53 = vshll.u32 %v7185_v34, 16 }
  0x65   :  { %v1356_v59 = vsel %vm7283_vm7, %v1352_v54, %v1355_v62  ;;  %v7552_v11 = vsel %vm7283_vm7, %v1357_v57, %v1360_v61  ;;  %v1367_v14 = vor.u32 %v1366_v51, %v1365_v43  ;;  %v9982_v61 = vshrl.u32 %v7185_v34, 16 }
  0x66   :  { %v7548_v58 = vcombine.low %v1348_v15, %v1356_v59  ;;  %v1369_v63 = vrot.slane %v9980_v30, 5  ;;  %v1370_v62 = vrot.slane %v9981_v25, 6  ;;  %v1374_v60 = vrot.slane %v9983_v53, 6 }
  0x67   :  { %6190 = vmatmul.mubr.msk.bf16.gmra.mxu0 %vm423_vm3, %v6173_v45  ;;  %v357_v45 = vor.u32 %v356_v41, %v7527_v37  ;;  %v1373_v24 = vrot.slane %v9982_v61, 5  ;;  %v7571_v12 = vsel %vm7283_vm7, %v1362_v38, %v1367_v14  ;;  %v9985_v47 = vshll.u32 %v7205_v5, 16 }
  0x68   :  { %599 = vmatprep.mubr.bf16.mxu0 %v9958_v0  ;;  %v6174_v23 = vcombine.low %v329_v27, %v343_v33  ;;  %v6264_v55 = vcombine.low %v7552_v11, %v7571_v12  ;;  %v1371_v42 = vor.u32 %v1370_v62, %v1369_v63  ;;  %v362_v54 = vrot.slane %v360_v29, 5  ;;  %v7590_v27 = vld [vmem:[%s9914_s0 + $0x4] sm:$0xf] }
  0x69   :  { %6220 = vmatmul.mubr.msk.bf16.gmra.mxu1 %vm423_vm3, %v6203_v40  ;;  %v9984_v40 = vshrl.u32 %v7205_v5, 16  ;;  %v1379_v52 = vrot.slane %v9985_v47, 6  ;;  %v1375_v15 = vor.u32 %v1374_v60, %v1373_v24  ;;  %v358_v34 = vrot.slane %v357_v45, 4 }
  0x6a   :  { %882 = vmatprep.mubr.bf16.mxu1 %v9958_v0  ;;  %v6204_v43 = vcombine.low %v7411_v26, %v7442_v20  ;;  %v1372_v56 = vrot.slane %v1371_v42, 4  ;;  %v1383_v5 = vshrl.u32 %v7239_v1, 16  ;;  %v353_v59 = vsel %vm7017_vm4, %v348_v22, %v7527_v37 }
  0x6b   :  { %v1378_v41 = vrot.slane %v9984_v40, 5  ;;  %v1377_v51 = vrot.slane %v1375_v15, 4  ;;  %v906_v38 = vrot.slane %v7590_v27, 5  ;;  %v9986_v33 = vshll.u32 %v7239_v1, 16  ;;  %v7615_v40 = vld [vmem:[%s9914_s0] sm:$0xf] }
  0x6c   :  { %v9987_v14 = vshrl.u32 %v7210_v7, 16  ;;  %v1376_v63 = vsel %vm7283_vm7, %v1372_v56, %v1375_v15  ;;  %v1385_v25 = vrot.slane %v1383_v5, 5  ;;  %v363_v62 = vsel %vm7017_vm4, %v358_v34, %v362_v54 }
  0x6d   :  { %v1380_v57 = vor.u32 %v1379_v52, %v1378_v41  ;;  %v1386_v45 = vrot.slane %v9986_v33, 6  ;;  %v9988_v61 = vshll.u32 %v7210_v7, 16  ;;  %v9989_v53 = vshrl.u32 %v7244_v2, 16  ;;  %v7623_v7 = vld [vmem:[%s9914_s0 + $0x8] sm:$0xf] }
  0x6e   :  { %v1389_v30 = vrot.slane %v9987_v14, 5  ;;  %v6222_v41 = vrot.slane %v7615_v40, 9  ;;  %v9990_v47 = vshll.u32 %v7244_v2, 16  ;;  %v9991_v15 = vshrl.u32 %v7249_v3, 16 }
  0x6f   :  { %6191 = vmatmul.mubr.msk.bf16.gmra.mxu0 %vm423_vm3, %v6174_v23  ;;  %v1381_v37 = vsel %vm7283_vm7, %v1377_v51, %v1380_v57  ;;  %v1382_v22 = vrot.slane %v1380_v57, 4  ;;  %v1390_v24 = vrot.slane %v9988_v61, 6  ;;  %v1393_v60 = vrot.slane %v9989_v53, 5 }
  0x70   :  { %609 = vmatprep.mubr.bf16.mxu0 %v9958_v0  ;;  %v7605_v1 = vcombine.low %v1376_v63, %v1381_v37  ;;  %v1387_v35 = vor.u32 %v1386_v45, %v1385_v25  ;;  %v1394_v52 = vrot.slane %v9990_v47, 6  ;;  %v909_v23 = vrot.slane %v7623_v7, 5 }
  0x71   :  { %6221 = vmatmul.mubr.msk.bf16.gmra.mxu1 %vm423_vm3, %v6204_v43  ;;  %v1391_v42 = vor.u32 %v1390_v24, %v1389_v30  ;;  %v1398_v34 = vrot.slane %v9991_v15, 5  ;;  %v9992_v54 = vshll.u32 %v7249_v3, 16  ;;  %v6175_v43 = vcombine.low %v353_v59, %v363_v62  ;;  %v6685_v59 = vld [vmem:[#allocation2 + $0x90] ss:$8 sps:$4 sm:$0x3f]  }
  0x72   :  { %1582 = vmatprep.mubr.bf16.mxu1 %v9958_v0  ;;  %v908_v56 = vrot.slane %v906_v38, 4  ;;  %v1388_v2 = vsel %vm7283_vm7, %v1382_v22, %v1387_v35  ;;  %v1395_v51 = vor.u32 %v1394_v52, %v1393_v60  ;;  %v1403_v14 = vshrl.u32 %v7294_v8, 16 }
  0x73   :  { %v1399_v57 = vrot.slane %v9992_v54, 6  ;;  %v1392_v33 = vrot.slane %v1391_v42, 4  ;;  %v1406_v3 = vrot.slane %v292_v21, 6  ;;  %v907_v25 = vsel %vm7635_vm10, %v6222_v41, %v906_v38 }
  0x74   :  { %v1397_v30 = vrot.slane %v1395_v51, 4  ;;  %v1405_v22 = vrot.slane %v1403_v14, 5  ;;  %v910_v21 = vsel %vm7635_vm10, %v908_v56, %v909_v23  ;;  %v9995_v53 = vshrl.u32 %v7271_v39, 16  ;;  %v7687_v14 = vld [vmem:[%s9914_s0 + $0x10] sm:$0xf] }
  0x75   :  { %v1400_v45 = vor.u32 %v1399_v57, %v1398_v34  ;;  %v1396_v63 = vsel %vm7283_vm7, %v1392_v33, %v1395_v51  ;;  %v9996_v35 = vshll.u32 %v7271_v39, 16  ;;  %v1413_v38 = vrot.slane %v310_v50, 5  ;;  %v7673_v39 = vld [vmem:[%s9914_s0 + $0xc] sm:$0x3] }
  0x76   :  { %v7647_v62 = vcombine.low %v1388_v2, %v1396_v63  ;;  %v1407_v24 = vor.u32 %v1406_v3, %v1405_v22  ;;  %v1409_v60 = vrot.slane %v9995_v53, 5  ;;  %v9997_v41 = vshll.u32 %v7311_v49, 16  ;;  %v6688_v2 = vld [vmem:[#allocation2 + $0x84] ss:$8 sps:$4 sm:$0xff]   ;;  %v7699_v22 = vld [vmem:[%s9914_s0 + $0x18] sm:$0xf] }
  0x77   :  { %v1402_v37 = vrot.slane %v1400_v45, 4  ;;  %6192 = vmatmul.mubr.msk.bf16.gmra.mxu0 %vm423_vm3, %v6175_v43  ;;  %v7651_v61 = vsel %vm7283_vm7, %v1397_v30, %v1400_v45  ;;  %v1410_v47 = vrot.slane %v9996_v35, 6  ;;  %v9998_v42 = vshrl.u32 %v7324_v17, 16  ;;  %v7693_v30 = vld [vmem:[%s9914_s0 + $0x14] sm:$0xf] }
  0x78   :  { %1117 = vmatprep.mubr.bf16.mxu0 %v9958_v0  ;;  %v1414_v52 = vrot.slane %v9997_v41, 6  ;;  %v9999_v34 = vshll.u32 %v7324_v17, 16  ;;  %v911_v57 = vrot.slane %v909_v23, 4  ;;  %v6230_v56 = vcombine.low %v907_v25, %v910_v21 }
  0x79   :  { %6276 = vmatmul.mubr.msk.bf16.vlgmr.msra.gmra.mxu1 %vm423_vm3, %v7373_v32  ;;  %v1418_v15 = vrot.slane %v9998_v42, 5  ;;  %v912_v32 = vrot.slane %v7673_v39, 5  ;;  %v7679_v50 = vsel %vm7283_vm7, %v1402_v37, %v1407_v24  ;;  %v1411_v43 = vor.u32 %v1410_v47, %v1409_v60 }
  0x7a   :  { %v1419_v54 = vrot.slane %v9999_v34, 6  ;;  %1592 = vmatprep.mubr.bf16.mxu1 %v9958_v0  ;;  %v6267_v51 = vcombine.low %v7651_v61, %v7679_v50  ;;  %v1415_v23 = vor.u32 %v1414_v52, %v1413_v38  ;;  %v1930_v45 = vsel %vm460_vm0, %v6685_v59, 0  ;;  %v6686_v34 = vld [vmem:[#allocation2 + $0x80] ss:$8 sps:$4 sm:$0xff]  }
  0x7b   :  { %v6223_v3 = vrot.slane %v7687_v14, 9  ;;  %v916_v63 = vrot.slane %v7693_v30, 5  ;;  %v1412_v37 = vrot.slane %v1411_v43, 4  ;;  %v919_v59 = vrot.slane %v7699_v22, 5 }
  0x7c   :  { %v1420_v33 = vor.u32 %v1419_v54, %v1418_v15  ;;  %v1417_v25 = vrot.slane %v1415_v23, 4  ;;  %v1423_v21 = vshrl.u32 %v7344_v36, 16  ;;  %v10000_v24 = vshll.u32 %v7344_v36, 16 }
  0x7d   :  { %v1416_v60 = vsel %vm7283_vm7, %v1412_v37, %v1415_v23  ;;  %v1429_v47 = vrot.slane %v331_v46, 5  ;;  %v913_v38 = vsel %vm7635_vm10, %v911_v57, %v912_v32  ;;  %v1430_v42 = vrot.slane %v334_v4, 6  ;;  %v7730_v4 = vld [vmem:[%s9914_s0 + $0x1c] sm:$0x3] }
  0x7e   :  { %v1426_v53 = vrot.slane %v10000_v24, 6  ;;  %v1422_v35 = vrot.slane %v1420_v33, 4  ;;  %v1421_v41 = vsel %vm7283_vm7, %v1417_v25, %v1420_v33  ;;  %v1425_v52 = vrot.slane %v1423_v21, 5 }
  0x7f   :  { %6247 = vmatmul.mubr.msk.bf16.vlgmr.msra.gmra.mxu0 %vm423_vm3, %v6230_v56  ;;  %v917_v15 = vsel %vm7635_vm10, %v6223_v3, %v916_v63  ;;  %v7719_v46 = vcombine.low %v1416_v60, %v1421_v41  ;;  %v1433_v54 = vrot.slane %v344_v13, 5  ;;  %v1434_v57 = vrot.slane %v340_v18, 6 }
  0x80   :  { %1948 = vmatpush1.bf16.msra.mxu0 %v1930_v45  ;;  %1127 = vmatprep.mubr.bf16.mxu0 %v9958_v0  ;;  %v918_v32 = vrot.slane %v916_v63, 4  ;;  %v922_v43 = vrot.slane %v7730_v4, 5  ;;  %v1427_v56 = vor.u32 %v1426_v53, %v1425_v52  ;;  %v1431_v23 = vor.u32 %v1430_v42, %v1429_v47 }
  0x81   :  { %6277 = vmatmul.mubr.msk.bf16.gmra.mxu1 %vm423_vm3, %v7455_v31  ;;  %1949 = vmatprep.subr.bf16.mxu0 %v6688_v2  ;;  %v1435_v13 = vor.u32 %v1434_v57, %v1433_v54  ;;  %v1438_v18 = vrot.slane %v354_v28, 5  ;;  %v1439_v31 = vrot.slane %v350_v48, 6  ;;  %v1443_v33 = vshrl.u32 %v7518_v6, 16 }
  0x82   :  { %1602 = vmatprep.mubr.bf16.mxu1 %v9958_v0  ;;  %v6231_v45 = vcombine.low %v913_v38, %v917_v15  ;;  %v921_v3 = vrot.slane %v919_v59, 4  ;;  %v1428_v63 = vsel %vm7283_vm7, %v1422_v35, %v1427_v56  ;;  %v1432_v37 = vrot.slane %v1431_v23, 4  ;;  %v7760_v38 = vld [vmem:[%s9914_s0 + $0x24] sm:$0xf]  ;;  %v7798_v23 = vld [vmem:[%s9914_s0 + $0x2c] sm:$0x3] }
  0x83   :  { %v1437_v2 = vrot.slane %v1435_v13, 4  ;;  %v1440_v25 = vor.u32 %v1439_v31, %v1438_v18  ;;  %v1445_v21 = vrot.slane %v1443_v33, 5  ;;  %v1446_v24 = vrot.slane %v360_v29, 6  ;;  %v7804_v18 = vld [vmem:[%s9914_s0 + $0x30] sm:$0xf] }
  0x84   :  { %1950 = vmatpush1.bf16.msra.mxu0 %v6686_v34  ;;  %v1436_v28 = vsel %vm7283_vm7, %v1432_v37, %v1435_v13  ;;  %v920_v47 = vsel %vm7635_vm10, %v918_v32, %v919_v59  ;;  %v923_v29 = vsel %vm7635_vm10, %v921_v3, %v922_v43  ;;  %v926_v41 = vrot.slane %v7760_v38, 5  ;;  %v7777_v34 = vld [vmem:[%s9914_s0 + $0x20] sm:$0xf] }
  0x85   :  { %v7745_v53 = vcombine.low %v1428_v63, %v1436_v28  ;;  %v7749_v48 = vsel %vm7283_vm7, %v1437_v2, %v1440_v25  ;;  %v1442_v60 = vrot.slane %v1440_v25, 4  ;;  %v1447_v35 = vor.u32 %v1446_v24, %v1445_v21  ;;  %v7822_v63 = vld [vmem:[%s9914_s0 + $0x38] sm:$0xf]  ;;  %v7831_v24 = vld [vmem:[%s9914_s0 + $0x3c] sm:$0x3] }
  0x86   :  { %v10001_v52 = vcombine.low %v7448_v9, %v7472_v19  ;;  %v6232_v15 = vcombine.low %v920_v47, %v923_v29  ;;  %v6224_v54 = vrot.slane %v7777_v34, 9  ;;  %v928_v9 = vrot.slane %v926_v41, 4 }
  0x87   :  { %6248 = vmatmul.mubr.msk.bf16.gmra.mxu0 %vm423_vm3, %v6231_v45  ;;  %v7769_v42 = vsel %vm7283_vm7, %v1442_v60, %v1447_v35  ;;  %v929_v19 = vrot.slane %v7783_v44, 5  ;;  %v932_v13 = vrot.slane %v7798_v23, 5  ;;  %v6225_v31 = vrot.slane %v7804_v18, 9  ;;  %v7843_v35 = vld [vmem:[%s9914_s0 + $0x44] sm:$0xf] }
  0x88   :  { %1137 = vmatprep.mubr.bf16.mxu0 %v9958_v0  ;;  %v6270_v59 = vcombine.low %v7749_v48, %v7769_v42  ;;  %v927_v57 = vsel %vm7635_vm10, %v6224_v54, %v926_v41  ;;  %v939_v37 = vrot.slane %v7822_v63, 5  ;;  %v942_v28 = vrot.slane %v7831_v24, 5  ;;  %v7854_v41 = vld [vmem:[%s9914_s0 + $0x40] sm:$0xf]  ;;  %v7860_v54 = vld [vmem:[%s9914_s0 + $0x48] sm:$0xf] }
  0x89   :  { %6278 = vmatmul.mubr.msk.bf16.gmra.mxu1 %vm423_vm3, %v10001_v52  ;;  %v930_v32 = vsel %vm7635_vm10, %v928_v9, %v929_v19  ;;  %v931_v56 = vrot.slane %v929_v19, 4  ;;  %v946_v47 = vrot.slane %v7843_v35, 5  ;;  %v6226_v52 = vrot.slane %v7854_v41, 9 }
  0x8a   :  { %1612 = vmatprep.mubr.bf16.mxu1 %v9958_v0  ;;  %v6233_v43 = vcombine.low %v927_v57, %v930_v32  ;;  %v941_v21 = vrot.slane %v939_v37, 4  ;;  %v949_v11 = vrot.slane %v7860_v54, 5  ;;  %v7875_v57 = vld [vmem:[%s9914_s0 + $0x4c] sm:$0x3]  ;;  %vm3505_vm0 = vsmask.f32 5392 }
  0x8b   :  { %v933_v45 = vsel %vm7635_vm10, %v931_v56, %v932_v13  ;;  %v947_v12 = vsel %vm7635_vm10, %v6226_v52, %v946_v47  ;;  %v952_v32 = vrot.slane %v7875_v57, 5  ;;  %v969_v52 = vrot.slane %v7324_v17, 5  ;;  %vm3506_vm7 = vmor %vm3504_vm5, %vm3505_vm0 }
  0x8c   :  { %v951_v19 = vrot.slane %v949_v11, 4  ;;  %v6229_v17 = vrot.slane %v7357_v10, 9  ;;  %vm4492_vm4 = vsmask.f32 4368  ;;  %vm8988_vm8 = vmor %vm3506_vm7, %vm3507_vm1  ;;  %vm4171_vm0 = vcmask 1044484  }
  0x8d   :  { %vm6917_vm5 = vmmov 0   ;;  %vm6157_vm7 = vcmask 80896  }
  0x8f   :  { %6249 = vmatmul.mubr.msk.bf16.gmra.mxu0 %vm423_vm3, %v6232_v15  ;;  %v948_v15 = vrot.slane %v946_v47, 4 }
  0x90   :  { %1147 = vmatprep.mubr.bf16.mxu0 %v9958_v0 }
  0x91   :  { %6279 = vmatmul.mubr.msk.bf16.gmra.mxu1 %vm423_vm3, %v7507_v16  ;;  %v7810_v16 = vld [vmem:[%s9914_s0 + $0x34] sm:$0xf] }
  0x92   :  { %1622 = vmatprep.mubr.bf16.mxu1 %v9958_v0  ;;  %v936_v33 = vrot.slane %v7810_v16, 5 }
  0x94   :  { %v937_v3 = vsel %vm7635_vm10, %v6225_v31, %v936_v33  ;;  %v938_v25 = vrot.slane %v936_v33, 4  ;;  %v953_v31 = vsel %vm7635_vm10, %v951_v19, %v952_v32  ;;  %v1756_v32 = vrot.slane %v7590_v27, 6 }
  0x95   :  { %v6234_v2 = vcombine.low %v933_v45, %v937_v3  ;;  %v7899_v45 = vld [vmem:[%s9914_s0 + $0x58] sm:$0xf] }
  0x96   :  { %v940_v60 = vsel %vm7635_vm10, %v938_v25, %v939_v37  ;;  %v959_v3 = vrot.slane %v7899_v45, 5 }
  0x97   :  { %6250 = vmatmul.mubr.msk.bf16.gmra.mxu0 %vm423_vm3, %v6233_v43  ;;  %v7881_v43 = vld [vmem:[%s9914_s0 + $0x50] sm:$0xf] }
  0x98   :  { %1157 = vmatprep.mubr.bf16.mxu0 %v9958_v0  ;;  %v6227_v56 = vrot.slane %v7881_v43, 9  ;;  %v961_v25 = vrot.slane %v959_v3, 4 }
  0x99   :  { %6280 = vmatmul.mubr.msk.bf16.gmra.mxu1 %vm423_vm3, %v7548_v58  ;;  %v943_v58 = vsel %vm7635_vm10, %v941_v21, %v942_v28  ;;  %v962_v21 = vrot.slane %v7294_v8, 5 }
  0x9a   :  { %1632 = vmatprep.mubr.bf16.mxu1 %v9958_v0  ;;  %v6235_v29 = vcombine.low %v940_v60, %v943_v58  ;;  %v966_v58 = vrot.slane %v7311_v49, 5 }
  0x9b   :  { %v963_v60 = vsel %vm7635_vm10, %v961_v25, %v962_v21 }
  0x9f   :  { %6251 = vmatmul.mubr.msk.bf16.gmra.mxu0 %vm423_vm3, %v6234_v2 }
  0xa0   :  { %1167 = vmatprep.mubr.bf16.mxu0 %v9958_v0 }
  0xa1   :  { %6281 = vmatmul.mubr.msk.bf16.gmra.mxu1 %vm423_vm3, %v6264_v55  ;;  %v950_v55 = vsel %vm7635_vm10, %v948_v15, %v949_v11  ;;  %v972_v15 = vrot.slane %v7344_v36, 5  ;;  %v976_v11 = vrot.slane %v7411_v26, 5 }
  0xa2   :  { %1642 = vmatprep.mubr.bf16.mxu1 %v9958_v0  ;;  %v6236_v9 = vcombine.low %v947_v12, %v950_v55  ;;  %v979_v55 = vrot.slane %v7442_v20, 5 }
  0xa3   :  { %v978_v36 = vrot.slane %v976_v11, 4 }
  0xa4   :  { %v981_v26 = vrot.slane %v979_v55, 4 }
  0xa5   :  { %v980_v19 = vsel %vm7635_vm10, %v978_v36, %v979_v55 }
  0xa7   :  { %6252 = vmatmul.mubr.msk.bf16.gmra.mxu0 %vm423_vm3, %v6235_v29  ;;  %v968_v29 = vrot.slane %v966_v58, 4 }
  0xa8   :  { %1177 = vmatprep.mubr.bf16.mxu0 %v9958_v0 }
  0xa9   :  { %6282 = vmatmul.mubr.msk.bf16.gmra.mxu1 %vm423_vm3, %v7605_v1  ;;  %v7887_v1 = vld [vmem:[%s9914_s0 + $0x54] sm:$0xf]  ;;  %v970_v61 = vsel %vm7635_vm10, %v968_v29, %v969_v52 }
  0xaa   :  { %1652 = vmatprep.mubr.bf16.mxu1 %v9958_v0  ;;  %v956_v13 = vrot.slane %v7887_v1, 5 }
  0xac   :  { %v957_v33 = vsel %vm7635_vm10, %v6227_v56, %v956_v13  ;;  %v958_v2 = vrot.slane %v956_v13, 4  ;;  %v1758_v56 = vrot.slane %v1756_v32, 4  ;;  %v1759_v13 = vrot.slane %v7623_v7, 6 }
  0xad   :  { %v6237_v37 = vcombine.low %v953_v31, %v957_v33  ;;  %v1762_v33 = vrot.slane %v7673_v39, 6  ;;  %v1769_v39 = vrot.slane %v7699_v22, 6 }
  0xae   :  { %v960_v28 = vsel %vm7635_vm10, %v958_v2, %v959_v3  ;;  %v1760_v42 = vsel %vm7963_vm13, %v1758_v56, %v1759_v13  ;;  %v1761_v7 = vrot.slane %v1759_v13, 4  ;;  %v6289_v3 = vrot.slane %v7687_v14, 10 }
  0xaf   :  { %6253 = vmatmul.mubr.msk.bf16.gmra.mxu0 %vm423_vm3, %v6236_v9  ;;  %v6238_v8 = vcombine.low %v960_v28, %v963_v60  ;;  %v982_v9 = vrot.slane %v7518_v6, 5 }
  0xb0   :  { %1187 = vmatprep.mubr.bf16.mxu0 %v9958_v0  ;;  %v1763_v28 = vsel %vm7963_vm13, %v1761_v7, %v1762_v33 }
  0xb1   :  { %6283 = vmatmul.mubr.msk.bf16.gmra.mxu1 %vm423_vm3, %v7647_v62  ;;  %v7921_v62 = vld [vmem:[%s9914_s0 + $0x60] sm:$0xf]  ;;  %v983_v20 = vsel %vm7635_vm10, %v981_v26, %v982_v9 }
  0xb2   :  { %1662 = vmatprep.mubr.bf16.mxu1 %v9958_v0  ;;  %v6228_v47 = vrot.slane %v7921_v62, 9  ;;  %v6241_v6 = vcombine.low %v980_v19, %v983_v20 }
  0xb4   :  { %v967_v49 = vsel %vm7635_vm10, %v6228_v47, %v966_v58 }
  0xb5   :  { %v6239_v50 = vcombine.low %v967_v49, %v970_v61  ;;  %v1771_v61 = vrot.slane %v1769_v39, 4 }
  0xb7   :  { %6254 = vmatmul.mubr.msk.bf16.gmra.mxu0 %vm423_vm3, %v6237_v37  ;;  %v1766_v37 = vrot.slane %v7693_v30, 6 }
  0xb8   :  { %1197 = vmatprep.mubr.bf16.mxu0 %v9958_v0 }
  0xb9   :  { %6284 = vmatmul.mubr.msk.bf16.gmra.mxu1 %vm423_vm3, %v6267_v51  ;;  %v971_v51 = vrot.slane %v969_v52, 4  ;;  %v1767_v60 = vsel %vm7963_vm13, %v6289_v3, %v1766_v37  ;;  %v1768_v49 = vrot.slane %v1766_v37, 4  ;;  %v1782_v3 = vrot.slane %v7798_v23, 6 }
  0xba   :  { %1672 = vmatprep.mubr.bf16.mxu1 %v9958_v0  ;;  %v6297_v47 = vcombine.low %v1763_v28, %v1767_v60  ;;  %v6291_v28 = vrot.slane %v7804_v18, 10  ;;  %v1786_v60 = vrot.slane %v7810_v16, 6  ;;  %v1789_v16 = vrot.slane %v7822_v63, 6 }
  0xbb   :  { %v973_v12 = vsel %vm7635_vm10, %v971_v51, %v972_v15 }
  0xbc   :  { %v1787_v18 = vsel %vm7963_vm13, %v6291_v28, %v1786_v60 }
  0xbf   :  { %6255 = vmatmul.mubr.msk.bf16.gmra.mxu0 %vm423_vm3, %v6238_v8 }
  0xc0   :  { %1207 = vmatprep.mubr.bf16.mxu0 %v9958_v0 }
  0xc1   :  { %6285 = vmatmul.mubr.msk.bf16.gmra.mxu1 %vm423_vm3, %v7719_v46  ;;  %v977_v46 = vsel %vm7635_vm10, %v6229_v17, %v976_v11 }
  0xc2   :  { %1682 = vmatprep.mubr.bf16.mxu1 %v9958_v0  ;;  %v6240_v10 = vcombine.low %v973_v12, %v977_v46  ;;  %v1770_v12 = vsel %vm7963_vm13, %v1768_v49, %v1769_v39 }
  0xc7   :  { %6256 = vmatmul.mubr.msk.bf16.gmra.mxu0 %vm423_vm3, %v6239_v50  ;;  %v1772_v50 = vrot.slane %v7730_v4, 6  ;;  %v1776_v4 = vrot.slane %v7760_v38, 6 }
  0xc8   :  { %1217 = vmatprep.mubr.bf16.mxu0 %v9958_v0 }
  0xc9   :  { %6286 = vmatmul.mubr.msk.bf16.gmra.mxu1 %vm423_vm3, %v7745_v53  ;;  %v6288_v53 = vrot.slane %v7615_v40, 10  ;;  %v1773_v46 = vsel %vm7963_vm13, %v1771_v61, %v1772_v50 }
  0xca   :  { %1692 = vmatprep.mubr.bf16.mxu1 %v9958_v0  ;;  %v6298_v9 = vcombine.low %v1770_v12, %v1773_v46  ;;  %v1788_v46 = vrot.slane %v1786_v60, 4 }
  0xcb   :  { %v1757_v48 = vsel %vm7963_vm13, %v6288_v53, %v1756_v32  ;;  %v6290_v32 = vrot.slane %v7777_v34, 10  ;;  %v1779_v53 = vrot.slane %v7783_v44, 6 }
  0xcf   :  { %6257 = vmatmul.mubr.msk.bf16.gmra.mxu0 %vm423_vm3, %v6240_v10 }
  0xd0   :  { %1227 = vmatprep.mubr.bf16.mxu0 %v9958_v0 }
  0xd1   :  { %6287 = vmatmul.mubr.msk.bf16.gmra.mxu1 %vm423_vm3, %v6270_v59  ;;  %v6296_v59 = vcombine.low %v1757_v48, %v1760_v42  ;;  %v1777_v42 = vsel %vm7963_vm13, %v6290_v32, %v1776_v4  ;;  %v1790_v32 = vsel %vm7963_vm13, %v1788_v46, %v1789_v16  ;;  %v1806_v46 = vrot.slane %v7887_v1, 6 }
  0xd2   :  { %3902 = vmatprep.mubr.bf16.mxu1 %v9958_v0 }
  0xd7   :  { %6258 = vmatmul.mubr.msk.bf16.gmra.mxu0 %vm423_vm3, %v6241_v6  ;;  %v1778_v6 = vrot.slane %v1776_v4, 4  ;;  %v1791_v4 = vrot.slane %v1789_v16, 4 }
  0xd8   :  { %1967 = vmatprep.mubr.bf16.mxu0 %v9958_v0  ;;  %v774_v27 = vpop.f32.mrf.mxu1 }
  0xd9   :  { %v1780_v34 = vsel %vm7963_vm13, %v1778_v6, %v1779_v53 }
  0xda   :  { %v776_v40 = vpop.f32.mrf.mxu1  ;;  %v6299_v7 = vcombine.low %v1777_v42, %v1780_v34 }
  0xdc   :  { %v778_v31 = vpop.f32.mrf.mxu1 }
  0xde   :  { %v7976_v2 = vpop.f32.mrf.mxu1 }
  0xdf   :  { %10004 = vst [vmem:[#allocation5_spill] sm:$0xff] %v7976_v2  ;;  %v501_v25 = vpop.f32.mrf.mxu0  ;;  %6313 = vmatmul.mubr.msk.bf16.vlgmr.msra.gmra.mxu0 %vm423_vm3, %v6296_v59 }
  0xe0   :  { %v7979_v21 = vadd.f32 %v774_v27, %v501_v25  ;;  %1977 = vmatprep.mubr.bf16.mxu0 %v9958_v0  ;;  %v1781_v25 = vrot.slane %v1779_v53, 4 }
  0xe1   :  { %v503_v14 = vpop.f32.mrf.mxu0  ;;  %v784_v58 = vpop.f32.mrf.mxu1 }
  0xe2   :  { %v7987_v30 = vadd.f32 %v776_v40, %v503_v14  ;;  %v1783_v23 = vsel %vm7963_vm13, %v1781_v25, %v1782_v3 }
  0xe3   :  { %v505_v8 = vpop.f32.mrf.mxu0  ;;  %v786_v29 = vpop.f32.mrf.mxu1 }
  0xe4   :  { %v7989_v52 = vadd.f32 %v778_v31, %v505_v8 }
  0xe5   :  { %v7992_v51 = vpop.f32.mrf.mxu0  ;;  %v788_v15 = vpop.f32.mrf.mxu1 }
  0xe6   :  { %10005 = vst [vmem:[#allocation6_spill] sm:$0xff] %v7992_v51 }
  0xe7   :  { %v511_v17 = vpop.f32.mrf.mxu0  ;;  %6314 = vmatmul.mubr.msk.bf16.gmra.mxu0 %vm423_vm3, %v6297_v47  ;;  %v7995_v22 = vpop.f32.mrf.mxu1 }
  0xe8   :  { %10006 = vst [vmem:[#allocation7_spill] sm:$0xff] %v7995_v22  ;;  %v7997_v11 = vadd.f32 %v784_v58, %v511_v17  ;;  %1987 = vmatprep.mubr.bf16.mxu0 %v9958_v0 }
  0xe9   :  { %v513_v55 = vpop.f32.mrf.mxu0  ;;  %v794_v10 = vpop.f32.mrf.mxu1 }
  0xea   :  { %v8005_v36 = vadd.f32 %v786_v29, %v513_v55  ;;  %v1792_v55 = vrot.slane %v7831_v24, 6  ;;  %v1796_v24 = vrot.slane %v7843_v35, 6 }
  0xeb   :  { %v515_v26 = vpop.f32.mrf.mxu0  ;;  %v796_v19 = vpop.f32.mrf.mxu1 }
  0xec   :  { %v8007_v20 = vadd.f32 %v788_v15, %v515_v26  ;;  %v6300_v15 = vcombine.low %v1783_v23, %v1787_v18  ;;  %v1793_v6 = vsel %vm7963_vm13, %v1791_v4, %v1792_v55 }
  0xed   :  { %v8011_v56 = vpop.f32.mrf.mxu0  ;;  %v798_v13 = vpop.f32.mrf.mxu1  ;;  %v6301_v34 = vcombine.low %v1790_v32, %v1793_v6 }
  0xee   :  { %10007 = vst [vmem:[#allocation8_spill] sm:$0xff] %v8011_v56 }
  0xef   :  { %v521_v27 = vpop.f32.mrf.mxu0  ;;  %6315 = vmatmul.mubr.msk.bf16.gmra.mxu0 %vm423_vm3, %v6298_v9  ;;  %v8014_v38 = vpop.f32.mrf.mxu1 }
  0xf0   :  { %v8016_v48 = vadd.f32 %v794_v10, %v521_v27  ;;  %1997 = vmatprep.mubr.bf16.mxu0 %v9958_v0 }
  0xf1   :  { %v523_v40 = vpop.f32.mrf.mxu0  ;;  %v804_v44 = vpop.f32.mrf.mxu1 }
  0xf2   :  { %v8023_v59 = vadd.f32 %v796_v19, %v523_v40 }
  0xf3   :  { %v525_v31 = vpop.f32.mrf.mxu0  ;;  %v806_v33 = vpop.f32.mrf.mxu1 }
  0xf4   :  { %v8026_v37 = vadd.f32 %v798_v13, %v525_v31  ;;  %v6292_v31 = vrot.slane %v7854_v41, 10 }
  0xf5   :  { %v8030_v39 = vpop.f32.mrf.mxu0  ;;  %v808_v14 = vpop.f32.mrf.mxu1 }
  0xf7   :  { %v531_v58 = vpop.f32.mrf.mxu0  ;;  %6316 = vmatmul.mubr.msk.bf16.gmra.mxu0 %vm423_vm3, %v6299_v7  ;;  %v8033_v8 = vpop.f32.mrf.mxu1  ;;  %v1798_v7 = vrot.slane %v1796_v24, 4 }
  0xf8   :  { %v8035_v47 = vadd.f32 %v804_v44, %v531_v58  ;;  %2007 = vmatprep.mubr.bf16.mxu0 %v9958_v0 }
  0xf9   :  { %v533_v29 = vpop.f32.mrf.mxu0  ;;  %v814_v49 = vpop.f32.mrf.mxu1 }
  0xfa   :  { %v8043_v61 = vadd.f32 %v806_v33, %v533_v29  ;;  %v1799_v33 = vrot.slane %v7860_v54, 6 }
  0xfb   :  { %v535_v50 = vpop.f32.mrf.mxu0  ;;  %v816_v17 = vpop.f32.mrf.mxu1 }
  0xfc   :  { %v8045_v12 = vadd.f32 %v808_v14, %v535_v50  ;;  %v1797_v14 = vsel %vm7963_vm13, %v6292_v31, %v1796_v24  ;;  %v1800_v41 = vsel %vm7963_vm13, %v1798_v7, %v1799_v33  ;;  %v1808_v31 = vrot.slane %v1806_v46, 4 }
  0xfd   :  { %v8048_v10 = vpop.f32.mrf.mxu0  ;;  %v818_v26 = vpop.f32.mrf.mxu1  ;;  %v6302_v16 = vcombine.low %v1797_v14, %v1800_v41 }
  0xff   :  { %v541_v9 = vpop.f32.mrf.mxu0  ;;  %6317 = vmatmul.mubr.msk.bf16.gmra.mxu0 %vm423_vm3, %v6300_v15  ;;  %v8051_v63 = vpop.f32.mrf.mxu1  ;;  %v1802_v15 = vrot.slane %v7875_v57, 6 }
 0x100   :  { %v8053_v19 = vadd.f32 %v814_v49, %v541_v9  ;;  %2017 = vmatprep.mubr.bf16.mxu0 %v9958_v0  ;;  %v1801_v49 = vrot.slane %v1799_v33, 4  ;;  %v6879_v33 = vld [vmem:[%s9914_s0 + $0x5c] sm:$0x3] }
 0x101   :  { %v543_v53 = vpop.f32.mrf.mxu0  ;;  %v824_v13 = vpop.f32.mrf.mxu1 }
 0x102   :  { %v8061_v27 = vadd.f32 %v816_v17, %v543_v53  ;;  %v6293_v17 = vrot.slane %v7881_v43, 10  ;;  %v1803_v6 = vsel %vm7963_vm13, %v1801_v49, %v1802_v15  ;;  %v1809_v43 = vrot.slane %v7899_v45, 6 }
 0x103   :  { %v545_v42 = vpop.f32.mrf.mxu0  ;;  %v826_v40 = vpop.f32.mrf.mxu1 }
 0x104   :  { %v8063_v44 = vadd.f32 %v818_v26, %v545_v42  ;;  %v1807_v57 = vsel %vm7963_vm13, %v6293_v17, %v1806_v46  ;;  %v1811_v7 = vrot.slane %v1809_v43, 4 }
 0x105   :  { %v8067_v3 = vpop.f32.mrf.mxu0  ;;  %v828_v25 = vpop.f32.mrf.mxu1  ;;  %v6303_v42 = vcombine.low %v1803_v6, %v1807_v57  ;;  %v6294_v57 = vrot.slane %v7921_v62, 10 }
 0x107   :  { %v551_v28 = vpop.f32.mrf.mxu0  ;;  %6318 = vmatmul.mubr.msk.bf16.gmra.mxu0 %vm423_vm3, %v6301_v34  ;;  %v8070_v35 = vpop.f32.mrf.mxu1 }
 0x108   :  { %v8072_v60 = vadd.f32 %v824_v13, %v551_v28  ;;  %2027 = vmatprep.mubr.bf16.mxu0 %v9958_v0 }
 0x109   :  { %v553_v58 = vpop.f32.mrf.mxu0  ;;  %v834_v54 = vpop.f32.mrf.mxu1 }
 0x10a   :  { %v8079_v23 = vadd.f32 %v826_v40, %v553_v58 }
 0x10b   :  { %v555_v18 = vpop.f32.mrf.mxu0  ;;  %v836_v29 = vpop.f32.mrf.mxu1 }
 0x10c   :  { %v8081_v50 = vadd.f32 %v828_v25, %v555_v18  ;;  %v1812_v25 = vrot.slane %v6879_v33, 6 }
 0x10d   :  { %v8086_v4 = vpop.f32.mrf.mxu0  ;;  %v838_v55 = vpop.f32.mrf.mxu1 }
 0x10e   :  { %v1813_v18 = vsel %vm7963_vm13, %v1811_v7, %v1812_v25 }
 0x10f   :  { %v561_v26 = vpop.f32.mrf.mxu0  ;;  %6319 = vmatmul.mubr.msk.bf16.gmra.mxu0 %vm423_vm3, %v6302_v16  ;;  %v8089_v9 = vpop.f32.mrf.mxu1  ;;  %v6880_v16 = vld [vmem:[%s9914_s0 + $0x64] sm:$0xf] }
 0x110   :  { %v8091_v32 = vadd.f32 %v834_v54, %v561_v26  ;;  %2037 = vmatprep.mubr.bf16.mxu0 %v9958_v0  ;;  %v1810_v54 = vsel %vm7963_vm13, %v1808_v31, %v1809_v43 }
 0x111   :  { %v563_v1 = vpop.f32.mrf.mxu0  ;;  %v844_v24 = vpop.f32.mrf.mxu1 }
 0x112   :  { %v8099_v53 = vadd.f32 %v836_v29, %v563_v1  ;;  %v1816_v29 = vrot.slane %v6880_v16, 6  ;;  %v6881_v1 = vld [vmem:[%s9914_s0 + $0x68] sm:$0xf] }
 0x113   :  { %v565_v13 = vpop.f32.mrf.mxu0  ;;  %v846_v34 = vpop.f32.mrf.mxu1 }
 0x114   :  { %v8101_v40 = vadd.f32 %v838_v55, %v565_v13  ;;  %v6304_v55 = vcombine.low %v1810_v54, %v1813_v18  ;;  %v1818_v43 = vrot.slane %v1816_v29, 4  ;;  %v1817_v62 = vsel %vm7963_vm13, %v6294_v57, %v1816_v29  ;;  %v6883_v29 = vld [vmem:[%s9914_s0 + $0x70] sm:$0xf] }
 0x115   :  { %v8106_v28 = vpop.f32.mrf.mxu0  ;;  %v848_v14 = vpop.f32.mrf.mxu1  ;;  %v6295_v57 = vrot.slane %v6883_v29, 10 }
 0x117   :  { %v571_v45 = vpop.f32.mrf.mxu0  ;;  %6320 = vmatmul.mubr.msk.bf16.gmra.mxu0 %vm423_vm3, %v6303_v42  ;;  %v8109_v41 = vpop.f32.mrf.mxu1 }
 0x118   :  { %v8111_v58 = vadd.f32 %v844_v24, %v571_v45  ;;  %2047 = vmatprep.mubr.bf16.mxu0 %v9958_v0  ;;  %v1819_v24 = vrot.slane %v6881_v1, 6 }
 0x119   :  { %v573_v49 = vpop.f32.mrf.mxu0  ;;  %v854_v15 = vpop.f32.mrf.mxu1 }
 0x11a   :  { %v8121_v17 = vadd.f32 %v846_v34, %v573_v49  ;;  %v1820_v33 = vsel %vm7963_vm13, %v1818_v43, %v1819_v24  ;;  %v1821_v49 = vrot.slane %v1819_v24, 4 }
 0x11b   :  { %v575_v46 = vpop.f32.mrf.mxu0  ;;  %v856_v26 = vpop.f32.mrf.mxu1  ;;  %v6305_v18 = vcombine.low %v1817_v62, %v1820_v33 }
 0x11c   :  { %v8123_v6 = vadd.f32 %v848_v14, %v575_v46 }
 0x11d   :  { %v8129_v13 = vpop.f32.mrf.mxu0  ;;  %v858_v42 = vpop.f32.mrf.mxu1 }
 0x11f   :  { %v581_v31 = vpop.f32.mrf.mxu0  ;;  %6321 = vmatmul.mubr.msk.bf16.gmra.mxu0 %vm423_vm3, %v6304_v55  ;;  %v8132_v34 = vpop.f32.mrf.mxu1 }
 0x120   :  { %10008 = vst [vmem:[#allocation9_spill] sm:$0xff] %v8132_v34  ;;  %v8134_v7 = vadd.f32 %v854_v15, %v581_v31  ;;  %2057 = vmatprep.mubr.bf16.mxu0 %v9958_v0  ;;  %v6882_v15 = vld [vmem:[%s9914_s0 + $0x6c] sm:$0x3] }
 0x121   :  { %v583_v25 = vpop.f32.mrf.mxu0  ;;  %v864_v14 = vpop.f32.mrf.mxu1  ;;  %v1822_v55 = vrot.slane %v6882_v15, 6 }
 0x122   :  { %v8141_v45 = vadd.f32 %v856_v26, %v583_v25  ;;  %v6884_v26 = vld [vmem:[%s9914_s0 + $0x74] sm:$0xf] }
 0x123   :  { %v585_v54 = vpop.f32.mrf.mxu0  ;;  %v866_v16 = vpop.f32.mrf.mxu1  ;;  %v1826_v43 = vrot.slane %v6884_v26, 6  ;;  %v1823_v33 = vsel %vm7963_vm13, %v1821_v49, %v1822_v55  ;;  %v6886_v49 = vld [vmem:[%s9914_s0 + $0x7c] sm:$0x3] }
 0x124   :  { %v8143_v46 = vadd.f32 %v858_v42, %v585_v54  ;;  %v6885_v54 = vld [vmem:[%s9914_s0 + $0x78] sm:$0xf]  ;;  %v1832_v55 = vrot.slane %v6886_v49, 6 }
 0x125   :  { %v8154_v1 = vpop.f32.mrf.mxu0  ;;  %v868_v24 = vpop.f32.mrf.mxu1  ;;  %v1827_v25 = vsel %vm7963_vm13, %v6295_v57, %v1826_v43  ;;  %v1829_v15 = vrot.slane %v6885_v54, 6 }
 0x126   :  { %10009 = vst [vmem:[#allocation10_spill] sm:$0xff] %v8154_v1 }
 0x127   :  { %v591_v42 = vpop.f32.mrf.mxu0  ;;  %6322 = vmatmul.mubr.msk.bf16.gmra.mxu0 %vm423_vm3, %v6305_v18  ;;  %v8157_v31 = vpop.f32.mrf.mxu1  ;;  %v1831_v1 = vrot.slane %v1829_v15, 4 }
 0x128   :  { %10010 = vst [vmem:[#allocation11_spill] sm:$0xff] %v8157_v31  ;;  %v8159_v62 = vadd.f32 %v864_v14, %v591_v42  ;;  %2067 = vmatprep.mubr.bf16.mxu0 %v9958_v0  ;;  %v6306_v14 = vcombine.low %v1823_v33, %v1827_v25  ;;  %v1828_v0 = vrot.slane %v1826_v43, 4  ;;  %v10013_v33 = vmov 0  }
 0x129   :  { %v593_v29 = vpop.f32.mrf.mxu0  ;;  %v874_v26 = vpop.f32.mrf.mxu1 }
 0x12a   :  { %v8169_v18 = vadd.f32 %v866_v16, %v593_v29  ;;  %v1830_v43 = vsel %vm7963_vm13, %v1828_v0, %v1829_v15 }
 0x12b   :  { %v595_v31 = vpop.f32.mrf.mxu0  ;;  %v876_v42 = vpop.f32.mrf.mxu1 }
 0x12c   :  { %v8171_v34 = vadd.f32 %v868_v24, %v595_v31  ;;  %v1833_v24 = vsel %vm7963_vm13, %v1831_v1, %v1832_v55  ;;  %vm4168_vm13 = vcmask 1040384  }
 0x12d   :  { %v8176_v57 = vpop.f32.mrf.mxu0  ;;  %v878_v22 = vpop.f32.mrf.mxu1  ;;  %v6307_v56 = vcombine.low %v1830_v43, %v1833_v24  ;;  %vm4170_vm15 = vmor %vm4168_vm13, %vm4169_vm14 }
 0x12e   :  { %10011 = vst [vmem:[#allocation12_spill] sm:$0xff] %v8176_v57  ;;  %vm4172_vm1 = vmor %vm4170_vm15, %vm4171_vm0 }
 0x12f   :  { %v601_v54 = vpop.f32.mrf.mxu0  ;;  %6323 = vmatmul.mubr.msk.bf16.gmra.mxu0 %vm423_vm3, %v6306_v14  ;;  %v8179_v16 = vpop.f32.mrf.mxu1 }
 0x130   :  { %10012 = vst [vmem:[#allocation13_spill] sm:$0xff] %v8179_v16  ;;  %v8181_v29 = vadd.f32 %v874_v26, %v601_v54  ;;  %2077 = vmatprep.mubr.bf16.mxu0 %v10013_v33 }
 0x131   :  { %v603_v31 = vpop.f32.mrf.mxu0  ;;  %v884_v25 = vpop.f32.mrf.mxu1 }
 0x132   :  { %v8188_v49 = vadd.f32 %v876_v42, %v603_v31 }
 0x133   :  { %v605_v57 = vpop.f32.mrf.mxu0  ;;  %v886_v2 = vpop.f32.mrf.mxu1 }
 0x134   :  { %v8190_v14 = vadd.f32 %v878_v22, %v605_v57 }
 0x135   :  { %v8192_v16 = vpop.f32.mrf.mxu0  ;;  %v888_v26 = vpop.f32.mrf.mxu1 }
 0x137   :  { %v611_v54 = vpop.f32.mrf.mxu0  ;;  %6324 = vmatmul.mubr.msk.bf16.gmra.mxu0 %vm423_vm3, %v6307_v56  ;;  %v8195_v51 = vpop.f32.mrf.mxu1  ;;  %vm4490_vm3 = vsmask.f32 2312 }
 0x138   :  { %v8197_v0 = vadd.f32 %v884_v25, %v611_v54  ;;  %4785 = vmatprep.mubr.bf16.mxu0 %v10013_v33  ;;  %vm4491_vm9 = vmor %vm4489_vm2, %vm4490_vm3  ;;  %vm4173_vm2 = vcmask 1046534  }
 0x139   :  { %v613_v5 = vpop.f32.mrf.mxu0  ;;  %v8200_v1 = vpop.f32.mrf.mxu1  ;;  %vm4493_vm10 = vmor %vm4491_vm9, %vm4492_vm4  ;;  %vm6012_vm4 = vcmask 1043456  }
 0x13a   :  { %v8202_v15 = vadd.f32 %v886_v2, %v613_v5  ;;  %vm9018_vm12 = vmor %vm4493_vm10, %vm4494_vm6  ;;  %vm6109_vm6 = vcmask 687104  }
 0x13b   :  { %v615_v42 = vpop.f32.mrf.mxu0  ;;  %v8204_v22 = vpop.f32.mrf.mxu1  ;;  %vm9331_vm3 = vmor %vm4172_vm1, %vm4173_vm2 }
 0x13c   :  { %v8206_v55 = vadd.f32 %v888_v26, %v615_v42 }
 0x13d   :  { %v8208_v57 = vpop.f32.mrf.mxu0  ;;  %v8210_v43 = vpop.f32.mrf.mxu1 }
 0x13e   :  { %10014 = vst [vmem:[#allocation14_spill] sm:$0xff] %v8206_v55  ;;  %10015 = vst [vmem:[#allocation15_spill] sm:$0xff] %v8210_v43 }
 0x13f   :  { %v1119_v56 = vpop.f32.mrf.mxu0  ;;  %v8212_v24 = vpop.f32.mrf.mxu1 }
 0x140   :  { %10016 = vst [vmem:[#allocation16_spill] sm:$0xff] %v8212_v24  ;;  %v8215_v31 = vadd.f32 %v1119_v56, %v7979_v21 }
 0x141   :  { %v1121_v25 = vpop.f32.mrf.mxu0  ;;  %v8217_v54 = vpop.f32.mrf.mxu1 }
 0x142   :  { %10017 = vst [vmem:[#allocation17_spill] sm:$0xff] %v8217_v54  ;;  %v8220_v2 = vadd.f32 %v1121_v25, %v7987_v30 }
 0x143   :  { %v1123_v5 = vpop.f32.mrf.mxu0  ;;  %v8222_v33 = vpop.f32.mrf.mxu1 }
 0x144   :  { %10018 = vst [vmem:[#allocation18_spill] sm:$0xff] %v8222_v33  ;;  %v8225_v26 = vadd.f32 %v1123_v5, %v7989_v52  ;;  %v6689_v52 = vld [vmem:[%s9917_s3 + $0xf0] ss:$8 sps:$4 sm:$0xff]   ;;  %v6691_v5 = vld [vmem:[%s9917_s3 + $0xf4] ss:$8 sps:$4 sm:$0xff]  }
 0x145   :  { %v8227_v42 = vpop.f32.mrf.mxu0  ;;  %v8229_v55 = vpop.f32.mrf.mxu1  ;;  %3870 = vmatprep.subr.bf16.mxu1 %v6691_v5 }
 0x146   :  { %10019 = vst [vmem:[#allocation19_spill] sm:$0xff] %v8229_v55  ;;  %3871 = vmatpush1.bf16.msra.mxu1 %v6689_v52  ;;  %v6695_v52 = vld [vmem:[%s9917_s3 + $0x1f0] ss:$8 sps:$4 sm:$0xff]  }
 0x147   :  { %v1129_v24 = vpop.f32.mrf.mxu0  ;;  %v8231_v43 = vpop.f32.mrf.mxu1 }
 0x148   :  { %10020 = vst [vmem:[#allocation20_spill] sm:$0xff] %v8231_v43  ;;  %v8234_v21 = vadd.f32 %v1129_v24, %v7997_v11 }
 0x149   :  { %v1131_v56 = vpop.f32.mrf.mxu0  ;;  %v8236_v54 = vpop.f32.mrf.mxu1 }
 0x14a   :  { %10021 = vst [vmem:[#allocation21_spill] sm:$0xff] %v8236_v54  ;;  %v8239_v30 = vadd.f32 %v1131_v56, %v8005_v36 }
 0x14b   :  { %v1133_v25 = vpop.f32.mrf.mxu0  ;;  %v8241_v33 = vpop.f32.mrf.mxu1 }
 0x14c   :  { %10022 = vst [vmem:[#allocation22_spill] sm:$0xff] %v8239_v30  ;;  %10023 = vst [vmem:[#allocation23_spill] sm:$0xff] %v8241_v33  ;;  %v8250_v11 = vadd.f32 %v1133_v25, %v8007_v20  ;;  %v6697_v20 = vld [vmem:[%s9917_s3 + $0x1f4] ss:$8 sps:$4 sm:$0xff]  }
 0x14d   :  { %v8252_v24 = vpop.f32.mrf.mxu0  ;;  %v8254_v54 = vpop.f32.mrf.mxu1  ;;  %4753 = vmatprep.subr.bf16.mxu0 %v6697_v20 }
 0x14e   :  { %10024 = vst [vmem:[#allocation24_spill] sm:$0xff] %v8254_v54  ;;  %4754 = vmatpush1.bf16.msra.mxu0 %v6695_v52  ;;  %v6700_v52 = vld [vmem:[%s9917_s3 + $0xd4] ss:$8 sps:$4 sm:$0xff]  }
 0x14f   :  { %v1139_v36 = vpop.f32.mrf.mxu0  ;;  %v8256_v56 = vpop.f32.mrf.mxu1 }
 0x150   :  { %10025 = vst [vmem:[#allocation25_spill] sm:$0xff] %v8256_v56  ;;  %v8259_v33 = vadd.f32 %v1139_v36, %v8016_v48  ;;  %v801_v48 = vadd.f32 %v8014_v38, %v8030_v39  ;;  %v6694_v36 = vld [vmem:[%s9917_s3 + $0xe4] ss:$8 sps:$4 sm:$0xff]  }
 0x151   :  { %v1141_v43 = vpop.f32.mrf.mxu0  ;;  %v8261_v55 = vpop.f32.mrf.mxu1  ;;  %3872 = vmatprep.subr.bf16.mxu1 %v6694_v36  ;;  %v6698_v36 = vld [vmem:[%s9917_s3 + $0xd0] ss:$8 sps:$4 sm:$0xff]  }
 0x152   :  { %10026 = vst [vmem:[#allocation26_spill] sm:$0xff] %v8261_v55  ;;  %v8264_v30 = vadd.f32 %v1141_v43, %v8023_v59  ;;  %v6692_v55 = vld [vmem:[%s9917_s3 + $0xe0] ss:$8 sps:$4 sm:$0xff]  }
 0x153   :  { %v1143_v25 = vpop.f32.mrf.mxu0  ;;  %v8269_v54 = vpop.f32.mrf.mxu1  ;;  %3873 = vmatpush1.bf16.msra.mxu1 %v6692_v55  ;;  %v811_v55 = vadd.f32 %v8033_v8, %v8048_v10 }
 0x154   :  { %10027 = vst [vmem:[#allocation27_spill] sm:$0xff] %v8269_v54  ;;  %v8277_v5 = vadd.f32 %v1143_v25, %v8026_v37  ;;  %3874 = vmatprep.subr.bf16.mxu1 %v6700_v52 }
 0x155   :  { %v1145_v59 = vpop.f32.mrf.mxu0  ;;  %v8279_v43 = vpop.f32.mrf.mxu1 }
 0x156   :  { %10028 = vst [vmem:[#allocation28_spill] sm:$0xff] %v8279_v43  ;;  %v8284_v54 = vadd.f32 %v1145_v59, %v801_v48 }
 0x157   :  { %v1149_v56 = vpop.f32.mrf.mxu0  ;;  %v8289_v38 = vpop.f32.mrf.mxu1  ;;  %3875 = vmatpush1.bf16.msra.mxu1 %v6698_v36 }
 0x158   :  { %10029 = vst [vmem:[#allocation29_spill] sm:$0xff] %v8289_v38  ;;  %v8292_v37 = vadd.f32 %v1149_v56, %v8035_v47  ;;  %v6703_v47 = vld [vmem:[%s9917_s3 + $0x1e4] ss:$8 sps:$4 sm:$0xff]   ;;  %v6701_v56 = vld [vmem:[%s9917_s3 + $0x1e0] ss:$8 sps:$4 sm:$0xff]  }
 0x159   :  { %v1151_v39 = vpop.f32.mrf.mxu0  ;;  %v8294_v20 = vpop.f32.mrf.mxu1  ;;  %4755 = vmatprep.subr.bf16.mxu0 %v6703_v47 }
 0x15a   :  { %10030 = vst [vmem:[#allocation30_spill] sm:$0xff] %v8294_v20  ;;  %v8297_v25 = vadd.f32 %v1151_v39, %v8043_v61  ;;  %4756 = vmatpush1.bf16.msra.mxu0 %v6701_v56  ;;  %v6709_v56 = vld [vmem:[%s9917_s3 + $0xc4] ss:$8 sps:$4 sm:$0xff]  }
 0x15b   :  { %v1153_v48 = vpop.f32.mrf.mxu0  ;;  %v8302_v59 = vpop.f32.mrf.mxu1  ;;  %3876 = vmatprep.subr.bf16.mxu1 %v6709_v56  ;;  %v6713_v56 = vld [vmem:[%s9917_s3 + $0xb0] ss:$8 sps:$4 sm:$0xff]  }
 0x15c   :  { %10031 = vst [vmem:[#allocation31_spill] sm:$0xff] %v8302_v59  ;;  %v8313_v61 = vadd.f32 %v1153_v48, %v8045_v12  ;;  %v6706_v12 = vld [vmem:[%s9917_s3 + $0x1d4] ss:$8 sps:$4 sm:$0xff]   ;;  %v6704_v48 = vld [vmem:[%s9917_s3 + $0x1d0] ss:$8 sps:$4 sm:$0xff]  }
 0x15d   :  { %v1155_v39 = vpop.f32.mrf.mxu0  ;;  %v8318_v59 = vpop.f32.mrf.mxu1  ;;  %4757 = vmatprep.subr.bf16.mxu0 %v6706_v12 }
 0x15e   :  { %v8320_v20 = vadd.f32 %v1155_v39, %v811_v55  ;;  %4758 = vmatpush1.bf16.msra.mxu0 %v6704_v48 }
 0x15f   :  { %v1159_v38 = vpop.f32.mrf.mxu0  ;;  %v8322_v43 = vpop.f32.mrf.mxu1 }
 0x160   :  { %v8325_v8 = vadd.f32 %v1159_v38, %v8053_v19  ;;  %v821_v19 = vadd.f32 %v8051_v63, %v8067_v3  ;;  %v6710_v63 = vld [vmem:[%s9917_s3 + $0x1c0] ss:$8 sps:$4 sm:$0xff]  }
 0x161   :  { %v1161_v10 = vpop.f32.mrf.mxu0  ;;  %v8330_v52 = vpop.f32.mrf.mxu1 }
 0x162   :  { %10032 = vst [vmem:[#allocation32_spill] sm:$0xff] %v8330_v52  ;;  %v8336_v36 = vadd.f32 %v1161_v10, %v8061_v27  ;;  %v6712_v27 = vld [vmem:[%s9917_s3 + $0x1c4] ss:$8 sps:$4 sm:$0xff]   ;;  %v6707_v10 = vld [vmem:[%s9917_s3 + $0xc0] ss:$8 sps:$4 sm:$0xff]  }
 0x163   :  { %v1163_v47 = vpop.f32.mrf.mxu0  ;;  %v8338_v55 = vpop.f32.mrf.mxu1  ;;  %4759 = vmatprep.subr.bf16.mxu0 %v6712_v27  ;;  %3877 = vmatpush1.bf16.msra.mxu1 %v6707_v10 }
 0x164   :  { %10033 = vst [vmem:[#allocation33_spill] sm:$0xff] %v8338_v55  ;;  %v8343_v38 = vadd.f32 %v1163_v47, %v8063_v44  ;;  %4760 = vmatpush1.bf16.msra.mxu0 %v6710_v63  ;;  %v6718_v55 = vld [vmem:[%s9917_s3 + $0x1b4] ss:$8 sps:$4 sm:$0xff]  }
 0x165   :  { %v1165_v39 = vpop.f32.mrf.mxu0  ;;  %v8351_v12 = vpop.f32.mrf.mxu1  ;;  %4761 = vmatprep.subr.bf16.mxu0 %v6718_v55 }
 0x166   :  { %10034 = vst [vmem:[#allocation34_spill] sm:$0xff] %v8351_v12  ;;  %v8359_v44 = vadd.f32 %v1165_v39, %v821_v19  ;;  %v6715_v12 = vld [vmem:[%s9917_s3 + $0xb4] ss:$8 sps:$4 sm:$0xff]  }
 0x167   :  { %v1169_v3 = vpop.f32.mrf.mxu0  ;;  %v8361_v48 = vpop.f32.mrf.mxu1  ;;  %3878 = vmatprep.subr.bf16.mxu1 %v6715_v12 }
 0x168   :  { %10035 = vst [vmem:[#allocation35_spill] sm:$0xff] %v8361_v48  ;;  %v8364_v47 = vadd.f32 %v1169_v3, %v8072_v60  ;;  %v6716_v60 = vld [vmem:[%s9917_s3 + $0x1b0] ss:$8 sps:$4 sm:$0xff]   ;;  %3879 = vmatpush1.bf16.msra.mxu1 %v6713_v56  ;;  %v831_v3 = vadd.f32 %v8070_v35, %v8086_v4  ;;  %v6721_v35 = vld [vmem:[%s9917_s3 + $0xa4] ss:$8 sps:$4 sm:$0xff]  }
 0x169   :  { %v1171_v19 = vpop.f32.mrf.mxu0  ;;  %v8372_v39 = vpop.f32.mrf.mxu1  ;;  %4762 = vmatpush1.bf16.msra.mxu0 %v6716_v60  ;;  %3880 = vmatprep.subr.bf16.mxu1 %v6721_v35  ;;  %v6725_v35 = vld [vmem:[%s9917_s3 + $0x90] ss:$8 sps:$4 sm:$0xff]  }
 0x16a   :  { %10036 = vst [vmem:[#allocation36_spill] sm:$0xff] %v8364_v47  ;;  %10037 = vst [vmem:[#allocation37_spill] sm:$0xff] %v8372_v39  ;;  %v8381_v27 = vadd.f32 %v1171_v19, %v8079_v23 }
 0x16b   :  { %v1173_v10 = vpop.f32.mrf.mxu0  ;;  %v8383_v63 = vpop.f32.mrf.mxu1 }
 0x16c   :  { %v8388_v39 = vadd.f32 %v1173_v10, %v8081_v50  ;;  %v6724_v50 = vld [vmem:[%s9917_s3 + $0x1a4] ss:$8 sps:$4 sm:$0xff]   ;;  %v841_v10 = vadd.f32 %v8089_v9, %v8106_v28  ;;  %v6730_v9 = vld [vmem:[%s9917_s3 + $0x194] ss:$8 sps:$4 sm:$0xff]  }
 0x16d   :  { %v1175_v48 = vpop.f32.mrf.mxu0  ;;  %v8390_v52 = vpop.f32.mrf.mxu1  ;;  %4763 = vmatprep.subr.bf16.mxu0 %v6724_v50  ;;  %v6728_v50 = vld [vmem:[%s9917_s3 + $0x190] ss:$8 sps:$4 sm:$0xff]  }
 0x16e   :  { %v8392_v47 = vadd.f32 %v1175_v48, %v831_v3 }
 0x16f   :  { %v1179_v23 = vpop.f32.mrf.mxu0  ;;  %v8394_v19 = vpop.f32.mrf.mxu1 }
 0x170   :  { %v8397_v55 = vadd.f32 %v1179_v23, %v8091_v32  ;;  %v6719_v32 = vld [vmem:[%s9917_s3 + $0xa0] ss:$8 sps:$4 sm:$0xff]  }
 0x171   :  { %v1181_v12 = vpop.f32.mrf.mxu0  ;;  %v8399_v56 = vpop.f32.mrf.mxu1  ;;  %3881 = vmatpush1.bf16.msra.mxu1 %v6719_v32 }
 0x172   :  { %10038 = vst [vmem:[#allocation38_spill] sm:$0xff] %v8399_v56  ;;  %v8402_v60 = vadd.f32 %v1181_v12, %v8099_v53  ;;  %v6722_v53 = vld [vmem:[%s9917_s3 + $0x1a0] ss:$8 sps:$4 sm:$0xff]   ;;  %v6727_v56 = vld [vmem:[%s9917_s3 + $0x94] ss:$8 sps:$4 sm:$0xff]  }
 0x173   :  { %v1183_v4 = vpop.f32.mrf.mxu0  ;;  %v8410_v48 = vpop.f32.mrf.mxu1  ;;  %4764 = vmatpush1.bf16.msra.mxu0 %v6722_v53  ;;  %3882 = vmatprep.subr.bf16.mxu1 %v6727_v56  ;;  %v6731_v56 = vld [vmem:[%s9917_s3 + $0x80] ss:$8 sps:$4 sm:$0xff]  }
 0x174   :  { %10039 = vst [vmem:[#allocation39_spill] sm:$0xff] %v8410_v48  ;;  %v8421_v3 = vadd.f32 %v1183_v4, %v8101_v40  ;;  %4765 = vmatprep.subr.bf16.mxu0 %v6730_v9  ;;  %v851_v9 = vadd.f32 %v8109_v41, %v8129_v13 }
 0x175   :  { %v1185_v23 = vpop.f32.mrf.mxu0  ;;  %v8423_v12 = vpop.f32.mrf.mxu1  ;;  %3883 = vmatpush1.bf16.msra.mxu1 %v6725_v35 }
 0x176   :  { %10040 = vst [vmem:[#allocation40_spill] sm:$0xff] %v8423_v12  ;;  %v8425_v48 = vadd.f32 %v1185_v23, %v841_v10  ;;  %v6733_v23 = vld [vmem:[%s9917_s3 + $0x84] ss:$8 sps:$4 sm:$0xff]  }
 0x177   :  { %v1189_v28 = vpop.f32.mrf.mxu0  ;;  %v8433_v40 = vpop.f32.mrf.mxu1  ;;  %4766 = vmatpush1.bf16.msra.mxu0 %v6728_v50  ;;  %3884 = vmatprep.subr.bf16.mxu1 %v6733_v23 }
 0x178   :  { %10041 = vst [vmem:[#allocation41_spill] sm:$0xff] %v8433_v40  ;;  %v8442_v4 = vadd.f32 %v1189_v28, %v8111_v58  ;;  %v6736_v40 = vld [vmem:[%s9917_s3 + $0x184] ss:$8 sps:$4 sm:$0xff]  }
 0x179   :  { %v1191_v32 = vpop.f32.mrf.mxu0  ;;  %v8444_v53 = vpop.f32.mrf.mxu1  ;;  %4767 = vmatprep.subr.bf16.mxu0 %v6736_v40  ;;  %3885 = vmatpush1.bf16.msra.mxu1 %v6731_v56 }
 0x17a   :  { %10042 = vst [vmem:[#allocation42_spill] sm:$0xff] %v8442_v4  ;;  %10043 = vst [vmem:[#allocation43_spill] sm:$0xff] %v8444_v53  ;;  %v8447_v10 = vadd.f32 %v1191_v32, %v8121_v17  ;;  %v6734_v17 = vld [vmem:[%s9917_s3 + $0x180] ss:$8 sps:$4 sm:$0xff]  }
 0x17b   :  { %v1193_v58 = vpop.f32.mrf.mxu0  ;;  %v8455_v28 = vpop.f32.mrf.mxu1  ;;  %4768 = vmatpush1.bf16.msra.mxu0 %v6734_v17 }
 0x17c   :  { %10044 = vst [vmem:[#allocation44_spill] sm:$0xff] %v8447_v10  ;;  %10045 = vst [vmem:[#allocation45_spill] sm:$0xff] %v8455_v28  ;;  %v8466_v35 = vadd.f32 %v1193_v58, %v8123_v6 }
 0x17d   :  { %v1195_v50 = vpop.f32.mrf.mxu0  ;;  %v8468_v32 = vpop.f32.mrf.mxu1 }
 0x17e   :  { %10046 = vst [vmem:[#allocation46_spill] sm:$0xff] %v8468_v32  ;;  %v8470_v28 = vadd.f32 %v1195_v50, %v851_v9  ;;  %v2138_v50 = vlaneseq }
 0x17f   :  { %v1199_v53 = vpop.f32.mrf.mxu0  ;;  %v8472_v12 = vpop.f32.mrf.mxu1 }
 0x180   :  { %10047 = vst [vmem:[#allocation47_spill] sm:$0xff] %v8472_v12  ;;  %v8475_v10 = vadd.f32 %v1199_v53, %v8134_v7 }
 0x181   :  { %v1201_v4 = vpop.f32.mrf.mxu0  ;;  %v8477_v41 = vpop.f32.mrf.mxu1 }
 0x182   :  { %10048 = vst [vmem:[#allocation48_spill] sm:$0xff] %v8477_v41  ;;  %v8480_v6 = vadd.f32 %v1201_v4, %v8141_v45  ;;  %v8506_v41 = vshrl.u32 %v2138_v50, 7  ;;  %v10063_v50 = vld [vmem:[#allocation6_spill] sm:$0xff] }
 0x183   :  { %v1203_v13 = vpop.f32.mrf.mxu0  ;;  %v8482_v40 = vpop.f32.mrf.mxu1 }
 0x184   :  { %10049 = vst [vmem:[#allocation49_spill] sm:$0xff] %v8480_v6  ;;  %10050 = vst [vmem:[#allocation50_spill] sm:$0xff] %v8482_v40  ;;  %v8485_v23 = vadd.f32 %v1203_v13, %v8143_v46 }
 0x185   :  { %v8487_v58 = vpop.f32.mrf.mxu0  ;;  %v8489_v56 = vpop.f32.mrf.mxu1  ;;  %10058 = vst [vmem:[#allocation58_spill] sm:$0xff] %v8506_v41 }
 0x186   :  { %10051 = vst [vmem:[#allocation51_spill] sm:$0xff] %v8485_v23  ;;  %10052 = vst [vmem:[#allocation52_spill] sm:$0xff] %v8489_v56  ;;  %v10071_v23 = vld [vmem:[#allocation9_spill] sm:$0xff] }
 0x187   :  { %v1209_v17 = vpop.f32.mrf.mxu0  ;;  %v8497_v45 = vpop.f32.mrf.mxu1 }
 0x188   :  { %v8492_v7 = vadd.f32 %v1209_v17, %v8159_v62  ;;  %10055 = vst [vmem:[#allocation55_spill] sm:$0xff] %v8497_v45 }
 0x189   :  { %v1211_v53 = vpop.f32.mrf.mxu0  ;;  %v8504_v13 = vpop.f32.mrf.mxu1 }
 0x18a   :  { %10053 = vst [vmem:[#allocation53_spill] sm:$0xff] %v8492_v7  ;;  %v8495_v9 = vadd.f32 %v1211_v53, %v8169_v18  ;;  %10057 = vst [vmem:[#allocation57_spill] sm:$0xff] %v8504_v13  ;;  %v6913_v18 = vmov 1966171168  }
 0x18b   :  { %v1213_v4 = vpop.f32.mrf.mxu0  ;;  %v2389_v53 = vunpack.c.l.s4 %v6913_v18  ;;  %v10064_v18 = vld [vmem:[#allocation5_spill] sm:$0xff] }
 0x18c   :  { %10054 = vst [vmem:[#allocation54_spill] sm:$0xff] %v8495_v9  ;;  %v8500_v40 = vadd.f32 %v1213_v4, %v8171_v34  ;;  %v6914_v9 = vmov 1983009808   ;;  %v8514_v34 = vpop.f32.mrf.mxu1 }
 0x18d   :  { %v8502_v46 = vpop.f32.mrf.mxu0  ;;  %v3159_v45 = vunpack.c.l.s4 %v6914_v9  ;;  %10061 = vst [vmem:[#allocation61_spill] sm:$0xff] %v8514_v34  ;;  %v781_v9 = vadd.f32 %v10064_v18, %v10063_v50  ;;  %v10066_v34 = vld [vmem:[#allocation8_spill] sm:$0xff]  ;;  %v10074_v18 = vld [vmem:[#allocation11_spill] sm:$0xff] }
 0x18e   :  { %10056 = vst [vmem:[#allocation56_spill] sm:$0xff] %v8500_v40  ;;  %v8530_v40 = vpop.f32.mrf.mxu1 }
 0x18f   :  { %v1219_v56 = vpop.f32.mrf.mxu0  ;;  %10068 = vst [vmem:[#allocation5_spill] sm:$0xff] %v8530_v40 }
 0x190   :  { %v8509_v62 = vadd.f32 %v1219_v56, %v8181_v29  ;;  %v2136_v29 = vld [vmem:[%s9916_s2] sm:$0x3]  ;;  %v10070_v56 = vld [vmem:[#allocation10_spill] sm:$0xff] }
 0x191   :  { %v1221_v17 = vpop.f32.mrf.mxu0  ;;  %v861_v6 = vadd.f32 %v10071_v23, %v10070_v56  ;;  %v1704_v23 = vadd.f32 %v8204_v22, %v8220_v2  ;;  %v10076_v56 = vld [vmem:[#allocation15_spill] sm:$0xff] }
 0x192   :  { %10059 = vst [vmem:[#allocation59_spill] sm:$0xff] %v8509_v62  ;;  %v8512_v7 = vadd.f32 %v1221_v17, %v8188_v49  ;;  %v2390_v49 = vunpack.c.0.s8 %v2389_v53  ;;  %v3160_v17 = vunpack.c.0.s8 %v3159_v45  ;;  %v10072_v45 = vsub.s32 1, %v8506_v41  ;;  %v10081_v22 = vld [vmem:[#allocation19_spill] sm:$0xff] }
 0x193   :  { %v1223_v4 = vpop.f32.mrf.mxu0  ;;  %v8585_v2 = vadd.f32 %v10081_v22, %v8250_v11  ;;  %v10087_v11 = vld [vmem:[#allocation25_spill] sm:$0xff] }
 0x194   :  { %10060 = vst [vmem:[#allocation60_spill] sm:$0xff] %v8512_v7  ;;  %v8518_v13 = vadd.f32 %v1223_v4, %v8190_v14  ;;  %v10067_v7 = vld [vmem:[#allocation7_spill] sm:$0xff]  ;;  %v1241_v14 = vadd.f32 %v8227_v42, %v781_v9  ;;  %v10075_v9 = vld [vmem:[#allocation13_spill] sm:$0xff] }
 0x195   :  { %v8526_v62 = vpop.f32.mrf.mxu0  ;;  %v791_v12 = vadd.f32 %v10067_v7, %v10066_v34  ;;  %v8545_v7 = vrot.slane %v2136_v29, %v10072_v45  ;;  %v10073_v34 = vld [vmem:[#allocation12_spill] sm:$0xff]  ;;  %v8551_v40 = vadd.f32 %v10075_v9, %v8192_v16  ;;  %v10078_v45 = vld [vmem:[#allocation17_spill] sm:$0xff] }
 0x196   :  { %10062 = vst [vmem:[#allocation62_spill] sm:$0xff] %v8518_v13  ;;  %10065 = vst [vmem:[#allocation6_spill] sm:$0xff] %v8526_v62  ;;  %v10069_v13 = vsub.s32 0, %v8506_v41  ;;  %v871_v42 = vadd.f32 %v10074_v18, %v10073_v34  ;;  %v8554_v62 = vsub.s32 %v2390_v49, %v8506_v41  ;;  %v1705_v49 = vadd.f32 %v10076_v56, %v8225_v26  ;;  %v10080_v34 = vld [vmem:[#allocation18_spill] sm:$0xff]  ;;  %v10083_v26 = vld [vmem:[#allocation21_spill] sm:$0xff] }
 0x197   :  { %v1229_v4 = vpop.f32.mrf.mxu0  ;;  %v1245_v50 = vadd.f32 %v8252_v24, %v791_v12  ;;  %v8557_v24 = vsub.s32 %v3160_v17, %v8506_v41  ;;  %v1703_v12 = vadd.f32 %v8200_v1, %v8215_v31  ;;  %v10077_v17 = vld [vmem:[#allocation16_spill] sm:$0xff]  ;;  %v8592_v9 = vadd.f32 %v10083_v26, %v8259_v33 }
 0x198   :  { %v8535_v32 = vrot.slane %v2136_v29, %v10069_v13  ;;  %v8541_v53 = vadd.f32 %v1229_v4, %v8197_v0  ;;  %v8561_v0 = vadd.f32 %v8195_v51, %v8208_v57  ;;  %v8567_v29 = vpop.f32.mrf.mxu1  ;;  %v1706_v4 = vadd.f32 %v10077_v17, %v1241_v14  ;;  %v10079_v57 = vld [vmem:[#allocation22_spill] sm:$0xff]  ;;  %v10086_v17 = vld [vmem:[#allocation24_spill] sm:$0xff] }
 0x199   :  { %v1231_v13 = vpop.f32.mrf.mxu0  ;;  %v8577_v51 = vadd.f32 %v10078_v45, %v8234_v21  ;;  %v8581_v1 = vadd.f32 %v10080_v34, %v10079_v57  ;;  %v10084_v14 = vld [vmem:[#allocation14_spill] sm:$0xff]  ;;  %v10085_v21 = vld [vmem:[#allocation23_spill] sm:$0xff]  ;;  %v8603_v45 = vadd.f32 %v10086_v17, %v8277_v5  ;;  %v8607_v57 = vadd.f32 %v10087_v11, %v8284_v54  ;;  %v10091_v5 = vld [vmem:[#allocation29_spill] sm:$0xff] }
 0x19a   :  { %v8570_v16 = vadd.f32 %v1231_v13, %v8202_v15  ;;  %v10082_v15 = vld [vmem:[#allocation20_spill] sm:$0xff]  ;;  %v8599_v56 = vadd.f32 %v10085_v21, %v8264_v30  ;;  %v8623_v26 = vadd.f32 %v10091_v5, %v8320_v20  ;;  %v10092_v54 = vld [vmem:[#allocation30_spill] sm:$0xff]  ;;  %v1694_v21 = vpop.f32.mrf.mxu1 }
 0x19b   :  { %v1233_v31 = vpop.f32.mrf.mxu0  ;;  %v8588_v18 = vadd.f32 %v10082_v15, %v1245_v50  ;;  %v10088_v50 = vld [vmem:[#allocation26_spill] sm:$0xff]  ;;  %v10090_v30 = vld [vmem:[#allocation28_spill] sm:$0xff] }
 0x19c   :  { %v8595_v13 = vadd.f32 %v1233_v31, %v10084_v14  ;;  %v8611_v34 = vadd.f32 %v10088_v50, %v8292_v37  ;;  %v10089_v31 = vld [vmem:[#allocation27_spill] sm:$0xff]  ;;  %v8619_v15 = vadd.f32 %v10090_v30, %v8313_v61  ;;  %v8627_v14 = vadd.f32 %v10092_v54, %v8325_v8  ;;  %v10094_v11 = vld [vmem:[#allocation36_spill] sm:$0xff]  ;;  %v10096_v8 = vld [vmem:[#allocation33_spill] sm:$0xff] }
 0x19d   :  { %v1235_v33 = vpop.f32.mrf.mxu0  ;;  %v8615_v22 = vadd.f32 %v10089_v31, %v8297_v25  ;;  %v10093_v37 = vld [vmem:[#allocation31_spill] sm:$0xff]  ;;  %v8635_v25 = vadd.f32 %v8318_v59, %v8343_v38  ;;  %v8639_v61 = vadd.f32 %v8322_v43, %v8359_v44  ;;  %v10095_v20 = vld [vmem:[#allocation32_spill] sm:$0xff]  ;;  %v8647_v30 = vadd.f32 %v10096_v8, %v8381_v27  ;;  %v10099_v43 = vld [vmem:[#allocation37_spill] sm:$0xff] }
 0x19e   :  { %v8631_v17 = vadd.f32 %v10093_v37, %v8336_v36  ;;  %v8643_v50 = vadd.f32 %v10095_v20, %v10094_v11  ;;  %v10097_v36 = vld [vmem:[#allocation34_spill] sm:$0xff]  ;;  %v10098_v59 = vld [vmem:[#allocation35_spill] sm:$0xff]  ;;  %v8659_v44 = vadd.f32 %v10099_v43, %v8397_v55  ;;  %v8663_v37 = vadd.f32 %v8383_v63, %v8402_v60  ;;  %v1696_v55 = vpop.f32.mrf.mxu1  ;;  %v10102_v60 = vld [vmem:[#allocation44_spill] sm:$0xff] }
 0x19f   :  { %v1969_v31 = vpop.f32.mrf.mxu0  ;;  %v8651_v5 = vadd.f32 %v10097_v36, %v8388_v39  ;;  %v8655_v38 = vadd.f32 %v10098_v59, %v8392_v47  ;;  %v8667_v27 = vadd.f32 %v8390_v52, %v8421_v3  ;;  %v1273_v39 = vadd.f32 %v8487_v58, %v861_v6  ;;  %v10101_v20 = vld [vmem:[#allocation38_spill] sm:$0xff]  ;;  %v10103_v36 = vld [vmem:[#allocation39_spill] sm:$0xff]  ;;  %v10104_v52 = vld [vmem:[#allocation40_spill] sm:$0xff] }
 0x1a0   :  { %v2088_v54 = vadd.f32 %v1969_v31, %v1703_v12  ;;  %v8672_v47 = vadd.f32 %v8394_v19, %v8425_v48  ;;  %v10100_v12 = vld [vmem:[#allocation42_spill] sm:$0xff]  ;;  %v8681_v59 = vadd.f32 %v10103_v36, %v10102_v60  ;;  %v8685_v3 = vadd.f32 %v10104_v52, %v8466_v35  ;;  %v10105_v6 = vld [vmem:[#allocation41_spill] sm:$0xff]  ;;  %v10106_v43 = vld [vmem:[#allocation43_spill] sm:$0xff] }
 0x1a1   :  { %v1971_v11 = vpop.f32.mrf.mxu0  ;;  %v8676_v31 = vadd.f32 %v10101_v20, %v10100_v12  ;;  %v8689_v19 = vadd.f32 %v10105_v6, %v8470_v28  ;;  %v1277_v48 = vadd.f32 %v8502_v46, %v871_v42  ;;  %v8694_v12 = vadd.f32 %v10106_v43, %v8475_v10  ;;  %v10111_v35 = vld [vmem:[#allocation51_spill] sm:$0xff]  ;;  %v10112_v36 = vld [vmem:[#allocation46_spill] sm:$0xff]  ;;  %v10116_v46 = vld [vmem:[#allocation53_spill] sm:$0xff] }
 0x1a2   :  { %v2148_v8 = vadd.f32 %v8535_v32, %v2088_v54  ;;  %v2089_v63 = vadd.f32 %v1971_v11, %v1704_v23  ;;  %v10108_v23 = vld [vmem:[#allocation49_spill] sm:$0xff]  ;;  %v8703_v52 = vadd.f32 %v10112_v36, %v10111_v35  ;;  %v10114_v28 = vld [vmem:[#allocation47_spill] sm:$0xff]  ;;  %v10117_v42 = vld [vmem:[#allocation48_spill] sm:$0xff] }
 0x1a3   :  { %v1973_v58 = vpop.f32.mrf.mxu0  ;;  %10107 = vst [vmem:[#allocation8_spill] sm:$0xff] %v8694_v12  ;;  %v10109_v54 = vld [vmem:[#allocation45_spill] sm:$0xff]  ;;  %v8706_v6 = vadd.f32 %v10114_v28, %v1273_v39  ;;  %v8710_v41 = vadd.f32 %v10117_v42, %v10116_v46  ;;  %v10119_v10 = vld [vmem:[#allocation54_spill] sm:$0xff]  ;;  %v10122_v35 = vld [vmem:[#allocation56_spill] sm:$0xff] }
 0x1a4   :  { %v8698_v11 = vadd.f32 %v10109_v54, %v10108_v23  ;;  %v2149_v20 = vadd.f32 %v8545_v7, %v2089_v63  ;;  %v2090_v60 = vadd.f32 %v1973_v58, %v1705_v49  ;;  %10113 = vst [vmem:[#allocation10_spill] sm:$0xff] %v8703_v52  ;;  %v10120_v43 = vld [vmem:[#allocation50_spill] sm:$0xff]  ;;  %v1698_v54 = vpop.f32.mrf.mxu1  ;;  %v10123_v36 = vld [vmem:[#allocation52_spill] sm:$0xff]  ;;  %v10124_v39 = vld [vmem:[#allocation55_spill] sm:$0xff] }
 0x1a5   :  { %10115 = vst [vmem:[#allocation9_spill] sm:$0xff] %v8706_v6  ;;  %10118 = vst [vmem:[#allocation12_spill] sm:$0xff] %v8710_v41  ;;  %v8714_v12 = vadd.f32 %v10120_v43, %v10119_v10  ;;  %v1975_v23 = vpop.f32.mrf.mxu0  ;;  %v8719_v52 = vadd.f32 %v10123_v36, %v10122_v35  ;;  %v8722_v28 = vadd.f32 %v10124_v39, %v1277_v48  ;;  %v10125_v46 = vld [vmem:[#allocation59_spill] sm:$0xff]  ;;  %v10126_v42 = vld [vmem:[#allocation57_spill] sm:$0xff] }
 0x1a6   :  { %10110 = vst [vmem:[#allocation7_spill] sm:$0xff] %v8698_v11  ;;  %v2196_v11 = vmax.f32 %v2148_v8, 0.0  ;;  %v2197_v63 = vmax.f32 %v2149_v20, 0.0  ;;  %v2150_v49 = vadd.f32 %v8535_v32, %v2090_v60  ;;  %v2091_v58 = vadd.f32 %v1975_v23, %v1706_v4  ;;  %v10128_v10 = vld [vmem:[#allocation6_spill] sm:$0xff]  ;;  %v10129_v8 = vld [vmem:[#allocation60_spill] sm:$0xff]  ;;  %v10130_v20 = vld [vmem:[#allocation61_spill] sm:$0xff] }
 0x1a7   :  { %10121 = vst [vmem:[#allocation11_spill] sm:$0xff] %v8714_v12  ;;  %v8726_v41 = vadd.f32 %v10126_v42, %v10125_v46  ;;  %v1281_v43 = vadd.f32 %v10128_v10, %v8551_v40  ;;  %v1979_v12 = vpop.f32.mrf.mxu0  ;;  %v8732_v6 = vadd.f32 %v10130_v20, %v10129_v8  ;;  %v10131_v35 = vld [vmem:[#allocation62_spill] sm:$0xff]  ;;  %v10132_v36 = vld [vmem:[#allocation5_spill] sm:$0xff]  ;;  %v1285_v39 = vadd.f32 %v1235_v33, %v8561_v0  ;;  %v1700_v40 = vpop.f32.mrf.mxu1 }
 0x1a8   :  { %v2292_v4 = vcombine.low %v2196_v11, %v2197_v63  ;;  %v2293_v60 = vcombine.high %v2196_v11, %v2197_v63  ;;  %v2151_v23 = vadd.f32 %v8545_v7, %v2091_v58  ;;  %v8737_v48 = vadd.f32 %v10132_v36, %v10131_v35 }
 0x1a9   :  { %10127 = vst [vmem:[#allocation13_spill] sm:$0xff] %v8726_v41  ;;  %v2198_v46 = vmax.f32 %v2150_v49, 0.0  ;;  %v2092_v42 = vadd.f32 %v1979_v12, %v8577_v51  ;;  %v1981_v41 = vpop.f32.mrf.mxu0  ;;  %v8745_v63 = vadd.f32 %v8567_v29, %v1281_v43  ;;  %v8748_v58 = vadd.f32 %v1694_v21, %v8541_v53 }
 0x1aa   :  { %v2394_v10 = vrot.slane %v2292_v4, %v8554_v62  ;;  %v2401_v8 = vrot.slane %v2293_v60, %v8554_v62  ;;  %v2199_v20 = vmax.f32 %v2151_v23, 0.0  ;;  %v2093_v11 = vadd.f32 %v1981_v41, %v8581_v1 }
 0x1ab   :  { %v8751_v0 = vadd.f32 %v1696_v55, %v8570_v16  ;;  %v2152_v51 = vadd.f32 %v8535_v32, %v2092_v42  ;;  %v1983_v33 = vpop.f32.mrf.mxu0  ;;  %v8755_v60 = vadd.f32 %v1698_v54, %v8595_v13  ;;  %v8757_v41 = vadd.f32 %v1700_v40, %v1285_v39 }
 0x1ac   :  { %v2772_v12 = vrot.slane %v2394_v10, 4  ;;  %v2773_v49 = vrot.slane %v2401_v8, 4  ;;  %v2294_v4 = vcombine.low %v2198_v46, %v2199_v20  ;;  %v2295_v35 = vcombine.high %v2198_v46, %v2199_v20 }
 0x1ad   :  { %10133 = vst [vmem:[#allocation15_spill] sm:$0xff] %v8751_v0  ;;  %10134 = vst [vmem:[#allocation16_spill] sm:$0xff] %v8755_v60  ;;  %v2153_v29 = vadd.f32 %v8545_v7, %v2093_v11  ;;  %v2094_v53 = vadd.f32 %v1983_v33, %v8585_v2  ;;  %v1985_v1 = vpop.f32.mrf.mxu0  ;;  %v2200_v23 = vmax.f32 %v2152_v51, 0.0 }
 0x1ae   :  { %10135 = vst [vmem:[#allocation17_spill] sm:$0xff] %v8757_v41  ;;  %v2868_v21 = vmax.f32 %v2394_v10, %v2772_v12  ;;  %v2869_v16 = vmax.f32 %v2401_v8, %v2773_v49  ;;  %v2408_v55 = vrot.slane %v2294_v4, %v8554_v62  ;;  %v2415_v43 = vrot.slane %v2295_v35, %v8554_v62 }
 0x1af   :  { %v2201_v36 = vmax.f32 %v2153_v29, 0.0  ;;  %v2154_v46 = vadd.f32 %v8535_v32, %v2094_v53  ;;  %v2095_v13 = vadd.f32 %v1985_v1, %v8588_v18  ;;  %v1989_v54 = vpop.f32.mrf.mxu0 }
 0x1b0   :  { %v2964_v39 = vrot.slane %v2868_v21, 2  ;;  %v2965_v42 = vrot.slane %v2869_v16, 2  ;;  %v2774_v40 = vrot.slane %v2408_v55, 4  ;;  %v2775_v20 = vrot.slane %v2415_v43, 4 }
 0x1b1   :  { %v2296_v11 = vcombine.low %v2200_v23, %v2201_v36  ;;  %v2297_v2 = vcombine.high %v2200_v23, %v2201_v36  ;;  %v2202_v33 = vmax.f32 %v2154_v46, 0.0  ;;  %v2155_v10 = vadd.f32 %v8545_v7, %v2095_v13  ;;  %v1991_v8 = vpop.f32.mrf.mxu0 }
 0x1b2   :  { %v3060_v12 = vmax.f32 %v2868_v21, %v2964_v39  ;;  %v3061_v49 = vmax.f32 %v2869_v16, %v2965_v42  ;;  %v2870_v4 = vmax.f32 %v2408_v55, %v2774_v40  ;;  %v2871_v51 = vmax.f32 %v2415_v43, %v2775_v20 }
 0x1b3   :  { %v2422_v35 = vrot.slane %v2296_v11, %v8554_v62  ;;  %v2429_v29 = vrot.slane %v2297_v2, %v8554_v62  ;;  %v2203_v18 = vmax.f32 %v2155_v10, 0.0  ;;  %v2096_v53 = vadd.f32 %v1989_v54, %v8592_v9  ;;  %v1993_v1 = vpop.f32.mrf.mxu0 }
 0x1b4   :  { %v3156_v41 = vcombine.low %v3060_v12, %v3061_v49  ;;  %v2966_v60 = vrot.slane %v2870_v4, 2  ;;  %v2967_v0 = vrot.slane %v2871_v51, 2  ;;  %v2097_v23 = vadd.f32 %v1991_v8, %v8599_v56 }
 0x1b5   :  { %v2776_v36 = vrot.slane %v2422_v35, 4  ;;  %v2777_v46 = vrot.slane %v2429_v29, 4  ;;  %v2298_v13 = vcombine.low %v2202_v33, %v2203_v18  ;;  %v2299_v21 = vcombine.high %v2202_v33, %v2203_v18  ;;  %v1995_v16 = vpop.f32.mrf.mxu0 }
 0x1b6   :  { %v8771_v55 = vrot.slane %v3156_v41, %v8557_v24  ;;  %v3062_v43 = vmax.f32 %v2870_v4, %v2966_v60  ;;  %v3063_v39 = vmax.f32 %v2871_v51, %v2967_v0  ;;  %v2156_v42 = vadd.f32 %v8535_v32, %v2096_v53 }
 0x1b7   :  { %v2872_v40 = vmax.f32 %v2422_v35, %v2776_v36  ;;  %v2873_v9 = vmax.f32 %v2429_v29, %v2777_v46  ;;  %v2436_v54 = vrot.slane %v2298_v13, %v8554_v62  ;;  %v2443_v20 = vrot.slane %v2299_v21, %v8554_v62  ;;  %v1999_v11 = vpop.f32.mrf.mxu0 }
 0x1b8   :  { %v3157_v56 = vcombine.low %v3062_v43, %v3063_v39  ;;  %v2204_v2 = vmax.f32 %v2156_v42, 0.0  ;;  %v2157_v10 = vadd.f32 %v8545_v7, %v2097_v23  ;;  %v2098_v33 = vadd.f32 %v1993_v1, %v8603_v45 }
 0x1b9   :  { %v2968_v8 = vrot.slane %v2872_v40, 2  ;;  %v2969_v41 = vrot.slane %v2873_v9, 2  ;;  %v2778_v12 = vrot.slane %v2436_v54, 4  ;;  %v2779_v60 = vrot.slane %v2443_v20, 4  ;;  %v2001_v0 = vpop.f32.mrf.mxu0 }
 0x1ba   :  { %v3171_v49 = vrot.slane %v3157_v56, %v8557_v24  ;;  %v2205_v4 = vmax.f32 %v2157_v10, 0.0  ;;  %v2158_v51 = vadd.f32 %v8535_v32, %v2098_v33  ;;  %v2099_v35 = vadd.f32 %v1995_v16, %v8607_v57 }
 0x1bb   :  { %v3064_v29 = vmax.f32 %v2872_v40, %v2968_v8  ;;  %v3065_v18 = vmax.f32 %v2873_v9, %v2969_v41  ;;  %v2874_v53 = vmax.f32 %v2436_v54, %v2778_v12  ;;  %v2875_v36 = vmax.f32 %v2443_v20, %v2779_v60  ;;  %v2003_v46 = vpop.f32.mrf.mxu0 }
 0x1bc   :  { %v3172_v23 = vcombine.low %v8771_v55, %v3171_v49  ;;  %v2300_v45 = vcombine.low %v2204_v2, %v2205_v4  ;;  %v2301_v1 = vcombine.high %v2204_v2, %v2205_v4  ;;  %v2206_v13 = vmax.f32 %v2158_v51, 0.0 }
 0x1bd   :  { %v3173_v21 = vcombine.low %v3064_v29, %v3065_v18  ;;  %v2970_v43 = vrot.slane %v2874_v53, 2  ;;  %v2971_v39 = vrot.slane %v2875_v36, 2  ;;  %v2159_v42 = vadd.f32 %v8545_v7, %v2099_v35  ;;  %v2005_v56 = vpop.f32.mrf.mxu0 }
 0x1be   :  { %v2450_v10 = vrot.slane %v2300_v45, %v8554_v62  ;;  %v2457_v57 = vrot.slane %v2301_v1, %v8554_v62  ;;  %v2100_v16 = vadd.f32 %v1999_v11, %v8611_v34  ;;  %v2101_v40 = vadd.f32 %v2001_v0, %v8615_v22 }
 0x1bf   :  { %v3181_v9 = vrot.slane %v3173_v21, %v8557_v24  ;;  %v3066_v55 = vmax.f32 %v2874_v53, %v2970_v43  ;;  %v3067_v54 = vmax.f32 %v2875_v36, %v2971_v39  ;;  %v2207_v20 = vmax.f32 %v2159_v42, 0.0  ;;  %v2009_v2 = vpop.f32.mrf.mxu0 }
 0x1c0   :  { %v2780_v33 = vrot.slane %v2450_v10, 4  ;;  %v2781_v8 = vrot.slane %v2457_v57, 4  ;;  %v2160_v41 = vadd.f32 %v8535_v32, %v2100_v16  ;;  %v2161_v12 = vadd.f32 %v8545_v7, %v2101_v40 }
 0x1c1   :  { %v3174_v60 = vcombine.low %v3066_v55, %v3067_v54  ;;  %v2302_v49 = vcombine.low %v2206_v13, %v2207_v20  ;;  %v2303_v4 = vcombine.high %v2206_v13, %v2207_v20  ;;  %v2102_v51 = vadd.f32 %v2003_v46, %v8619_v15  ;;  %v2011_v34 = vpop.f32.mrf.mxu0 }
 0x1c2   :  { %v2876_v11 = vmax.f32 %v2450_v10, %v2780_v33  ;;  %v2877_v22 = vmax.f32 %v2457_v57, %v2781_v8  ;;  %v2208_v0 = vmax.f32 %v2160_v41, 0.0  ;;  %v2209_v35 = vmax.f32 %v2161_v12, 0.0 }
 0x1c3   :  { %v3188_v29 = vrot.slane %v3174_v60, %v8557_v24  ;;  %v2464_v18 = vrot.slane %v2302_v49, %v8554_v62  ;;  %v2471_v53 = vrot.slane %v2303_v4, %v8554_v62  ;;  %v2162_v36 = vadd.f32 %v8535_v32, %v2102_v51  ;;  %v2013_v45 = vpop.f32.mrf.mxu0 }
 0x1c4   :  { %v2972_v1 = vrot.slane %v2876_v11, 2  ;;  %v2973_v21 = vrot.slane %v2877_v22, 2  ;;  %v2304_v43 = vcombine.low %v2208_v0, %v2209_v35  ;;  %v2305_v13 = vcombine.high %v2208_v0, %v2209_v35 }
 0x1c5   :  { %v3189_v39 = vcombine.low %v3181_v9, %v3188_v29  ;;  %v2782_v15 = vrot.slane %v2464_v18, 4  ;;  %v2783_v46 = vrot.slane %v2471_v53, 4  ;;  %v2210_v42 = vmax.f32 %v2162_v36, 0.0  ;;  %v2015_v10 = vpop.f32.mrf.mxu0 }
 0x1c6   :  { %v3068_v57 = vmax.f32 %v2876_v11, %v2972_v1  ;;  %v3069_v16 = vmax.f32 %v2877_v22, %v2973_v21  ;;  %v2478_v40 = vrot.slane %v2304_v43, %v8554_v62  ;;  %v2485_v55 = vrot.slane %v2305_v13, %v8554_v62 }
 0x1c7   :  { %v3372_v54 = vpack.c.bf16 %v3189_v39, %v3172_v23  ;;  %v6325_v20 = vpack.c.bf16 %v3189_v39, %v3189_v39  ;;  %v2878_v33 = vmax.f32 %v2464_v18, %v2782_v15  ;;  %v2879_v8 = vmax.f32 %v2471_v53, %v2783_v46  ;;  %v2019_v41 = vpop.f32.mrf.mxu0 }
 0x1c8   :  { %v3190_v12 = vcombine.low %v3068_v57, %v3069_v16  ;;  %v2784_v60 = vrot.slane %v2478_v40, 4  ;;  %v2785_v49 = vrot.slane %v2485_v55, 4  ;;  %v2103_v9 = vadd.f32 %v2005_v56, %v8623_v26 }
 0x1c9   :  { %v8799_v4 = vrot.slane %v3372_v54, %v8557_v24  ;;  %v8802_v51 = vrot.slane %v6325_v20, %v8557_v24  ;;  %v2974_v11 = vrot.slane %v2878_v33, 2  ;;  %v2975_v22 = vrot.slane %v2879_v8, 2  ;;  %v2021_v0 = vpop.f32.mrf.mxu0 }
 0x1ca   :  { %v8805_v23 = vrot.slane %v3190_v12, %v8557_v24  ;;  %v2880_v35 = vmax.f32 %v2478_v40, %v2784_v60  ;;  %v2881_v29 = vmax.f32 %v2485_v55, %v2785_v49  ;;  %v2163_v18 = vadd.f32 %v8545_v7, %v2103_v9 }
 0x1cb   :  { %v8810_v53 = vcombine.high %v8799_v4, %v8799_v4  ;;  %v3070_v26 = vmax.f32 %v2878_v33, %v2974_v11  ;;  %v3071_v56 = vmax.f32 %v2879_v8, %v2975_v22  ;;  %v2104_v36 = vadd.f32 %v2009_v2, %v8627_v14  ;;  %v2023_v1 = vpop.f32.mrf.mxu0 }
 0x1cc   :  { %v2976_v21 = vrot.slane %v2880_v35, 2  ;;  %v2977_v43 = vrot.slane %v2881_v29, 2  ;;  %v2211_v13 = vmax.f32 %v2163_v18, 0.0  ;;  %v2105_v39 = vadd.f32 %v2011_v34, %v8631_v17 }
 0x1cd   :  { %v3191_v15 = vcombine.low %v3070_v26, %v3071_v56  ;;  %v2164_v46 = vadd.f32 %v8535_v32, %v2104_v36  ;;  %v2106_v57 = vadd.f32 %v2013_v45, %v8635_v25  ;;  %v2107_v16 = vadd.f32 %v2015_v10, %v8639_v61  ;;  %v8817_v40 = vpop.f32.mrf.mxu0 }
 0x1ce   :  { %v3072_v55 = vmax.f32 %v2880_v35, %v2976_v21  ;;  %v3073_v54 = vmax.f32 %v2881_v29, %v2977_v43  ;;  %v2306_v20 = vcombine.low %v2210_v42, %v2211_v13  ;;  %v2307_v33 = vcombine.high %v2210_v42, %v2211_v13 }
 0x1cf   :  { %v8820_v14 = vrot.slane %v3191_v15, %v8557_v24  ;;  %v2212_v2 = vmax.f32 %v2164_v46, 0.0  ;;  %v2165_v8 = vadd.f32 %v8545_v7, %v2105_v39  ;;  %v2166_v17 = vadd.f32 %v8535_v32, %v2106_v57  ;;  %v8824_v34 = vpop.f32.mrf.mxu0 }
 0x1d0   :  { %v3207_v12 = vcombine.low %v3072_v55, %v3073_v54  ;;  %v2492_v25 = vrot.slane %v2306_v20, %v8554_v62  ;;  %v2499_v61 = vrot.slane %v2307_v33, %v8554_v62  ;;  %v2167_v45 = vadd.f32 %v8545_v7, %v2107_v16 }
 0x1d1   :  { %v3206_v42 = vcombine.low %v8805_v23, %v8820_v14  ;;  %v2213_v10 = vmax.f32 %v2165_v8, 0.0  ;;  %v2214_v60 = vmax.f32 %v2166_v17, 0.0  ;;  %v2108_v49 = vadd.f32 %v2019_v41, %v8643_v50  ;;  %v8832_v9 = vpop.f32.mrf.mxu0 }
 0x1d2   :  { %v3215_v11 = vrot.slane %v3207_v12, %v8557_v24  ;;  %v2786_v22 = vrot.slane %v2492_v25, 4  ;;  %v2787_v35 = vrot.slane %v2499_v61, 4  ;;  %v2215_v29 = vmax.f32 %v2167_v45, 0.0 }
 0x1d3   :  { %v2308_v18 = vcombine.low %v2212_v2, %v2213_v10  ;;  %v2309_v26 = vcombine.high %v2212_v2, %v2213_v10  ;;  %v2168_v56 = vadd.f32 %v8535_v32, %v2108_v49  ;;  %v2109_v36 = vadd.f32 %v2021_v0, %v8647_v30  ;;  %v8837_v21 = vpop.f32.mrf.mxu0  ;;  %v6739_v10 = vld [vmem:[%s9917_s3 + $0x74] ss:$8 sps:$4 sm:$0xff]  }
 0x1d4   :  { %v2882_v43 = vmax.f32 %v2492_v25, %v2786_v22  ;;  %v2883_v13 = vmax.f32 %v2499_v61, %v2787_v35  ;;  %v2310_v39 = vcombine.low %v2214_v60, %v2215_v29  ;;  %v2311_v15 = vcombine.high %v2214_v60, %v2215_v29  ;;  %4095 = vmatprep.subr.bf16.mxu1 %v6739_v10 }
 0x1d5   :  { %v2506_v50 = vrot.slane %v2308_v18, %v8554_v62  ;;  %v2513_v41 = vrot.slane %v2309_v26, %v8554_v62  ;;  %v2216_v46 = vmax.f32 %v2168_v56, 0.0  ;;  %v2169_v57 = vadd.f32 %v8545_v7, %v2109_v36  ;;  %v8842_v16 = vpop.f32.mrf.mxu0 }
 0x1d6   :  { %v2978_v55 = vrot.slane %v2882_v43, 2  ;;  %v2979_v54 = vrot.slane %v2883_v13, 2  ;;  %v2520_v20 = vrot.slane %v2310_v39, %v8554_v62  ;;  %v2527_v30 = vrot.slane %v2311_v15, %v8554_v62 }
 0x1d7   :  { %v2788_v0 = vrot.slane %v2506_v50, 4  ;;  %v2789_v33 = vrot.slane %v2513_v41, 4  ;;  %v2217_v2 = vmax.f32 %v2169_v57, 0.0  ;;  %v2110_v8 = vadd.f32 %v2023_v1, %v8651_v5  ;;  %v2039_v17 = vpop.f32.mrf.mxu0 }
 0x1d8   :  { %v3074_v12 = vmax.f32 %v2882_v43, %v2978_v55  ;;  %v3075_v25 = vmax.f32 %v2883_v13, %v2979_v54  ;;  %v2790_v61 = vrot.slane %v2520_v20, 4  ;;  %v2791_v45 = vrot.slane %v2527_v30, 4 }
 0x1d9   :  { %v2884_v60 = vmax.f32 %v2506_v50, %v2788_v0  ;;  %v2885_v49 = vmax.f32 %v2513_v41, %v2789_v33  ;;  %v2312_v22 = vcombine.low %v2216_v46, %v2217_v2  ;;  %v2313_v35 = vcombine.high %v2216_v46, %v2217_v2  ;;  %v2041_v29 = vpop.f32.mrf.mxu0 }
 0x1da   :  { %v3208_v18 = vcombine.low %v3074_v12, %v3075_v25  ;;  %v2886_v26 = vmax.f32 %v2520_v20, %v2790_v61  ;;  %v2887_v56 = vmax.f32 %v2527_v30, %v2791_v45  ;;  %v2170_v36 = vadd.f32 %v8535_v32, %v2110_v8 }
 0x1db   :  { %v2980_v5 = vrot.slane %v2884_v60, 2  ;;  %v2981_v1 = vrot.slane %v2885_v49, 2  ;;  %v2534_v43 = vrot.slane %v2312_v22, %v8554_v62  ;;  %v2541_v13 = vrot.slane %v2313_v35, %v8554_v62  ;;  %v2043_v20 = vpop.f32.mrf.mxu0 }
 0x1dc   :  { %v3222_v39 = vrot.slane %v3208_v18, %v8557_v24  ;;  %v2982_v15 = vrot.slane %v2886_v26, 2  ;;  %v2983_v50 = vrot.slane %v2887_v56, 2  ;;  %v2218_v41 = vmax.f32 %v2170_v36, 0.0 }
 0x1dd   :  { %v3076_v57 = vmax.f32 %v2884_v60, %v2980_v5  ;;  %v3077_v46 = vmax.f32 %v2885_v49, %v2981_v1  ;;  %v2792_v55 = vrot.slane %v2534_v43, 4  ;;  %v2793_v54 = vrot.slane %v2541_v13, 4 }
 0x1de   :  { %v3223_v30 = vcombine.low %v3215_v11, %v3222_v39  ;;  %v3078_v0 = vmax.f32 %v2886_v26, %v2982_v15  ;;  %v3079_v33 = vmax.f32 %v2887_v56, %v2983_v50  ;;  %v2111_v2 = vadd.f32 %v8817_v40, %v8655_v38  ;;  %v8866_v40 = vpop.f32.mrf.mxu0 }
 0x1df   :  { %v3224_v8 = vcombine.low %v3076_v57, %v3077_v46  ;;  %v2888_v12 = vmax.f32 %v2534_v43, %v2792_v55  ;;  %v2889_v25 = vmax.f32 %v2541_v13, %v2793_v54  ;;  %v2112_v61 = vadd.f32 %v8824_v34, %v8659_v44 }
 0x1e0   :  { %v3373_v45 = vpack.c.bf16 %v3223_v30, %v3206_v42  ;;  %v6326_v10 = vpack.c.bf16 %v3223_v30, %v3223_v30  ;;  %v3225_v60 = vcombine.low %v3078_v0, %v3079_v33  ;;  %v2171_v49 = vadd.f32 %v8545_v7, %v2111_v2  ;;  %v8887_v57 = vpop.f32.mrf.mxu0 }
 0x1e1   :  { %v8863_v11 = vrot.slane %v3224_v8, %v8557_v24  ;;  %v2984_v22 = vrot.slane %v2888_v12, 2  ;;  %v2985_v35 = vrot.slane %v2889_v25, 2  ;;  %v2172_v38 = vadd.f32 %v8535_v32, %v2112_v61 }
 0x1e2   :  { %v8869_v18 = vrot.slane %v3373_v45, %v8557_v24  ;;  %v8872_v44 = vrot.slane %v6326_v10, %v8557_v24  ;;  %v8875_v23 = vrot.slane %v3225_v60, %v8557_v24  ;;  %v2219_v14 = vmax.f32 %v2171_v49, 0.0  ;;  %v8897_v8 = vpop.f32.mrf.mxu0 }
 0x1e3   :  { %v3080_v34 = vmax.f32 %v2888_v12, %v2984_v22  ;;  %v3081_v42 = vmax.f32 %v2889_v25, %v2985_v35  ;;  %v2220_v26 = vmax.f32 %v2172_v38, 0.0  ;;  %v2113_v56 = vadd.f32 %v8832_v9, %v8663_v37 }
 0x1e4   :  { %v3240_v36 = vcombine.low %v8863_v11, %v8875_v23  ;;  %v2314_v5 = vcombine.low %v2218_v41, %v2219_v14  ;;  %v2315_v1 = vcombine.high %v2218_v41, %v2219_v14  ;;  %v2114_v43 = vadd.f32 %v8837_v21, %v8667_v27  ;;  %v10137_v11 = vld [vmem:[#allocation7_spill] sm:$0xff] }
 0x1e5   :  { %v3241_v13 = vcombine.low %v3080_v34, %v3081_v42  ;;  %v2173_v39 = vadd.f32 %v8545_v7, %v2113_v56  ;;  %v2115_v15 = vadd.f32 %v8842_v16, %v8672_v47  ;;  %v2116_v50 = vadd.f32 %v2039_v17, %v8676_v31  ;;  %v2053_v56 = vpop.f32.mrf.mxu0 }
 0x1e6   :  { %v2548_v37 = vrot.slane %v2314_v5, %v8554_v62  ;;  %v2555_v9 = vrot.slane %v2315_v1, %v8554_v62  ;;  %v2174_v46 = vadd.f32 %v8535_v32, %v2114_v43  ;;  %v2117_v41 = vadd.f32 %v2041_v29, %v8681_v59 }
 0x1e7   :  { %v3249_v27 = vrot.slane %v3241_v13, %v8557_v24  ;;  %v2221_v21 = vmax.f32 %v2173_v39, 0.0  ;;  %v2175_v55 = vadd.f32 %v8545_v7, %v2115_v15  ;;  %v2176_v54 = vadd.f32 %v8535_v32, %v2116_v50 }
 0x1e8   :  { %v2794_v47 = vrot.slane %v2548_v37, 4  ;;  %v2795_v16 = vrot.slane %v2555_v9, 4  ;;  %v2222_v31 = vmax.f32 %v2174_v46, 0.0  ;;  %v2177_v17 = vadd.f32 %v8545_v7, %v2117_v41 }
 0x1e9   :  { %v2316_v30 = vcombine.low %v2220_v26, %v2221_v21  ;;  %v2317_v0 = vcombine.high %v2220_v26, %v2221_v21  ;;  %v2223_v33 = vmax.f32 %v2175_v55, 0.0  ;;  %v2224_v2 = vmax.f32 %v2176_v54, 0.0 }
 0x1ea   :  { %v2890_v12 = vmax.f32 %v2548_v37, %v2794_v47  ;;  %v2891_v59 = vmax.f32 %v2555_v9, %v2795_v16  ;;  %v2225_v29 = vmax.f32 %v2177_v17, 0.0  ;;  %v2118_v25 = vadd.f32 %v2043_v20, %v8685_v3  ;;  %v2055_v47 = vpop.f32.mrf.mxu0 }
 0x1eb   :  { %v2562_v61 = vrot.slane %v2316_v30, %v8554_v62  ;;  %v2569_v45 = vrot.slane %v2317_v0, %v8554_v62  ;;  %v2318_v10 = vcombine.low %v2222_v31, %v2223_v33  ;;  %v2319_v60 = vcombine.high %v2222_v31, %v2223_v33 }
 0x1ec   :  { %v2986_v49 = vrot.slane %v2890_v12, 2  ;;  %v2987_v22 = vrot.slane %v2891_v59, 2  ;;  %v2320_v35 = vcombine.low %v2224_v2, %v2225_v29  ;;  %v2321_v38 = vcombine.high %v2224_v2, %v2225_v29 }
 0x1ed   :  { %v2796_v14 = vrot.slane %v2562_v61, 4  ;;  %v2797_v34 = vrot.slane %v2569_v45, 4  ;;  %v2576_v42 = vrot.slane %v2318_v10, %v8554_v62  ;;  %v2583_v26 = vrot.slane %v2319_v60, %v8554_v62 }
 0x1ee   :  { %v3082_v5 = vmax.f32 %v2890_v12, %v2986_v49  ;;  %v3083_v1 = vmax.f32 %v2891_v59, %v2987_v22  ;;  %v2590_v3 = vrot.slane %v2320_v35, %v8554_v62  ;;  %v2597_v20 = vrot.slane %v2321_v38, %v8554_v62  ;;  %v10136_v49 = vld [vmem:[#allocation8_spill] sm:$0xff]  ;;  %v2059_v35 = vpop.f32.mrf.mxu0 }
 0x1ef   :  { %v2892_v43 = vmax.f32 %v2562_v61, %v2796_v14  ;;  %v2893_v13 = vmax.f32 %v2569_v45, %v2797_v34  ;;  %v2798_v39 = vrot.slane %v2576_v42, 4  ;;  %v2799_v15 = vrot.slane %v2583_v26, 4 }
 0x1f0   :  { %v3242_v50 = vcombine.low %v3082_v5, %v3083_v1  ;;  %v2800_v37 = vrot.slane %v2590_v3, 4  ;;  %v2801_v9 = vrot.slane %v2597_v20, 4  ;;  %v2178_v46 = vadd.f32 %v8535_v32, %v2118_v25 }
 0x1f1   :  { %v2988_v41 = vrot.slane %v2892_v43, 2  ;;  %v2989_v21 = vrot.slane %v2893_v13, 2  ;;  %v2894_v55 = vmax.f32 %v2576_v42, %v2798_v39  ;;  %v2895_v54 = vmax.f32 %v2583_v26, %v2799_v15  ;;  %v2061_v39 = vpop.f32.mrf.mxu0 }
 0x1f2   :  { %v3256_v16 = vrot.slane %v3242_v50, %v8557_v24  ;;  %v2896_v31 = vmax.f32 %v2590_v3, %v2800_v37  ;;  %v2897_v17 = vmax.f32 %v2597_v20, %v2801_v9  ;;  %v2226_v30 = vmax.f32 %v2178_v46, 0.0  ;;  %v10139_v37 = vld [vmem:[#allocation9_spill] sm:$0xff]  ;;  %v10140_v46 = vld [vmem:[#allocation12_spill] sm:$0xff] }
 0x1f3   :  { %v3084_v0 = vmax.f32 %v2892_v43, %v2988_v41  ;;  %v3085_v33 = vmax.f32 %v2893_v13, %v2989_v21  ;;  %v2990_v2 = vrot.slane %v2894_v55, 2  ;;  %v2991_v12 = vrot.slane %v2895_v54, 2  ;;  %v10138_v43 = vld [vmem:[#allocation10_spill] sm:$0xff] }
 0x1f4   :  { %v3257_v59 = vcombine.low %v3249_v27, %v3256_v16  ;;  %v2992_v29 = vrot.slane %v2896_v31, 2  ;;  %v2993_v61 = vrot.slane %v2897_v17, 2  ;;  %v2119_v25 = vadd.f32 %v8866_v40, %v8689_v19 }
 0x1f5   :  { %v3258_v45 = vcombine.low %v3084_v0, %v3085_v33  ;;  %v3086_v10 = vmax.f32 %v2894_v55, %v2990_v2  ;;  %v3087_v60 = vmax.f32 %v2895_v54, %v2991_v12  ;;  %v2120_v22 = vadd.f32 %v8887_v57, %v10136_v49 }
 0x1f6   :  { %v3374_v38 = vpack.c.bf16 %v3257_v59, %v3240_v36  ;;  %v6327_v14 = vpack.c.bf16 %v3257_v59, %v3257_v59  ;;  %v3088_v34 = vmax.f32 %v2896_v31, %v2992_v29  ;;  %v3089_v42 = vmax.f32 %v2897_v17, %v2993_v61  ;;  %v10141_v17 = vld [vmem:[#allocation11_spill] sm:$0xff] }
 0x1f7   :  { %v8916_v27 = vrot.slane %v3258_v45, %v8557_v24  ;;  %v3259_v26 = vcombine.low %v3086_v10, %v3087_v60  ;;  %v2179_v19 = vadd.f32 %v8545_v7, %v2119_v25  ;;  %v2180_v40 = vadd.f32 %v8535_v32, %v2120_v22 }
 0x1f8   :  { %v8921_v5 = vrot.slane %v3374_v38, %v8557_v24  ;;  %v8924_v57 = vrot.slane %v6327_v14, %v8557_v24  ;;  %v3275_v1 = vcombine.low %v3088_v34, %v3089_v42  ;;  %v2121_v23 = vadd.f32 %v8897_v8, %v10137_v11 }
 0x1f9   :  { %v8929_v36 = vrot.slane %v3259_v26, %v8557_v24  ;;  %v2227_v3 = vmax.f32 %v2179_v19, 0.0  ;;  %v2228_v20 = vmax.f32 %v2180_v40, 0.0  ;;  %v2122_v13 = vadd.f32 %v2053_v56, %v10138_v43 }
 0x1fa   :  { %v8933_v15 = vrot.slane %v3275_v1, %v8557_v24  ;;  %v2181_v50 = vadd.f32 %v8545_v7, %v2121_v23  ;;  %v2123_v9 = vadd.f32 %v2055_v47, %v10139_v37  ;;  %v2124_v41 = vadd.f32 %v2059_v35, %v10140_v46 }
 0x1fb   :  { %v3274_v8 = vcombine.low %v8916_v27, %v8929_v36  ;;  %v2322_v21 = vcombine.low %v2226_v30, %v2227_v3  ;;  %v2323_v55 = vcombine.high %v2226_v30, %v2227_v3  ;;  %v2182_v54 = vadd.f32 %v8535_v32, %v2122_v13  ;;  %v8960_v13 = vpop.f32.mrf.mxu0 }
 0x1fc   :  { %v2229_v16 = vmax.f32 %v2181_v50, 0.0  ;;  %v2183_v56 = vadd.f32 %v8545_v7, %v2123_v9  ;;  %v2184_v31 = vadd.f32 %v8535_v32, %v2124_v41  ;;  %v2125_v0 = vadd.f32 %v2061_v39, %v10141_v17 }
 0x1fd   :  { %v2604_v33 = vrot.slane %v2322_v21, %v8554_v62  ;;  %v2611_v47 = vrot.slane %v2323_v55, %v8554_v62  ;;  %v2230_v2 = vmax.f32 %v2182_v54, 0.0  ;;  %v8948_v12 = vcombine.high %v8802_v51, %v8802_v51 }
 0x1fe   :  { %v2324_v30 = vcombine.low %v2228_v20, %v2229_v16  ;;  %v2325_v59 = vcombine.high %v2228_v20, %v2229_v16  ;;  %v2231_v29 = vmax.f32 %v2183_v56, 0.0  ;;  %v2232_v61 = vmax.f32 %v2184_v31, 0.0 }
 0x1ff   :  { %v2802_v25 = vrot.slane %v2604_v33, 4  ;;  %v2803_v45 = vrot.slane %v2611_v47, 4  ;;  %v2185_v10 = vadd.f32 %v8545_v7, %v2125_v0  ;;  %v8953_v60 = vcombine.high %v8869_v18, %v8869_v18 }
 0x200   :  { %v2618_v49 = vrot.slane %v2324_v30, %v8554_v62  ;;  %v2625_v22 = vrot.slane %v2325_v59, %v8554_v62  ;;  %v2326_v35 = vcombine.low %v2230_v2, %v2231_v29  ;;  %v2327_v38 = vcombine.high %v2230_v2, %v2231_v29  ;;  %v8966_v2 = vpop.f32.mrf.mxu0 }
 0x201   :  { %v2898_v14 = vmax.f32 %v2604_v33, %v2802_v25  ;;  %v2899_v34 = vmax.f32 %v2611_v47, %v2803_v45  ;;  %v2233_v42 = vmax.f32 %v2185_v10, 0.0  ;;  %v3510_v26 = vshrl.u32 %v8799_v4, 16 }
 0x202   :  { %v2804_v19 = vrot.slane %v2618_v49, 4  ;;  %v2805_v40 = vrot.slane %v2625_v22, 4  ;;  %v2632_v1 = vrot.slane %v2326_v35, %v8554_v62  ;;  %v2639_v11 = vrot.slane %v2327_v38, %v8554_v62 }
 0x203   :  { %v2994_v23 = vrot.slane %v2898_v14, 2  ;;  %v2995_v3 = vrot.slane %v2899_v34, 2  ;;  %v2328_v20 = vcombine.low %v2232_v61, %v2233_v42  ;;  %v2329_v43 = vcombine.high %v2232_v61, %v2233_v42 }
 0x204   :  { %v2900_v39 = vmax.f32 %v2618_v49, %v2804_v19  ;;  %v2901_v50 = vmax.f32 %v2625_v22, %v2805_v40  ;;  %v2806_v37 = vrot.slane %v2632_v1, 4  ;;  %v2807_v9 = vrot.slane %v2639_v11, 4 }
 0x205   :  { %v3090_v46 = vmax.f32 %v2898_v14, %v2994_v23  ;;  %v3091_v41 = vmax.f32 %v2899_v34, %v2995_v3  ;;  %v2646_v21 = vrot.slane %v2328_v20, %v8554_v62  ;;  %v2653_v55 = vrot.slane %v2329_v43, %v8554_v62 }
 0x206   :  { %v2996_v54 = vrot.slane %v2900_v39, 2  ;;  %v2997_v16 = vrot.slane %v2901_v50, 2  ;;  %v2902_v56 = vmax.f32 %v2632_v1, %v2806_v37  ;;  %v2903_v31 = vmax.f32 %v2639_v11, %v2807_v9  ;;  %v8975_v1 = vpop.f32.mrf.mxu0 }
 0x207   :  { %v3276_v17 = vcombine.low %v3090_v46, %v3091_v41  ;;  %v2808_v0 = vrot.slane %v2646_v21, 4  ;;  %v2809_v33 = vrot.slane %v2653_v55, 4  ;;  %v3512_v47 = vrot.slane %v3510_v26, 6 }
 0x208   :  { %v3092_v30 = vmax.f32 %v2900_v39, %v2996_v54  ;;  %v3093_v59 = vmax.f32 %v2901_v50, %v2997_v16  ;;  %v2998_v29 = vrot.slane %v2902_v56, 2  ;;  %v2999_v61 = vrot.slane %v2903_v31, 2  ;;  %v2071_v54 = vpop.f32.mrf.mxu0 }
 0x209   :  { %v3290_v25 = vrot.slane %v3276_v17, %v8557_v24  ;;  %v2904_v45 = vmax.f32 %v2646_v21, %v2808_v0  ;;  %v2905_v10 = vmax.f32 %v2653_v55, %v2809_v33  ;;  %v3513_v49 = vshll.u32 %v8799_v4, 16 }
 0x20a   :  { %v3292_v22 = vcombine.low %v3092_v30, %v3093_v59  ;;  %v3094_v35 = vmax.f32 %v2902_v56, %v2998_v29  ;;  %v3095_v38 = vmax.f32 %v2903_v31, %v2999_v61  ;;  %v3519_v14 = vshll.u32 %v8810_v53, 16 }
 0x20b   :  { %v3291_v34 = vcombine.low %v8933_v15, %v3290_v25  ;;  %v3000_v42 = vrot.slane %v2904_v45, 2  ;;  %v3001_v19 = vrot.slane %v2905_v10, 2  ;;  %v3515_v40 = vrot.slane %v3513_v49, 7 }
 0x20c   :  { %v8978_v11 = vrot.slane %v3292_v22, %v8557_v24  ;;  %v3293_v23 = vcombine.low %v3094_v35, %v3095_v38  ;;  %v3521_v3 = vrot.slane %v3519_v14, 7  ;;  %v3523_v20 = vshrl.u32 %v8810_v53, 16  ;;  %v2073_v35 = vpop.f32.mrf.mxu0 }
 0x20d   :  { %v3375_v43 = vpack.c.bf16 %v3291_v34, %v3274_v8  ;;  %v6328_v39 = vpack.c.bf16 %v3291_v34, %v3291_v34  ;;  %v3096_v15 = vmax.f32 %v2904_v45, %v3000_v42  ;;  %v3097_v50 = vmax.f32 %v2905_v10, %v3001_v19 }
 0x20e   :  { %v8985_v37 = vrot.slane %v3293_v23, %v8557_v24  ;;  %v3516_v46 = vor.u32 %v3515_v40, %v3512_v47  ;;  %v3525_v41 = vrot.slane %v3523_v20, 6  ;;  %v3529_v21 = vshll.u32 %v8802_v51, 16 }
 0x20f   :  { %v8994_v55 = vrot.slane %v3375_v43, %v8557_v24  ;;  %v8997_v27 = vrot.slane %v6328_v39, %v8557_v24  ;;  %v3309_v36 = vcombine.low %v3096_v15, %v3097_v50  ;;  %v3534_v8 = vshrl.u32 %v8948_v12, 16 }
 0x210   :  { %v3308_v16 = vcombine.low %v8978_v11, %v8985_v37  ;;  %v3517_v56 = vrot.slane %v3516_v46, 2  ;;  %v3526_v31 = vor.u32 %v3525_v41, %v3521_v3  ;;  %v3531_v17 = vrot.slane %v3529_v21, 7 }
 0x211   :  { %v9005_v0 = vrot.slane %v3309_v36, %v8557_v24  ;;  %v3536_v33 = vrot.slane %v3534_v8, 6  ;;  %v3537_v47 = vshll.u32 %v8948_v12, 16  ;;  %v3543_v30 = vshll.u32 %v8869_v18, 16 }
 0x212   :  { %v3522_v59 = vsel %vm8988_vm8, %v3517_v56, %v3521_v3  ;;  %v3527_v29 = vrot.slane %v3526_v31, 2  ;;  %v3547_v61 = vshrl.u32 %v8869_v18, 16  ;;  %v3553_v25 = vshll.u32 %v8953_v60, 16 }
 0x213   :  { %v3539_v45 = vrot.slane %v3537_v47, 7  ;;  %v3545_v10 = vrot.slane %v3543_v30, 7  ;;  %v4498_v49 = vrot.slane %v3523_v20, 7  ;;  %v4502_v22 = vshrl.u32 %v8802_v51, 16 }
 0x214   :  { %v3532_v38 = vsel %vm8988_vm8, %v3527_v29, %v3531_v17  ;;  %v3549_v34 = vrot.slane %v3547_v61, 6  ;;  %v3555_v42 = vrot.slane %v3553_v25, 7  ;;  %v4509_v19 = vrot.slane %v3547_v61, 7  ;;  %v2075_v17 = vpop.f32.mrf.mxu0 }
 0x215   :  { %v3540_v40 = vor.u32 %v3539_v45, %v3536_v33  ;;  %v3718_v23 = vcombine.low %v3522_v59, %v3532_v38  ;;  %v4499_v3 = vor.u32 %v4498_v49, %v3519_v14  ;;  %v4504_v43 = vrot.slane %v4502_v22, 7 }
 0x216   :  { %v3550_v15 = vor.u32 %v3549_v34, %v3545_v10  ;;  %v4510_v20 = vor.u32 %v4509_v19, %v3543_v30  ;;  %v4513_v50 = vshrl.u32 %v8953_v60, 16  ;;  %v6419_v46 = vrot.slane %v3510_v26, 9  ;;  %v10146_v34 = vld [vmem:[#allocation13_spill] sm:$0xff] }
 0x217   :  { %v3541_v41 = vrot.slane %v3540_v40, 2  ;;  %v3726_v36 = vrot.slane %v3718_v23, %v8557_v24  ;;  %v4505_v56 = vor.u32 %v4504_v43, %v3529_v21  ;;  %v4501_v31 = vrot.slane %v4498_v49, 2  ;;  %v2079_v40 = vpop.f32.mrf.mxu0 }
 0x218   :  { %v3551_v14 = vrot.slane %v3550_v15, 2  ;;  %v4515_v33 = vrot.slane %v4513_v50, 7  ;;  %v4500_v47 = vsel %vm9018_vm12, %v6419_v46, %v4499_v3  ;;  %v6420_v59 = vrot.slane %v3534_v8, 9 }
 0x219   :  { %v3546_v30 = vsel %vm8988_vm8, %v3541_v41, %v3545_v10  ;;  %v4506_v29 = vsel %vm9018_vm12, %v4501_v31, %v4505_v56  ;;  %v4512_v61 = vrot.slane %v4509_v19, 2  ;;  %v2126_v26 = vadd.f32 %v8960_v13, %v8719_v52  ;;  %v2081_v46 = vpop.f32.mrf.mxu0  ;;  %v6742_v41 = vld [vmem:[%s9917_s3 + $0x64] ss:$8 sps:$4 sm:$0xff]  }
 0x21a   :  { %v3556_v21 = vsel %vm8988_vm8, %v3551_v14, %v3555_v42  ;;  %v4516_v45 = vor.u32 %v4515_v33, %v3553_v25  ;;  %v4511_v49 = vsel %vm9018_vm12, %v6420_v59, %v4510_v20  ;;  %v4601_v22 = vcombine.low %v4500_v47, %v4506_v29 }
 0x21b   :  { %v3719_v38 = vcombine.low %v3546_v30, %v3556_v21  ;;  %v2186_v8 = vadd.f32 %v8535_v32, %v2126_v26  ;;  %v2127_v10 = vadd.f32 %v8966_v2, %v8722_v28  ;;  %v2128_v19 = vadd.f32 %v8975_v1, %v10146_v34  ;;  %v6740_v21 = vld [vmem:[%s9917_s3 + $0x60] ss:$8 sps:$4 sm:$0xff]  }
 0x21c   :  { %v4517_v52 = vsel %vm9018_vm12, %v4512_v61, %v4516_v45  ;;  %v4609_v13 = vrot.slane %v4601_v22, %v8557_v24  ;;  %v2129_v25 = vadd.f32 %v2071_v54, %v8732_v6  ;;  %v2130_v42 = vadd.f32 %v2073_v35, %v8737_v48  ;;  %v6737_v6 = vld [vmem:[%s9917_s3 + $0x70] ss:$8 sps:$4 sm:$0xff]  }
 0x21d   :  { %v3733_v23 = vrot.slane %v3719_v38, %v8557_v24  ;;  %v4602_v3 = vcombine.low %v4511_v49, %v4517_v52  ;;  %v2234_v43 = vmax.f32 %v2186_v8, 0.0  ;;  %v2187_v15 = vadd.f32 %v8545_v7, %v2127_v10  ;;  %v6745_v8 = vld [vmem:[%s9917_s3 + $0x54] ss:$8 sps:$4 sm:$0xff]  }
 0x21e   :  { %v2188_v28 = vadd.f32 %v8535_v32, %v2128_v19  ;;  %v2189_v2 = vadd.f32 %v8545_v7, %v2129_v25  ;;  %v2190_v1 = vadd.f32 %v8535_v32, %v2130_v42  ;;  %v2131_v20 = vadd.f32 %v2075_v17, %v8745_v63 }
 0x21f   :  { %v3734_v54 = vcombine.low %v3726_v36, %v3733_v23  ;;  %v4616_v48 = vrot.slane %v4602_v3, %v8557_v24  ;;  %v2235_v35 = vmax.f32 %v2187_v15, 0.0  ;;  %v2132_v50 = vadd.f32 %v2079_v40, %v8748_v58  ;;  %v10147_v58 = vld [vmem:[#allocation15_spill] sm:$0xff] }
 0x220   :  { %v2236_v56 = vmax.f32 %v2188_v28, 0.0  ;;  %v2237_v31 = vmax.f32 %v2189_v2, 0.0  ;;  %v2238_v14 = vmax.f32 %v2190_v1, 0.0  ;;  %v2191_v63 = vadd.f32 %v8545_v7, %v2131_v20  ;;  %v6743_v28 = vld [vmem:[%s9917_s3 + $0x50] ss:$8 sps:$4 sm:$0xff]  }
 0x221   :  { %3903 = vmatmul.mubr.bf16.vlgmr.msra.gmra.mxu1 %v3734_v54  ;;  %v4617_v17 = vcombine.low %v4609_v13, %v4616_v48  ;;  %v2330_v33 = vcombine.low %v2234_v43, %v2235_v35  ;;  %v2331_v47 = vcombine.high %v2234_v43, %v2235_v35  ;;  %v2192_v36 = vadd.f32 %v8535_v32, %v2132_v50  ;;  %v6748_v54 = vld [vmem:[%s9917_s3 + $0x44] ss:$8 sps:$4 sm:$0xff]  }
 0x222   :  { %v2332_v59 = vcombine.low %v2236_v56, %v2237_v31  ;;  %v2333_v30 = vcombine.high %v2236_v56, %v2237_v31  ;;  %v2239_v29 = vmax.f32 %v2191_v63, 0.0  ;;  %v2133_v61 = vadd.f32 %v2081_v46, %v10147_v58  ;;  %4096 = vmatpush1.bf16.msra.mxu1 %v6737_v6 }
 0x223   :  { %v10148_v26 = vmov 0   ;;  %4786 = vmatmul.mubr.bf16.vlgmr.msra.gmra.mxu0 %v4617_v17  ;;  %v2660_v45 = vrot.slane %v2330_v33, %v8554_v62  ;;  %v2667_v49 = vrot.slane %v2331_v47, %v8554_v62  ;;  %v2240_v22 = vmax.f32 %v2192_v36, 0.0  ;;  %4097 = vmatprep.subr.bf16.mxu1 %v6742_v41  ;;  %v6746_v36 = vld [vmem:[%s9917_s3 + $0x40] ss:$8 sps:$4 sm:$0xff]  }
 0x224   :  { %3912 = vmatprep.mubr.bf16.mxu1 %v10148_v26  ;;  %v9073_v38 = vcombine.high %v8872_v44, %v8872_v44  ;;  %v2674_v10 = vrot.slane %v2332_v59, %v8554_v62  ;;  %v2681_v34 = vrot.slane %v2333_v30, %v8554_v62  ;;  %v2334_v19 = vcombine.low %v2238_v14, %v2239_v29 }
 0x225   :  { %v2335_v40 = vcombine.high %v2238_v14, %v2239_v29  ;;  %4795 = vmatprep.mubr.bf16.mxu0 %v10148_v26  ;;  %v2810_v52 = vrot.slane %v2660_v45, 4  ;;  %v2811_v13 = vrot.slane %v2667_v49, 4  ;;  %v2193_v25 = vadd.f32 %v8545_v7, %v2133_v61  ;;  %v6751_v61 = vld [vmem:[%s9917_s3 + $0x34] ss:$8 sps:$4 sm:$0xff]  }
 0x226   :  { %v9084_v42 = vcombine.high %v8921_v5, %v8921_v5  ;;  %v2812_v23 = vrot.slane %v2674_v10, 4  ;;  %v2813_v3 = vrot.slane %v2681_v34, 4  ;;  %v2688_v43 = vrot.slane %v2334_v19, %v8554_v62  ;;  %4098 = vmatpush1.bf16.msra.mxu1 %v6740_v21 }
 0x227   :  { %v2695_v15 = vrot.slane %v2335_v40, %v8554_v62  ;;  %v2906_v2 = vmax.f32 %v2660_v45, %v2810_v52  ;;  %v2907_v1 = vmax.f32 %v2667_v49, %v2811_v13  ;;  %v2241_v20 = vmax.f32 %v2193_v25, 0.0  ;;  %4099 = vmatprep.subr.bf16.mxu1 %v6745_v8 }
 0x228   :  { %v9093_v6 = vcombine.high %v8924_v57, %v8924_v57  ;;  %v2908_v48 = vmax.f32 %v2674_v10, %v2812_v23  ;;  %v2909_v35 = vmax.f32 %v2681_v34, %v2813_v3  ;;  %v2814_v50 = vrot.slane %v2688_v43, 4  ;;  %v6749_v23 = vld [vmem:[%s9917_s3 + $0x30] ss:$8 sps:$4 sm:$0xff]  }
 0x229   :  { %v2815_v46 = vrot.slane %v2695_v15, 4  ;;  %v3002_v41 = vrot.slane %v2906_v2, 2  ;;  %v3003_v56 = vrot.slane %v2907_v1, 2  ;;  %v2336_v31 = vcombine.low %v2240_v22, %v2241_v20 }
 0x22a   :  { %v2337_v14 = vcombine.high %v2240_v22, %v2241_v20  ;;  %v3004_v63 = vrot.slane %v2908_v48, 2  ;;  %v3005_v17 = vrot.slane %v2909_v35, 2  ;;  %v2910_v33 = vmax.f32 %v2688_v43, %v2814_v50  ;;  %4100 = vmatpush1.bf16.msra.mxu1 %v6743_v28 }
 0x22b   :  { %v2911_v47 = vmax.f32 %v2695_v15, %v2815_v46  ;;  %v3098_v59 = vmax.f32 %v2906_v2, %v3002_v41  ;;  %v3099_v30 = vmax.f32 %v2907_v1, %v3003_v56  ;;  %v2702_v29 = vrot.slane %v2336_v31, %v8554_v62  ;;  %4101 = vmatprep.subr.bf16.mxu1 %v6748_v54  ;;  %v6754_v2 = vld [vmem:[%s9917_s3 + $0x24] ss:$8 sps:$4 sm:$0xff]  }
 0x22c   :  { %v2709_v58 = vrot.slane %v2337_v14, %v8554_v62  ;;  %v3100_v21 = vmax.f32 %v2908_v48, %v3004_v63  ;;  %v3101_v45 = vmax.f32 %v2909_v35, %v3005_v17  ;;  %v3006_v49 = vrot.slane %v2910_v33, 2  ;;  %v6752_v17 = vld [vmem:[%s9917_s3 + $0x20] ss:$8 sps:$4 sm:$0xff]  }
 0x22d   :  { %v3007_v22 = vrot.slane %v2911_v47, 2  ;;  %v3310_v8 = vcombine.low %v3098_v59, %v3099_v30  ;;  %v2816_v10 = vrot.slane %v2702_v29, 4  ;;  %v3558_v19 = vshrl.u32 %v8872_v44, 16  ;;  %v6757_v59 = vld [vmem:[%s9917_s3 + $0x14] ss:$8 sps:$4 sm:$0xff]  }
 0x22e   :  { %v2817_v34 = vrot.slane %v2709_v58, 4  ;;  %v3326_v40 = vcombine.low %v3100_v21, %v3101_v45  ;;  %v3102_v52 = vmax.f32 %v2910_v33, %v3006_v49  ;;  %v3567_v25 = vshll.u32 %v9073_v38, 16  ;;  %4102 = vmatpush1.bf16.msra.mxu1 %v6746_v36  ;;  %v2083_v21 = vpop.f32.mrf.mxu0 }
 0x22f   :  { %v3103_v13 = vmax.f32 %v2911_v47, %v3007_v22  ;;  %v3324_v3 = vrot.slane %v3310_v8, %v8557_v24  ;;  %v2912_v43 = vmax.f32 %v2702_v29, %v2816_v10  ;;  %v3571_v28 = vshrl.u32 %v9073_v38, 16  ;;  %4103 = vmatprep.subr.bf16.mxu1 %v6751_v61 }
 0x230   :  { %v2913_v15 = vmax.f32 %v2709_v58, %v2817_v34  ;;  %v9117_v1 = vrot.slane %v3326_v40, %v8557_v24  ;;  %v3577_v54 = vshll.u32 %v8921_v5, 16  ;;  %v3582_v48 = vshrl.u32 %v9084_v42, 16  ;;  %v6755_v34 = vld [vmem:[%s9917_s3 + $0x10] ss:$8 sps:$4 sm:$0xff]  }
 0x231   :  { %v3327_v20 = vcombine.low %v3102_v52, %v3103_v13  ;;  %v3325_v35 = vcombine.low %v9005_v0, %v3324_v3  ;;  %v3008_v50 = vrot.slane %v2912_v43, 2  ;;  %v3591_v41 = vshll.u32 %v8924_v57, 16 }
 0x232   :  { %v3009_v46 = vrot.slane %v2913_v15, 2  ;;  %v3595_v31 = vshrl.u32 %v8924_v57, 16  ;;  %v3601_v14 = vshll.u32 %v9093_v6, 16  ;;  %v6421_v63 = vrot.slane %v3558_v19, 9  ;;  %4104 = vmatpush1.bf16.msra.mxu1 %v6749_v23  ;;  %v10149_v23 = vld [vmem:[#allocation16_spill] sm:$0xff] }
 0x233   :  { %v9124_v56 = vrot.slane %v3327_v20, %v8557_v24  ;;  %v3376_v0 = vpack.c.bf16 %v3325_v35, %v3308_v16  ;;  %v6329_v33 = vpack.c.bf16 %v3325_v35, %v3325_v35  ;;  %v3104_v47 = vmax.f32 %v2912_v43, %v3008_v50  ;;  %4105 = vmatprep.subr.bf16.mxu1 %v6754_v2  ;;  %v6760_v43 = vld [vmem:[%s9917_s3 + $0x4] ss:$8 sps:$4 sm:$0xff]  }
 0x234   :  { %v3105_v36 = vmax.f32 %v2913_v15, %v3009_v46  ;;  %v4520_v29 = vrot.slane %v3571_v28, 7  ;;  %v4524_v58 = vshrl.u32 %v8921_v5, 16  ;;  %v6422_v61 = vrot.slane %v3582_v48, 9 }
 0x235   :  { %v3342_v30 = vcombine.low %v9117_v1, %v9124_v56  ;;  %v9141_v45 = vrot.slane %v3376_v0, %v8557_v24  ;;  %v9144_v11 = vrot.slane %v6329_v33, %v8557_v24  ;;  %v4531_v16 = vrot.slane %v3595_v31, 7 }
 0x236   :  { %v3343_v37 = vcombine.low %v3104_v47, %v3105_v36  ;;  %v4521_v49 = vor.u32 %v4520_v29, %v3567_v25  ;;  %v4523_v22 = vrot.slane %v4520_v29, 2  ;;  %v4526_v8 = vrot.slane %v4524_v58, 7  ;;  %4106 = vmatpush1.bf16.msra.mxu1 %v6752_v17 }
 0x237   :  { %v4535_v10 = vshrl.u32 %v9093_v6, 16  ;;  %v4532_v52 = vor.u32 %v4531_v16, %v3591_v41  ;;  %v4534_v13 = vrot.slane %v4531_v16, 2  ;;  %v2134_v3 = vadd.f32 %v2083_v21, %v10149_v23  ;;  %4107 = vmatprep.subr.bf16.mxu1 %v6757_v59  ;;  %v2085_v21 = vpop.f32.mrf.mxu0 }
 0x238   :  { %v9151_v40 = vrot.slane %v3343_v37, %v8557_v24  ;;  %v4522_v15 = vsel %vm9018_vm12, %v6421_v63, %v4521_v49  ;;  %v4527_v2 = vor.u32 %v4526_v8, %v3577_v54  ;;  %v3560_v35 = vrot.slane %v3558_v19, 6  ;;  %v6758_v63 = vld [vmem:[%s9917_s3] ss:$8 sps:$4 sm:$0xff]  }
 0x239   :  { %v4537_v20 = vrot.slane %v4535_v10, 7  ;;  %v4533_v50 = vsel %vm9018_vm12, %v6422_v61, %v4532_v52  ;;  %v2194_v46 = vadd.f32 %v8535_v32, %v2134_v3  ;;  %v3561_v17 = vshll.u32 %v8872_v44, 16  ;;  %v6763_v32 = vld [vmem:[%s9917_s3 + $0x174] ss:$8 sps:$4 sm:$0xff]   ;;  %v10150_v52 = vld [vmem:[#allocation17_spill] sm:$0xff] }
 0x23a   :  { %v3569_v0 = vrot.slane %v3567_v25, 7  ;;  %v4528_v33 = vsel %vm9018_vm12, %v4523_v22, %v4527_v2  ;;  %v3573_v36 = vrot.slane %v3571_v28, 6  ;;  %v3579_v59 = vrot.slane %v3577_v54, 7  ;;  %4108 = vmatpush1.bf16.msra.mxu1 %v6755_v34 }
 0x23b   :  { %v4538_v47 = vor.u32 %v4537_v20, %v3601_v14  ;;  %v4618_v19 = vcombine.low %v4522_v15, %v4528_v33  ;;  %v2242_v29 = vmax.f32 %v2194_v46, 0.0  ;;  %v3563_v58 = vrot.slane %v3561_v17, 7  ;;  %4109 = vmatprep.subr.bf16.mxu1 %v6760_v43 }
 0x23c   :  { %v3584_v61 = vrot.slane %v3582_v48, 6  ;;  %v3574_v28 = vor.u32 %v3573_v36, %v3569_v0  ;;  %v3585_v54 = vshll.u32 %v9084_v42, 16  ;;  %v3593_v37 = vrot.slane %v3591_v41, 7 }
 0x23d   :  { %v4539_v25 = vsel %vm9018_vm12, %v4534_v13, %v4538_v47  ;;  %v4626_v49 = vrot.slane %v4618_v19, %v8557_v24  ;;  %v3564_v22 = vor.u32 %v3563_v58, %v3560_v35  ;;  %v3597_v8 = vrot.slane %v3595_v31, 6 }
 0x23e   :  { %v4619_v16 = vcombine.low %v4533_v50, %v4539_v25  ;;  %v3575_v10 = vrot.slane %v3574_v28, 2  ;;  %v3587_v48 = vrot.slane %v3585_v54, 7  ;;  %v3603_v34 = vrot.slane %v3601_v14, 7  ;;  %4110 = vmatpush1.bf16.msra.mxu1 %v6758_v63 }
 0x23f   :  { %v2135_v23 = vadd.f32 %v2085_v21, %v10150_v52  ;;  %v3565_v43 = vrot.slane %v3564_v22, 2  ;;  %v3598_v15 = vor.u32 %v3597_v8, %v3593_v37  ;;  %v9179_v13 = vcombine.high %v8994_v55, %v8994_v55  ;;  %4400 = vmatprep.subr.bf16.mxu1 %v6763_v32 }
 0x240   :  { %v4633_v3 = vrot.slane %v4619_v16, %v8557_v24  ;;  %v3580_v41 = vsel %vm8988_vm8, %v3575_v10, %v3579_v59  ;;  %v3588_v2 = vor.u32 %v3587_v48, %v3584_v61  ;;  %v9186_v14 = vcombine.high %v8997_v27, %v8997_v27 }
 0x241   :  { %v2195_v31 = vadd.f32 %v8545_v7, %v2135_v23  ;;  %v3570_v35 = vsel %vm8988_vm8, %v3565_v43, %v3569_v0  ;;  %v3599_v50 = vrot.slane %v3598_v15, 2  ;;  %v9192_v46 = vcombine.high %v9141_v45, %v9141_v45 }
 0x242   :  { %v4634_v20 = vcombine.low %v4626_v49, %v4633_v3  ;;  %v3589_v17 = vrot.slane %v3588_v2, 2  ;;  %v3735_v33 = vcombine.low %v3570_v35, %v3580_v41  ;;  %v3606_v36 = vshrl.u32 %v8994_v55, 16 }
 0x243   :  { %v2243_v47 = vmax.f32 %v2195_v31, 0.0  ;;  %v3604_v7 = vsel %vm8988_vm8, %v3599_v50, %v3603_v34  ;;  %v3609_v59 = vshll.u32 %v8994_v55, 16  ;;  %v3615_v63 = vshll.u32 %v9179_v13, 16 }
 0x244   :  { %4796 = vmatmul.mubr.bf16.gmra.mxu0 %v4634_v20  ;;  %v3619_v0 = vshrl.u32 %v9179_v13, 16  ;;  %v3594_v19 = vsel %vm8988_vm8, %v3589_v17, %v3593_v37  ;;  %v3743_v58 = vrot.slane %v3735_v33, %v8557_v24  ;;  %v3608_v25 = vrot.slane %v3606_v36, 6 }
 0x245   :  { %v2338_v61 = vcombine.low %v2242_v29, %v2243_v47  ;;  %v2339_v21 = vcombine.high %v2242_v29, %v2243_v47  ;;  %4805 = vmatprep.mubr.bf16.mxu0 %v10148_v26  ;;  %v3736_v32 = vcombine.low %v3594_v19, %v3604_v7  ;;  %v3611_v28 = vrot.slane %v3609_v59, 7 }
 0x246   :  { %v3617_v54 = vrot.slane %v3615_v63, 7  ;;  %v3621_v22 = vrot.slane %v3619_v0, 6  ;;  %v3625_v8 = vshll.u32 %v8997_v27, 16  ;;  %v3630_v48 = vshrl.u32 %v9186_v14, 16 }
 0x247   :  { %v2716_v16 = vrot.slane %v2338_v61, %v8554_v62  ;;  %v2723_v49 = vrot.slane %v2339_v21, %v8554_v62  ;;  %v3750_v10 = vrot.slane %v3736_v32, %v8557_v24  ;;  %v3612_v37 = vor.u32 %v3611_v28, %v3608_v25 }
 0x248   :  { %v3633_v29 = vshll.u32 %v9186_v14, 16  ;;  %v3622_v23 = vor.u32 %v3621_v22, %v3617_v54  ;;  %v3627_v3 = vrot.slane %v3625_v8, 7  ;;  %v3632_v41 = vrot.slane %v3630_v48, 6 }
 0x249   :  { %v2818_v34 = vrot.slane %v2716_v16, 4  ;;  %v2819_v52 = vrot.slane %v2723_v49, 4  ;;  %v3751_v43 = vcombine.low %v3743_v58, %v3750_v10  ;;  %v3613_v15 = vrot.slane %v3612_v37, 2 }
 0x24a   :  { %v3635_v2 = vrot.slane %v3633_v29, 7  ;;  %v3623_v35 = vrot.slane %v3622_v23, 2  ;;  %v3639_v50 = vshll.u32 %v9141_v45, 16  ;;  %v3643_v47 = vshrl.u32 %v9141_v45, 16 }
 0x24b   :  { %v2914_v31 = vmax.f32 %v2716_v16, %v2818_v34  ;;  %v2915_v20 = vmax.f32 %v2723_v49, %v2819_v52  ;;  %3913 = vmatmul.mubr.bf16.gmra.mxu1 %v3751_v43  ;;  %v3618_v17 = vsel %vm8988_vm8, %v3613_v15, %v3617_v54  ;;  %v3649_v7 = vshll.u32 %v9192_v46, 16 }
 0x24c   :  { %v3636_v33 = vor.u32 %v3635_v2, %v3632_v41  ;;  %3922 = vmatprep.mubr.bf16.mxu1 %v10148_v26  ;;  %v3628_v58 = vsel %vm8988_vm8, %v3623_v35, %v3627_v3  ;;  %v3641_v61 = vrot.slane %v3639_v50, 7  ;;  %v3645_v32 = vrot.slane %v3643_v47, 6 }
 0x24d   :  { %v3010_v59 = vrot.slane %v2914_v31, 2  ;;  %v3011_v19 = vrot.slane %v2915_v20, 2  ;;  %v3651_v25 = vrot.slane %v3649_v7, 7  ;;  %v3752_v28 = vcombine.low %v3618_v17, %v3628_v58 }
 0x24e   :  { %v3637_v21 = vrot.slane %v3636_v33, 2  ;;  %v6423_v54 = vrot.slane %v3606_v36, 9  ;;  %v4542_v22 = vrot.slane %v3619_v0, 7  ;;  %v3646_v37 = vor.u32 %v3645_v32, %v3641_v61 }
 0x24f   :  { %v3106_v16 = vmax.f32 %v2914_v31, %v3010_v59  ;;  %v3107_v49 = vmax.f32 %v2915_v20, %v3011_v19  ;;  %v3760_v29 = vrot.slane %v3752_v28, %v8557_v24  ;;  %v4546_v34 = vshrl.u32 %v8997_v27, 16 }
 0x250   :  { %v3642_v10 = vsel %vm8988_vm8, %v3637_v21, %v3641_v61  ;;  %v4543_v23 = vor.u32 %v4542_v22, %v3615_v63  ;;  %v4545_v3 = vrot.slane %v4542_v22, 2  ;;  %v6424_v43 = vrot.slane %v3630_v48, 9 }
 0x251   :  { %v3344_v52 = vcombine.low %v3106_v16, %v3107_v49  ;;  %v3647_v15 = vrot.slane %v3646_v37, 2  ;;  %v4548_v41 = vrot.slane %v4546_v34, 7  ;;  %v4553_v2 = vrot.slane %v3643_v47, 7 }
 0x252   :  { %v4557_v31 = vshrl.u32 %v9192_v46, 16  ;;  %v4544_v0 = vsel %vm9018_vm12, %v6423_v54, %v4543_v23  ;;  %v9228_v20 = vcombine.high %v9144_v11, %v9144_v11  ;;  %v3654_v35 = vshrl.u32 %v9144_v11, 16 }
 0x253   :  { %v3358_v36 = vrot.slane %v3344_v52, %v8557_v24  ;;  %v3652_v63 = vsel %vm8988_vm8, %v3647_v15, %v3651_v25  ;;  %v4549_v48 = vor.u32 %v4548_v41, %v3625_v8  ;;  %v4554_v17 = vor.u32 %v4553_v2, %v3639_v50 }
 0x254   :  { %v4556_v33 = vrot.slane %v4553_v2, 2  ;;  %v3753_v59 = vcombine.low %v3642_v10, %v3652_v63  ;;  %v4559_v19 = vrot.slane %v4557_v31, 7  ;;  %v3663_v58 = vshll.u32 %v9228_v20, 16 }
 0x255   :  { %v3359_v47 = vcombine.low %v9151_v40, %v3358_v36  ;;  %v4550_v61 = vsel %vm9018_vm12, %v4545_v3, %v4549_v48  ;;  %v4555_v21 = vsel %vm9018_vm12, %v6424_v43, %v4554_v17  ;;  %v3667_v32 = vshrl.u32 %v9228_v20, 16 }
 0x256   :  { %v6425_v28 = vrot.slane %v3654_v35, 9  ;;  %v3767_v40 = vrot.slane %v3753_v59, %v8557_v24  ;;  %v4560_v25 = vor.u32 %v4559_v19, %v3649_v7  ;;  %v4635_v16 = vcombine.low %v4544_v0, %v4550_v61 }
 0x257   :  { %v3377_v8 = vpack.c.bf16 %v3359_v47, %v3342_v30  ;;  %v6330_v50 = vpack.c.bf16 %v3359_v47, %v3359_v47  ;;  %v4564_v49 = vrot.slane %v3667_v32, 7  ;;  %v3656_v54 = vrot.slane %v3654_v35, 6 }
 0x258   :  { %v3657_v22 = vshll.u32 %v9144_v11, 16  ;;  %v3768_v34 = vcombine.low %v3760_v29, %v3767_v40  ;;  %v4561_v1 = vsel %vm9018_vm12, %v4556_v33, %v4560_v25  ;;  %v4643_v30 = vrot.slane %v4635_v16, %v8557_v24 }
 0x259   :  { %v9246_v10 = vrot.slane %v3377_v8, %v8557_v24  ;;  %v9249_v37 = vrot.slane %v6330_v50, %v8557_v24  ;;  %v4636_v56 = vcombine.low %v4555_v21, %v4561_v1  ;;  %v4565_v52 = vor.u32 %v4564_v49, %v3663_v58 }
 0x25a   :  { %v4567_v7 = vrot.slane %v4564_v49, 2  ;;  %3923 = vmatmul.mubr.bf16.gmra.mxu1 %v3768_v34  ;;  %v3659_v63 = vrot.slane %v3657_v22, 7  ;;  %v3665_v47 = vrot.slane %v3663_v58, 7  ;;  %v3669_v21 = vrot.slane %v3667_v32, 6 }
 0x25b   :  { %v9256_v23 = vcombine.high %v9246_v10, %v9246_v10  ;;  %v9260_v3 = vcombine.high %v9249_v37, %v9249_v37  ;;  %v3673_v43 = vshll.u32 %v9246_v10, 16  ;;  %v3687_v29 = vshll.u32 %v9249_v37, 16  ;;  %3932 = vmatprep.mubr.bf16.mxu1 %v10148_v26 }
 0x25c   :  { %v4650_v15 = vrot.slane %v4636_v56, %v8557_v24  ;;  %v3691_v41 = vshrl.u32 %v9249_v37, 16  ;;  %v4566_v2 = vsel %vm9018_vm12, %v6425_v28, %v4565_v52  ;;  %v4568_v31 = vshrl.u32 %v9246_v10, 16 }
 0x25d   :  { %v3678_v36 = vshrl.u32 %v9256_v23, 16  ;;  %v3697_v0 = vshll.u32 %v9260_v3, 16  ;;  %v4579_v35 = vshrl.u32 %v9260_v3, 16  ;;  %v3660_v61 = vor.u32 %v3659_v63, %v3656_v54 }
 0x25e   :  { %v4651_v48 = vcombine.low %v4643_v30, %v4650_v15  ;;  %v4570_v17 = vrot.slane %v4568_v31, 7  ;;  %v4575_v33 = vrot.slane %v3691_v41, 7  ;;  %v3675_v40 = vrot.slane %v3673_v43, 7 }
 0x25f   :  { %v6426_v59 = vrot.slane %v3678_v36, 9  ;;  %v4581_v19 = vrot.slane %v4579_v35, 7  ;;  %v3661_v16 = vrot.slane %v3660_v61, 2  ;;  %v3670_v49 = vor.u32 %v3669_v21, %v3665_v47 }
 0x260   :  { %4806 = vmatmul.mubr.bf16.gmra.mxu0 %v4651_v48  ;;  %v4571_v28 = vor.u32 %v4570_v17, %v3673_v43  ;;  %v4576_v8 = vor.u32 %v4575_v33, %v3687_v29  ;;  %v4578_v50 = vrot.slane %v4575_v33, 2  ;;  %v3680_v34 = vrot.slane %v3678_v36, 6 }
 0x261   :  { %4815 = vmatprep.mubr.bf16.mxu0 %v10148_v26  ;;  %v4582_v25 = vor.u32 %v4581_v19, %v3697_v0  ;;  %v3681_v54 = vshll.u32 %v9256_v23, 16  ;;  %v3689_v32 = vrot.slane %v3687_v29, 7  ;;  %v3671_v30 = vrot.slane %v3670_v49, 2 }
 0x262   :  { %v4572_v22 = vsel %vm9018_vm12, %v4567_v7, %v4571_v28  ;;  %v4577_v58 = vsel %vm9018_vm12, %v6426_v59, %v4576_v8  ;;  %v3693_v15 = vrot.slane %v3691_v41, 6  ;;  %v3666_v36 = vsel %vm8988_vm8, %v3661_v16, %v3665_v47 }
 0x263   :  { %v4583_v1 = vsel %vm9018_vm12, %v4578_v50, %v4582_v25  ;;  %v4652_v56 = vcombine.low %v4566_v2, %v4572_v22  ;;  %v3683_v43 = vrot.slane %v3681_v54, 7  ;;  %v3676_v7 = vsel %vm8988_vm8, %v3671_v30, %v3675_v40  ;;  %v6761_v30 = vld [vmem:[%s9917_s3 + $0x170] ss:$8 sps:$4 sm:$0xff]  }
 0x264   :  { %v4653_v52 = vcombine.low %v4577_v58, %v4583_v1  ;;  %v3694_v29 = vor.u32 %v3693_v15, %v3689_v32  ;;  %v3769_v48 = vcombine.low %v3666_v36, %v3676_v7  ;;  %v3699_v33 = vrot.slane %v3697_v0, 7  ;;  %v6791_v15 = vld [vmem:[%s9917_s3 + $0x250] ss:$8 sps:$4 sm:$0xff]  }
 0x265   :  { %v4660_v31 = vrot.slane %v4652_v56, %v8557_v24  ;;  %v3684_v63 = vor.u32 %v3683_v43, %v3680_v34  ;;  %v3977_v41 = vcombine.low %v8994_v55, %v9179_v13  ;;  %v3978_v19 = vcombine.low %v9186_v14, %v9141_v45 }
 0x266   :  { %v4667_v35 = vrot.slane %v4653_v52, %v8557_v24  ;;  %v3695_v2 = vrot.slane %v3694_v29, 2  ;;  %v3994_v61 = vcombine.low %v9144_v11, %v9228_v20  ;;  %v3995_v0 = vcombine.low %v9256_v23, %v9249_v37 }
 0x267   :  { %v3685_v17 = vrot.slane %v3684_v63, 2  ;;  %v3777_v28 = vrot.slane %v3769_v48, %v8557_v24  ;;  %v9301_v8 = vrot.slane %v3977_v41, %v8557_v24  ;;  %v9304_v50 = vrot.slane %v3978_v19, %v8557_v24 }
 0x268   :  { %v4668_v39 = vcombine.low %v4660_v31, %v4667_v35  ;;  %v3700_v47 = vsel %vm8988_vm8, %v3695_v2, %v3699_v33  ;;  %v9307_v9 = vrot.slane %v3994_v61, %v8557_v24  ;;  %v9311_v25 = vrot.slane %v3995_v0, %v8557_v24  ;;  %v6769_v61 = vld [vmem:[%s9917_s3 + $0x154] ss:$8 sps:$4 sm:$0xff]  }
 0x269   :  { %v3690_v59 = vsel %vm8988_vm8, %v3685_v17, %v3689_v32  ;;  %v3944_v16 = vcombine.low %v8948_v12, %v8869_v18  ;;  %v3993_v49 = vcombine.low %v9301_v8, %v9304_v50  ;;  %v3943_v58 = vcombine.low %v8799_v4, %v8810_v53 }
 0x26a   :  { %4816 = vmatmul.mubr.bf16.gmra.mxu0 %v4668_v39  ;;  %v3770_v21 = vcombine.low %v3690_v59, %v3700_v47  ;;  %v4010_v22 = vcombine.low %v9307_v9, %v9311_v25  ;;  %v6383_v1 = vrot.slane %v8994_v55, 9  ;;  %v4205_v56 = vrot.slane %v9179_v13, 7  ;;  %v6766_v55 = vld [vmem:[%s9917_s3 + $0x164] ss:$8 sps:$4 sm:$0xff]  }
 0x26b   :  { %v3958_v54 = vrot.slane %v3944_v16, %v8557_v24  ;;  %v3951_v32 = vrot.slane %v3943_v58, %v8557_v24  ;;  %v3961_v43 = vcombine.low %v9084_v42, %v8924_v57  ;;  %v4208_v31 = vrot.slane %v8997_v27, 7 }
 0x26c   :  { %v3784_v40 = vrot.slane %v3770_v21, %v8557_v24  ;;  %v4206_v36 = vsel %vm9331_vm3, %v6383_v1, %v4205_v56  ;;  %v4207_v7 = vrot.slane %v4205_v56, 2  ;;  %v6384_v35 = vrot.slane %v9186_v14, 9  ;;  %v6764_v14 = vld [vmem:[%s9917_s3 + $0x160] ss:$8 sps:$4 sm:$0xff]  }
 0x26d   :  { %v3959_v52 = vcombine.low %v3951_v32, %v3958_v54  ;;  %v4212_v63 = vrot.slane %v9141_v45, 7  ;;  %v3960_v29 = vcombine.low %v8872_v44, %v9073_v38  ;;  %v4215_v48 = vrot.slane %v9192_v46, 7  ;;  %v6767_v32 = vld [vmem:[%s9917_s3 + $0x150] ss:$8 sps:$4 sm:$0xff]  }
 0x26e   :  { %v3785_v34 = vcombine.low %v3777_v28, %v3784_v40  ;;  %v4209_v39 = vsel %vm9331_vm3, %v4207_v7, %v4208_v31  ;;  %v6385_v33 = vrot.slane %v9144_v11, 9  ;;  %v4219_v59 = vrot.slane %v9228_v20, 7 }
 0x26f   :  { %v4213_v17 = vsel %vm9331_vm3, %v6384_v35, %v4212_v63  ;;  %v4214_v2 = vrot.slane %v4212_v63, 2  ;;  %v4282_v41 = vcombine.low %v4206_v36, %v4209_v39  ;;  %v4222_v47 = vrot.slane %v9246_v10, 7 }
 0x270   :  { %3933 = vmatmul.mubr.bf16.gmra.mxu1 %v3785_v34  ;;  %v6386_v19 = vrot.slane %v9256_v23, 9  ;;  %v3975_v11 = vrot.slane %v3961_v43, %v8557_v24  ;;  %v4226_v0 = vrot.slane %v9249_v37, 7  ;;  %v4229_v28 = vrot.slane %v9260_v3, 7  ;;  %v6772_v43 = vld [vmem:[%s9917_s3 + $0x144] ss:$8 sps:$4 sm:$0xff]  }
 0x271   :  { %4127 = vmatprep.mubr.bf16.mxu1 %v10148_v26  ;;  %v4216_v21 = vsel %vm9331_vm3, %v4214_v2, %v4215_v48  ;;  %v4220_v16 = vsel %vm9331_vm3, %v6385_v33, %v4219_v59  ;;  %v4221_v34 = vrot.slane %v4219_v59, 2  ;;  %v3968_v23 = vrot.slane %v3960_v29, %v8557_v24  ;;  %v6770_v29 = vld [vmem:[%s9917_s3 + $0x140] ss:$8 sps:$4 sm:$0xff]  }
 0x272   :  { %v4283_v40 = vcombine.low %v4213_v17, %v4216_v21  ;;  %v4227_v58 = vsel %vm9331_vm3, %v6386_v19, %v4226_v0  ;;  %v4228_v54 = vrot.slane %v4226_v0, 2  ;;  %v9375_v1 = vrot.slane %v4282_v41, %v8557_v24  ;;  %v6773_v41 = vld [vmem:[%s9917_s3 + $0x130] ss:$8 sps:$4 sm:$0xff]   ;;  %v6781_v21 = vld [vmem:[%s9917_s3 + $0x114] ss:$8 sps:$4 sm:$0xff]  }
 0x273   :  { %v4893_v35 = vcombine.low %v9179_v13, %v8997_v27  ;;  %v4894_v63 = vcombine.low %v9141_v45, %v9192_v46  ;;  %v4910_v17 = vcombine.low %v9228_v20, %v9246_v10  ;;  %v6775_v27 = vld [vmem:[%s9917_s3 + $0x134] ss:$8 sps:$4 sm:$0xff]   ;;  %v4911_v46 = vcombine.low %v9249_v37, %v9260_v3  ;;  %v6778_v3 = vld [vmem:[%s9917_s3 + $0x124] ss:$8 sps:$4 sm:$0xff]  }
 0x274   :  { %v9378_v56 = vrot.slane %v4283_v40, %v8557_v24  ;;  %v4230_v31 = vsel %vm9331_vm3, %v4228_v54, %v4229_v28  ;;  %v4184_v2 = vrot.slane %v8869_v18, 7  ;;  %v4177_v37 = vrot.slane %v8810_v53, 7  ;;  %v6779_v40 = vld [vmem:[%s9917_s3 + $0x110] ss:$8 sps:$4 sm:$0xff]  }
 0x275   :  { %v4300_v7 = vcombine.low %v4227_v58, %v4230_v31  ;;  %v9409_v45 = vrot.slane %v4893_v35, %v8557_v24  ;;  %v9412_v13 = vrot.slane %v4894_v63, %v8557_v24  ;;  %v9422_v10 = vrot.slane %v4910_v17, %v8557_v24  ;;  %v6785_v35 = vld [vmem:[%s9917_s3 + $0x270] ss:$8 sps:$4 sm:$0xff]  }
 0x276   :  { %v4298_v36 = vcombine.low %v9375_v1, %v9378_v56  ;;  %v4187_v19 = vrot.slane %v8953_v60, 7  ;;  %v4180_v0 = vrot.slane %v8802_v51, 7  ;;  %v6380_v28 = vrot.slane %v8948_v12, 9  ;;  %v6784_v12 = vld [vmem:[%s9917_s3 + $0x104] ss:$8 sps:$4 sm:$0xff]  }
 0x277   :  { %v9401_v39 = vrot.slane %v4300_v7, %v8557_v24  ;;  %v4909_v20 = vcombine.low %v9409_v45, %v9412_v13  ;;  %v4198_v50 = vrot.slane %v8924_v57, 7  ;;  %v4191_v58 = vrot.slane %v9073_v38, 7  ;;  %v6808_v1 = vld [vmem:[%s9917_s3 + $0x204] ss:$8 sps:$4 sm:$0xff]  }
 0x278   :  { %4128 = vmatmul.mubr.bf16.vlgmr.msra.gmra.mxu1 %v3959_v52  ;;  %v3976_v52 = vcombine.low %v3968_v23, %v3975_v11  ;;  %v4179_v11 = vrot.slane %v4177_v37, 2  ;;  %v6382_v54 = vrot.slane %v9084_v42, 9  ;;  %v4194_v31 = vrot.slane %v8921_v5, 7  ;;  %v6787_v42 = vld [vmem:[%s9917_s3 + $0x274] ss:$8 sps:$4 sm:$0xff]  }
 0x279   :  { %4401 = vmatpush1.bf16.msra.mxu1 %v6761_v30  ;;  %4137 = vmatprep.mubr.bf16.mxu1 %v10148_v26  ;;  %v4223_v30 = vsel %vm9331_vm3, %v4221_v34, %v4222_v47  ;;  %v4186_v47 = vrot.slane %v4184_v2, 2  ;;  %v4185_v34 = vsel %vm9331_vm3, %v6380_v28, %v4184_v2  ;;  %v4193_v7 = vrot.slane %v4191_v58, 2  ;;  %v6802_v28 = vld [vmem:[%s9917_s3 + $0x224] ss:$8 sps:$4 sm:$0xff]  }
 0x27a   :  { %4402 = vmatprep.subr.bf16.mxu1 %v6766_v55  ;;  %v4299_v55 = vcombine.low %v4220_v16, %v4223_v30  ;;  %v4181_v16 = vsel %vm9331_vm3, %v4179_v11, %v4180_v0  ;;  %v4201_v30 = vrot.slane %v9093_v6, 7  ;;  %v4199_v9 = vsel %vm9331_vm3, %v6382_v54, %v4198_v50  ;;  %v6794_v11 = vld [vmem:[%s9917_s3 + $0x240] ss:$8 sps:$4 sm:$0xff]   ;;  %v6797_v0 = vld [vmem:[%s9917_s3 + $0x230] ss:$8 sps:$4 sm:$0xff]  }
 0x27b   :  { %v4188_v8 = vsel %vm9331_vm3, %v4186_v47, %v4187_v19  ;;  %v6381_v63 = vrot.slane %v8872_v44, 9  ;;  %v6788_v44 = vld [vmem:[%s9917_s3 + $0x260] ss:$8 sps:$4 sm:$0xff]   ;;  %v4860_v56 = vcombine.low %v8869_v18, %v8953_v60  ;;  %v4877_v60 = vcombine.low %v8924_v57, %v9093_v6  ;;  %v6813_v54 = vld [vmem:[%s9919_s5 + $0x70] sm:$0xff]  }
 0x27c   :  { %v9398_v48 = vrot.slane %v4299_v55, %v8557_v24 }
 0x27d   :  { %4403 = vmatpush1.bf16.msra.mxu1 %v6764_v14  ;;  %v9425_v14 = vrot.slane %v4911_v46, %v8557_v24  ;;  %v4192_v2 = vsel %vm9331_vm3, %v6381_v63, %v4191_v58  ;;  %v6812_v58 = vld [vmem:[%s9919_s5 + $0xb8] sm:$0xff]   ;;  %v6823_v63 = vld [vmem:[%s9919_s5 + $0xe0] sm:$0xff]  }
 0x27e   :  { %4404 = vmatprep.subr.bf16.mxu1 %v6769_v61  ;;  %v4315_v33 = vcombine.low %v9398_v48, %v9401_v39  ;;  %v6776_v61 = vld [vmem:[%s9917_s3 + $0x120] ss:$8 sps:$4 sm:$0xff]  }
 0x27f   :  { %v4926_v59 = vcombine.low %v9422_v10, %v9425_v14  ;;  %v6809_v14 = vld [vmem:[%s9919_s5 + $0x78] sm:$0xff]  }
 0x280   :  { %4138 = vmatmul.mubr.bf16.gmra.mxu1 %v3976_v52  ;;  %6542 = vmatprep.subr.bf16.mxu0 %v6809_v14  ;;  %v6915_v14 = vmov 0.0  }
 0x281   :  { %4405 = vmatpush1.bf16.msra.mxu1 %v6767_v32  ;;  %4147 = vmatprep.mubr.bf16.mxu1 %v10148_v26  ;;  %v4200_v32 = vrot.slane %v4198_v50, 2  ;;  %v6805_v50 = vld [vmem:[%s9917_s3 + $0x214] ss:$8 sps:$4 sm:$0xff]  }
 0x282   :  { %4406 = vmatprep.subr.bf16.mxu1 %v6772_v43  ;;  %v6782_v43 = vld [vmem:[%s9917_s3 + $0x100] ss:$8 sps:$4 sm:$0xff]  }
 0x283   :  { %v4202_v25 = vsel %vm9331_vm3, %v4200_v32, %v4201_v30  ;;  %v6815_v30 = vld [vmem:[%s9919_s5 + $0xf0] sm:$0xff]  }
 0x284   :  { %v4266_v46 = vcombine.low %v4199_v9, %v4202_v25  ;;  %v6818_v9 = vld [vmem:[%s9919_s5 + $0x28] sm:$0xff]  }
 0x285   :  { %4407 = vmatpush1.bf16.msra.mxu1 %v6770_v29  ;;  %v4195_v29 = vsel %vm9331_vm3, %v4193_v7, %v4194_v31  ;;  %v6820_v25 = vld [vmem:[%s9919_s5 + $0xa8] sm:$0xff]  }
 0x286   :  { %4408 = vmatprep.subr.bf16.mxu1 %v6775_v27  ;;  %v6790_v27 = vld [vmem:[%s9917_s3 + $0x264] ss:$8 sps:$4 sm:$0xff]  }
 0x288   :  { %4148 = vmatmul.mubr.bf16.gmra.mxu1 %v3993_v49  ;;  %v6379_v49 = vrot.slane %v8799_v4, 9  ;;  %v4249_v4 = vcombine.low %v4185_v34, %v4188_v8  ;;  %v6800_v8 = vld [vmem:[%s9917_s3 + $0x220] ss:$8 sps:$4 sm:$0xff]  }
 0x289   :  { %4409 = vmatpush1.bf16.msra.mxu1 %v6773_v41  ;;  %4157 = vmatprep.mubr.bf16.mxu1 %v10148_v26  ;;  %v4265_v41 = vcombine.low %v4192_v2, %v4195_v29  ;;  %v6825_v2 = vld [vmem:[%s9919_s5 + $0x58] sm:$0xff]  }
 0x28a   :  { %4410 = vmatprep.subr.bf16.mxu1 %v6778_v3  ;;  %v4178_v23 = vsel %vm9331_vm3, %v6379_v49, %v4177_v37  ;;  %v4263_v55 = vrot.slane %v4249_v4, %v8557_v24  ;;  %v6793_v37 = vld [vmem:[%s9917_s3 + $0x254] ss:$8 sps:$4 sm:$0xff]   ;;  %v4280_v3 = vrot.slane %v4266_v46, %v8557_v24  ;;  %v6803_v49 = vld [vmem:[%s9917_s3 + $0x210] ss:$8 sps:$4 sm:$0xff]  }
 0x28b   :  { %v4248_v52 = vcombine.low %v4178_v23, %v4181_v16  ;;  %v4273_v47 = vrot.slane %v4265_v41, %v8557_v24  ;;  %v4874_v16 = vrot.slane %v4860_v56, %v8557_v24  ;;  %v6811_v4 = vld [vmem:[%s9919_s5 + $0xf8] sm:$0xff]  }
 0x28c   :  { %v6827_v41 = vld [vmem:[%s9919_s5 + $0xd8] sm:$0xff]  }
 0x28d   :  { %4411 = vmatpush1.bf16.msra.mxu1 %v6776_v61  ;;  %v4281_v19 = vcombine.low %v4273_v47, %v4280_v3  ;;  %v6796_v61 = vld [vmem:[%s9917_s3 + $0x244] ss:$8 sps:$4 sm:$0xff]   ;;  %v6828_v3 = vld [vmem:[%s9919_s5 + $0x98] sm:$0xff]  }
 0x28e   :  { %4412 = vmatprep.subr.bf16.mxu1 %v6781_v21  ;;  %v6799_v21 = vld [vmem:[%s9917_s3 + $0x234] ss:$8 sps:$4 sm:$0xff]  }
 0x290   :  { %4158 = vmatmul.mubr.bf16.gmra.mxu1 %v4010_v22  ;;  %v4256_v22 = vrot.slane %v4248_v52, %v8557_v24  ;;  %v6814_v52 = vld [vmem:[%s9919_s5 + $0x30] sm:$0xff]  }
 0x291   :  { %4413 = vmatpush1.bf16.msra.mxu1 %v6779_v40  ;;  %4432 = vmatprep.mubr.bf16.mxu1 %v10148_v26  ;;  %v6806_v40 = vld [vmem:[%s9917_s3 + $0x200] ss:$8 sps:$4 sm:$0xff]  }
 0x292   :  { %4414 = vmatprep.subr.bf16.mxu1 %v6784_v12  ;;  %v4264_v17 = vcombine.low %v4256_v22, %v4263_v55  ;;  %v6819_v55 = vld [vmem:[%s9919_s5 + $0xe8] sm:$0xff]  }
 0x295   :  { %4415 = vmatpush1.bf16.msra.mxu1 %v6782_v43  ;;  %v6816_v43 = vld [vmem:[%s9919_s5 + $0xb0] sm:$0xff]  }
 0x296   :  { %5011 = vmatprep.subr.bf16.mxu1 %v6787_v42  ;;  %v6817_v42 = vld [vmem:[%s9919_s5 + $0x68] sm:$0xff]  }
 0x298   :  { %4433 = vmatmul.mubr.bf16.vlgmr.msra.gmra.mxu1 %v4264_v17  ;;  %v6822_v17 = vld [vmem:[%s9919_s5 + $0x20] sm:$0xff]  }
 0x299   :  { %5012 = vmatpush1.bf16.msra.mxu1 %v6785_v35  ;;  %4442 = vmatprep.mubr.bf16.mxu1 %v10148_v26  ;;  %v6821_v35 = vld [vmem:[%s9919_s5 + $0x60] sm:$0xff]  }
 0x29a   :  { %5013 = vmatprep.subr.bf16.mxu1 %v6790_v27  ;;  %v6824_v27 = vld [vmem:[%s9919_s5 + $0xa0] sm:$0xff]  }
 0x29d   :  { %5014 = vmatpush1.bf16.msra.mxu1 %v6788_v44 }
 0x29e   :  { %5015 = vmatprep.subr.bf16.mxu1 %v6793_v37  ;;  %v6826_v37 = vld [vmem:[%s9919_s5 + $0x18] sm:$0xff]  }
 0x2a0   :  { %4443 = vmatmul.mubr.bf16.gmra.mxu1 %v4281_v19  ;;  %v6831_v19 = vld [vmem:[%s9919_s5 + $0xd0] sm:$0xff]  }
 0x2a1   :  { %5016 = vmatpush1.bf16.msra.mxu1 %v6791_v15  ;;  %4452 = vmatprep.mubr.bf16.mxu1 %v10148_v26  ;;  %v6829_v15 = vld [vmem:[%s9919_s5 + $0x50] sm:$0xff]  }
 0x2a2   :  { %5017 = vmatprep.subr.bf16.mxu1 %v6796_v61 }
 0x2a5   :  { %5018 = vmatpush1.bf16.msra.mxu1 %v6794_v11 }
 0x2a6   :  { %5019 = vmatprep.subr.bf16.mxu1 %v6799_v21 }
 0x2a8   :  { %4453 = vmatmul.mubr.bf16.gmra.mxu1 %v4298_v36  ;;  %v4859_v36 = vcombine.low %v8810_v53, %v8802_v51  ;;  %v4876_v51 = vcombine.low %v9073_v38, %v8921_v5  ;;  %v4891_v53 = vrot.slane %v4877_v60, %v8557_v24  ;;  %v6839_v60 = vld [vmem:[%s9919_s5 + $0xc0] sm:$0xff]  }
 0x2a9   :  { %5020 = vmatpush1.bf16.msra.mxu1 %v6797_v0  ;;  %4462 = vmatprep.mubr.bf16.mxu1 %v10148_v26  ;;  %v6830_v0 = vld [vmem:[%s9919_s5 + $0x10] sm:$0xff]  }
 0x2aa   :  { %5021 = vmatprep.subr.bf16.mxu1 %v6802_v28  ;;  %v4867_v34 = vrot.slane %v4859_v36, %v8557_v24  ;;  %v4884_v48 = vrot.slane %v4876_v51, %v8557_v24  ;;  %v6832_v28 = vld [vmem:[%s9919_s5 + $0x90] sm:$0xff]  }
 0x2ac   :  { %v4875_v18 = vcombine.low %v4867_v34, %v4874_v16  ;;  %v4892_v39 = vcombine.low %v4884_v48, %v4891_v53  ;;  %v6836_v16 = vld [vmem:[%s9919_s5 + $0x88] sm:$0xff]  }
 0x2ad   :  { %5022 = vmatpush1.bf16.msra.mxu1 %v6800_v8 }
 0x2ae   :  { %5023 = vmatprep.subr.bf16.mxu1 %v6805_v50  ;;  %v6833_v50 = vld [vmem:[%s9919_s5 + $0x48] sm:$0xff]  }
 0x2b0   :  { %4463 = vmatmul.mubr.bf16.gmra.mxu1 %v4315_v33 }
 0x2b1   :  { %5024 = vmatpush1.bf16.msra.mxu1 %v6803_v49  ;;  %5043 = vmatprep.mubr.bf16.mxu1 %v10148_v26  ;;  %v6835_v49 = vld [vmem:[%s9919_s5 + $0xc8] sm:$0xff]  }
 0x2b2   :  { %5025 = vmatprep.subr.bf16.mxu1 %v6808_v1 }
 0x2b5   :  { %5026 = vmatpush1.bf16.msra.mxu1 %v6806_v40  ;;  %v6834_v40 = vld [vmem:[%s9919_s5 + $0x8] sm:$0xff]  }
 0x2b6   :  { %6564 = vmatprep.subr.bf16.mxu1 %v6811_v4 }
 0x2b8   :  { %5044 = vmatmul.mubr.bf16.vlgmr.msra.gmra.mxu1 %v4875_v18  ;;  %v6837_v18 = vld [vmem:[%s9919_s5 + $0x40] sm:$0xff]  }
 0x2b9   :  { %5053 = vmatprep.mubr.bf16.mxu1 %v10148_v26  ;;  %6565 = vmatpush3.bf16.msra.mxu1 %v6812_v58 }
 0x2ba   :  { %6566 = vmatprep.subr.bf16.mxu1 %v6815_v30 }
 0x2bd   :  { %6567 = vmatpush3.bf16.msra.mxu1 %v6816_v43 }
 0x2be   :  { %6568 = vmatprep.subr.bf16.mxu1 %v6819_v55 }
 0x2c0   :  { %5054 = vmatmul.mubr.bf16.gmra.mxu1 %v4892_v39  ;;  %v6838_v39 = vld [vmem:[%s9919_s5] sm:$0xff]  }
 0x2c1   :  { %5063 = vmatprep.mubr.bf16.mxu1 %v10148_v26  ;;  %6569 = vmatpush3.bf16.msra.mxu1 %v6820_v25 }
 0x2c2   :  { %6570 = vmatprep.subr.bf16.mxu1 %v6823_v63 }
 0x2c5   :  { %6571 = vmatpush3.bf16.msra.mxu1 %v6824_v27 }
 0x2c6   :  { %6572 = vmatprep.subr.bf16.mxu1 %v6827_v41 }
 0x2c8   :  { %5064 = vmatmul.mubr.bf16.gmra.mxu1 %v4909_v20 }
 0x2c9   :  { %5073 = vmatprep.mubr.bf16.mxu1 %v10148_v26  ;;  %6573 = vmatpush3.bf16.msra.mxu1 %v6828_v3 }
 0x2ca   :  { %6574 = vmatprep.subr.bf16.mxu1 %v6831_v19 }
 0x2cd   :  { %6575 = vmatpush3.bf16.msra.mxu1 %v6832_v28 }
 0x2ce   :  { %6576 = vmatprep.subr.bf16.mxu1 %v6835_v49 }
 0x2d0   :  { %5074 = vmatmul.mubr.bf16.gmra.mxu1 %v4926_v59  ;;  %v6810_v59 = vld [vmem:[%s9919_s5 + $0x38] sm:$0xff]  }
 0x2d1   :  { %6543 = vmatpush3.bf16.msra.mxu0 %v6810_v59  ;;  %6577 = vmatpush3.bf16.msra.mxu1 %v6836_v16 }
 0x2d2   :  { %6544 = vmatprep.subr.bf16.mxu0 %v6813_v54  ;;  %6578 = vmatprep.subr.bf16.mxu1 %v6839_v60 }
 0x2d5   :  { %6545 = vmatpush3.bf16.msra.mxu0 %v6814_v52 }
 0x2d6   :  { %6546 = vmatprep.subr.bf16.mxu0 %v6817_v42 }
 0x2d9   :  { %6547 = vmatpush3.bf16.msra.mxu0 %v6818_v9 }
 0x2da   :  { %6548 = vmatprep.subr.bf16.mxu0 %v6821_v35 }
 0x2dd   :  { %6549 = vmatpush3.bf16.msra.mxu0 %v6822_v17 }
 0x2de   :  { %6550 = vmatprep.subr.bf16.mxu0 %v6825_v2 }
 0x2e1   :  { %v9568_v5 = vpop.f32.mrf.mxu1  ;;  %6551 = vmatpush3.bf16.msra.mxu0 %v6826_v37 }
 0x2e2   :  { %6552 = vmatprep.subr.bf16.mxu0 %v6829_v15 }
 0x2e3   :  { %v9570_v57 = vpop.f32.mrf.mxu1  ;;  %v4787_v54 = vpop.f32.mrf.mxu0 }
 0x2e5   :  { %v9572_v38 = vpop.f32.mrf.mxu1  ;;  %6553 = vmatpush3.bf16.msra.mxu0 %v6830_v0  ;;  %v4789_v52 = vpop.f32.mrf.mxu0 }
 0x2e6   :  { %6554 = vmatprep.subr.bf16.mxu0 %v6833_v50  ;;  %v6916_v50 = vmov 1935823168  }
 0x2e7   :  { %v3910_v6 = vpop.f32.mrf.mxu1  ;;  %v4791_v55 = vpop.f32.mrf.mxu0  ;;  %v5521_v49 = vunpack.c.l.s4 %v6916_v50 }
 0x2e9   :  { %6555 = vmatpush3.bf16.msra.mxu0 %v6834_v40  ;;  %v4793_v35 = vpop.f32.mrf.mxu0 }
 0x2ea   :  { %6556 = vmatprep.subr.bf16.mxu0 %v6837_v18  ;;  %v5100_v18 = vld [vmem:[%s9918_s4] sm:$0x3] }
 0x2ed   :  { %6557 = vmatpush3.bf16.msra.mxu0 %v6838_v39 }
 0x2ee   :  { %6602 = vmatprep.subr.bf16.mxu0 %v6915_v14 }
 0x304   :  { %v4797_v17 = vpop.f32.mrf.mxu0 }
 0x306   :  { %v4799_v2 = vpop.f32.mrf.mxu0 }
 0x30b   :  { %v3914_v33 = vpop.f32.mrf.mxu1 }
 0x30d   :  { %v9574_v12 = vpop.f32.mrf.mxu1 }
 0x30f   :  { %v9576_v23 = vpop.f32.mrf.mxu1 }
 0x311   :  { %v9578_v45 = vpop.f32.mrf.mxu1 }
 0x31a   :  { %v9580_v13 = vpop.f32.mrf.mxu1 }
 0x31c   :  { %v9582_v26 = vpop.f32.mrf.mxu1 }
 0x31e   :  { %v9584_v20 = vpop.f32.mrf.mxu1 }
 0x320   :  { %v9586_v10 = vpop.f32.mrf.mxu1 }
 0x330   :  { %v9603_v32 = vpop.f32.mrf.mxu1 }
 0x332   :  { %v9614_v31 = vpop.f32.mrf.mxu1 }
 0x334   :  { %v9622_v7 = vpop.f32.mrf.mxu1 }
 0x336   :  { %v9630_v22 = vpop.f32.mrf.mxu1 }
 0x338   :  { %v9638_v29 = vpop.f32.mrf.mxu1 }
 0x339   :  { %v4130_v28 = vadd.f32 %v9638_v29, %v9568_v5  ;;  %v5522_v5 = vunpack.c.0.s8 %v5521_v49 }
 0x33a   :  { %v9646_v46 = vpop.f32.mrf.mxu1 }
 0x33b   :  { %v4132_v40 = vadd.f32 %v9646_v46, %v9570_v57 }
 0x33c   :  { %v9654_v44 = vpop.f32.mrf.mxu1 }
 0x33d   :  { %v4134_v60 = vadd.f32 %v9654_v44, %v9572_v38 }
 0x33e   :  { %v4135_v47 = vpop.f32.mrf.mxu1 }
 0x33f   :  { %v9668_v61 = vadd.f32 %v4135_v47, %v3910_v6  ;;  %v6840_v6 = vld [vmem:[%s9919_s5 + $0x80] sm:$0xff]  }
 0x340   :  { %v4139_v11 = vpop.f32.mrf.mxu1  ;;  %6579 = vmatpush3.bf16.msra.mxu1 %v6840_v6 }
 0x341   :  { %v9670_v21 = vadd.f32 %v4139_v11, %v3914_v33  ;;  %6622 = vmatprep.subr.bf16.mxu1 %v6915_v14 }
 0x342   :  { %v4141_v8 = vpop.f32.mrf.mxu1 }
 0x343   :  { %v9685_v1 = vadd.f32 %v4141_v8, %v9574_v12 }
 0x344   :  { %v4143_v56 = vpop.f32.mrf.mxu1 }
 0x345   :  { %v9688_v36 = vadd.f32 %v4143_v56, %v9576_v23 }
 0x346   :  { %v4145_v34 = vpop.f32.mrf.mxu1 }
 0x347   :  { %v9703_v51 = vadd.f32 %v4145_v34, %v9578_v45 }
 0x348   :  { %v4149_v53 = vpop.f32.mrf.mxu1 }
 0x349   :  { %v9706_v48 = vadd.f32 %v4149_v53, %v9580_v13 }
 0x34a   :  { %v4151_v33 = vpop.f32.mrf.mxu1 }
 0x34b   :  { %v9715_v12 = vadd.f32 %v4151_v33, %v9582_v26 }
 0x34c   :  { %v4153_v23 = vpop.f32.mrf.mxu1 }
 0x34d   :  { %v9718_v45 = vadd.f32 %v4153_v23, %v9584_v20  ;;  %v10153_v23 = vld [vmem:[#allocation58_spill] sm:$0xff] }
 0x34e   :  { %v4155_v13 = vpop.f32.mrf.mxu1  ;;  %v10155_v38 = vsub.s32 1, %v10153_v23 }
 0x34f   :  { %v9723_v59 = vadd.f32 %v4155_v13, %v9586_v10  ;;  %v10154_v13 = vsub.s32 0, %v10153_v23 }
 0x350   :  { %v4159_v4 = vpop.f32.mrf.mxu1  ;;  %v9747_v44 = vrot.slane %v5100_v18, %v10155_v38 }
 0x351   :  { %v9726_v58 = vadd.f32 %v4159_v4, %v9603_v32  ;;  %v4801_v32 = vpop.f32.mrf.mxu0  ;;  %v9741_v4 = vrot.slane %v5100_v18, %v10154_v13 }
 0x352   :  { %v4161_v26 = vpop.f32.mrf.mxu1 }
 0x353   :  { %v4803_v15 = vpop.f32.mrf.mxu0 }
 0x354   :  { %v4163_v30 = vpop.f32.mrf.mxu1 }
 0x355   :  { %v4807_v11 = vpop.f32.mrf.mxu0 }
 0x356   :  { %v4165_v20 = vpop.f32.mrf.mxu1 }
 0x357   :  { %v4809_v56 = vpop.f32.mrf.mxu0  ;;  %v4166_v18 = vadd.f32 %v4165_v20, %v9630_v22 }
 0x358   :  { %v4434_v43 = vpop.f32.mrf.mxu1 }
 0x359   :  { %v4473_v16 = vadd.f32 %v4434_v43, %v4130_v28  ;;  %v4811_v29 = vpop.f32.mrf.mxu0 }
 0x35a   :  { %v4436_v42 = vpop.f32.mrf.mxu1 }
 0x35b   :  { %v4474_v53 = vadd.f32 %v4436_v42, %v4132_v40  ;;  %v4826_v33 = vadd.f32 %v4787_v54, %v4473_v16  ;;  %v9753_v40 = vsub.s32 %v5522_v5, %v10153_v23  ;;  %v4164_v16 = vadd.f32 %v4163_v30, %v9622_v7 }
 0x35c   :  { %v4438_v9 = vpop.f32.mrf.mxu1 }
 0x35d   :  { %v4475_v6 = vadd.f32 %v4438_v9, %v4134_v60  ;;  %v4827_v50 = vadd.f32 %v4789_v52, %v4474_v53 }
 0x35e   :  { %v4440_v25 = vpop.f32.mrf.mxu1 }
 0x35f   :  { %v4476_v57 = vadd.f32 %v4440_v25, %v9668_v61  ;;  %v4813_v61 = vpop.f32.mrf.mxu0  ;;  %v4162_v25 = vadd.f32 %v4161_v26, %v9614_v31 }
 0x360   :  { %v4444_v63 = vpop.f32.mrf.mxu1 }
 0x361   :  { %v4477_v43 = vadd.f32 %v4444_v63, %v9670_v21  ;;  %v4828_v63 = vadd.f32 %v4791_v55, %v4475_v6 }
 0x362   :  { %v4446_v27 = vpop.f32.mrf.mxu1 }
 0x363   :  { %v4478_v42 = vadd.f32 %v4446_v27, %v9685_v1  ;;  %v4829_v27 = vadd.f32 %v4793_v35, %v4476_v57  ;;  %v4830_v53 = vadd.f32 %v4797_v17, %v4477_v43 }
 0x364   :  { %v4448_v10 = vpop.f32.mrf.mxu1 }
 0x365   :  { %v4479_v9 = vadd.f32 %v4448_v10, %v9688_v36  ;;  %v4831_v5 = vadd.f32 %v4799_v2, %v4478_v42 }
 0x366   :  { %v4450_v41 = vpop.f32.mrf.mxu1 }
 0x367   :  { %v4480_v54 = vadd.f32 %v4450_v41, %v9703_v51  ;;  %v4817_v51 = vpop.f32.mrf.mxu0  ;;  %v4832_v55 = vadd.f32 %v4801_v32, %v4479_v9 }
 0x368   :  { %v4454_v37 = vpop.f32.mrf.mxu1 }
 0x369   :  { %v4481_v1 = vadd.f32 %v4454_v37, %v9706_v48  ;;  %v4833_v6 = vadd.f32 %v4803_v15, %v4480_v54 }
 0x36a   :  { %v4456_v3 = vpop.f32.mrf.mxu1 }
 0x36b   :  { %v4482_v10 = vadd.f32 %v4456_v3, %v9715_v12  ;;  %v4834_v3 = vadd.f32 %v4807_v11, %v4481_v1 }
 0x36c   :  { %v4458_v47 = vpop.f32.mrf.mxu1 }
 0x36d   :  { %v4483_v31 = vadd.f32 %v4458_v47, %v9718_v45  ;;  %v4835_v2 = vadd.f32 %v4809_v56, %v4482_v10 }
 0x36e   :  { %v4460_v19 = vpop.f32.mrf.mxu1 }
 0x36f   :  { %v4484_v20 = vadd.f32 %v4460_v19, %v9723_v59  ;;  %v9767_v57 = vadd.f32 %v4811_v29, %v4483_v31 }
 0x370   :  { %v4464_v0 = vpop.f32.mrf.mxu1 }
 0x371   :  { %v4485_v35 = vadd.f32 %v4464_v0, %v9726_v58 }
 0x372   :  { %v4466_v8 = vpop.f32.mrf.mxu1 }
 0x373   :  { %v4486_v12 = vadd.f32 %v4466_v8, %v4162_v25  ;;  %v9772_v8 = vadd.f32 %v4813_v61, %v4484_v20  ;;  %v9774_v43 = vadd.f32 %v4817_v51, %v4485_v35 }
 0x374   :  { %v4468_v34 = vpop.f32.mrf.mxu1 }
 0x375   :  { %v4487_v32 = vadd.f32 %v4468_v34, %v4164_v16 }
 0x376   :  { %v9737_v39 = vpop.f32.mrf.mxu1 }
 0x377   :  { %v9779_v42 = vadd.f32 %v9737_v39, %v4166_v18 }
 0x378   :  { %v5045_v46 = vpop.f32.mrf.mxu1 }
 0x379   :  { %v5084_v28 = vadd.f32 %v5045_v46, %v4826_v33  ;;  %v4819_v33 = vpop.f32.mrf.mxu0 }
 0x37a   :  { %v5047_v49 = vpop.f32.mrf.mxu1  ;;  %v9776_v56 = vadd.f32 %v4819_v33, %v4486_v12 }
 0x37b   :  { %v5112_v21 = vadd.f32 %v9741_v4, %v5084_v28  ;;  %v5085_v52 = vadd.f32 %v5047_v49, %v4827_v50  ;;  %v4821_v34 = vpop.f32.mrf.mxu0 }
 0x37c   :  { %v5049_v36 = vpop.f32.mrf.mxu1  ;;  %v9782_v25 = vadd.f32 %v4821_v34, %v4487_v32 }
 0x37d   :  { %v5113_v41 = vadd.f32 %v9747_v44, %v5085_v52  ;;  %v5086_v60 = vadd.f32 %v5049_v36, %v4828_v63  ;;  %v5128_v7 = vmax.f32 %v5112_v21, 0.0 }
 0x37e   :  { %v5051_v26 = vpop.f32.mrf.mxu1 }
 0x37f   :  { %v5129_v30 = vmax.f32 %v5113_v41, 0.0  ;;  %v5114_v22 = vadd.f32 %v9741_v4, %v5086_v60  ;;  %v5087_v48 = vadd.f32 %v5051_v26, %v4829_v27 }
 0x380   :  { %v5055_v37 = vpop.f32.mrf.mxu1 }
 0x381   :  { %v5160_v17 = vcombine.low %v5128_v7, %v5129_v30  ;;  %v5161_v23 = vcombine.high %v5128_v7, %v5129_v30  ;;  %v5115_v45 = vadd.f32 %v9747_v44, %v5087_v48  ;;  %v5130_v47 = vmax.f32 %v5114_v22, 0.0 }
 0x382   :  { %v5088_v15 = vadd.f32 %v5055_v37, %v4830_v53  ;;  %v5057_v13 = vpop.f32.mrf.mxu1 }
 0x383   :  { %v5198_v46 = vrot.slane %v5160_v17, %v8554_v62  ;;  %v5205_v59 = vrot.slane %v5161_v23, %v8554_v62  ;;  %v5131_v58 = vmax.f32 %v5115_v45, 0.0  ;;  %v5089_v19 = vadd.f32 %v5057_v13, %v4831_v5 }
 0x384   :  { %v5116_v11 = vadd.f32 %v9741_v4, %v5088_v15  ;;  %v5059_v0 = vpop.f32.mrf.mxu1 }
 0x385   :  { %v5320_v28 = vrot.slane %v5198_v46, 4  ;;  %v5321_v50 = vrot.slane %v5205_v59, 4  ;;  %v5162_v29 = vcombine.low %v5130_v47, %v5131_v58  ;;  %v5163_v38 = vcombine.high %v5130_v47, %v5131_v58 }
 0x386   :  { %v5117_v9 = vadd.f32 %v9747_v44, %v5089_v19  ;;  %v5090_v54 = vadd.f32 %v5059_v0, %v4832_v55  ;;  %v5061_v49 = vpop.f32.mrf.mxu1  ;;  %v5132_v16 = vmax.f32 %v5116_v11, 0.0 }
 0x387   :  { %v5352_v61 = vmax.f32 %v5198_v46, %v5320_v28  ;;  %v5353_v21 = vmax.f32 %v5205_v59, %v5321_v50  ;;  %v5212_v52 = vrot.slane %v5162_v29, %v8554_v62  ;;  %v5219_v63 = vrot.slane %v5163_v38, %v8554_v62 }
 0x388   :  { %v5133_v1 = vmax.f32 %v5117_v9, 0.0  ;;  %v5118_v36 = vadd.f32 %v9741_v4, %v5090_v54  ;;  %v5091_v27 = vadd.f32 %v5061_v49, %v4833_v6  ;;  %v5065_v51 = vpop.f32.mrf.mxu1 }
 0x389   :  { %v5384_v39 = vrot.slane %v5352_v61, 2  ;;  %v5385_v18 = vrot.slane %v5353_v21, 2  ;;  %v5322_v10 = vrot.slane %v5212_v52, 4  ;;  %v5323_v41 = vrot.slane %v5219_v63, 4 }
 0x38a   :  { %v5164_v60 = vcombine.low %v5132_v16, %v5133_v1  ;;  %v5165_v53 = vcombine.high %v5132_v16, %v5133_v1  ;;  %v5134_v31 = vmax.f32 %v5118_v36, 0.0  ;;  %v5119_v26 = vadd.f32 %v9747_v44, %v5091_v27  ;;  %v5067_v5 = vpop.f32.mrf.mxu1 }
 0x38b   :  { %v9788_v55 = vmax.f32 %v5352_v61, %v5384_v39  ;;  %v9790_v7 = vmax.f32 %v5353_v21, %v5385_v18  ;;  %v5354_v30 = vmax.f32 %v5212_v52, %v5322_v10  ;;  %v5355_v22 = vmax.f32 %v5219_v63, %v5323_v41 }
 0x38c   :  { %v5226_v48 = vrot.slane %v5164_v60, %v8554_v62  ;;  %v5233_v6 = vrot.slane %v5165_v53, %v8554_v62  ;;  %v5135_v20 = vmax.f32 %v5119_v26, 0.0  ;;  %v5092_v35 = vadd.f32 %v5065_v51, %v4834_v3  ;;  %v5069_v12 = vpop.f32.mrf.mxu1 }
 0x38d   :  { %v5448_v37 = vcombine.low %v9788_v55, %v9790_v7  ;;  %v5386_v33 = vrot.slane %v5354_v30, 2  ;;  %v5387_v17 = vrot.slane %v5355_v22, 2  ;;  %v5093_v23 = vadd.f32 %v5067_v5, %v4835_v2 }
 0x38e   :  { %v5324_v45 = vrot.slane %v5226_v48, 4  ;;  %v5325_v32 = vrot.slane %v5233_v6, 4  ;;  %v5166_v47 = vcombine.low %v5134_v31, %v5135_v20  ;;  %v5167_v15 = vcombine.high %v5134_v31, %v5135_v20  ;;  %v5071_v13 = vpop.f32.mrf.mxu1 }
 0x38f   :  { %v9796_v46 = vmax.f32 %v5354_v30, %v5386_v33  ;;  %v9798_v59 = vmax.f32 %v5355_v22, %v5387_v17  ;;  %v5120_v58 = vadd.f32 %v9741_v4, %v5092_v35  ;;  %v5121_v3 = vadd.f32 %v9747_v44, %v5093_v23  ;;  %v4823_v33 = vpop.f32.mrf.mxu0 }
 0x390   :  { %v5356_v19 = vmax.f32 %v5226_v48, %v5324_v45  ;;  %v5357_v11 = vmax.f32 %v5233_v6, %v5325_v32  ;;  %v5240_v0 = vrot.slane %v5166_v47, %v8554_v62  ;;  %v5247_v34 = vrot.slane %v5167_v15, %v8554_v62  ;;  %v5075_v2 = vpop.f32.mrf.mxu1 }
 0x391   :  { %v5449_v28 = vcombine.low %v9796_v46, %v9798_v59  ;;  %v5136_v50 = vmax.f32 %v5120_v58, 0.0  ;;  %v5137_v29 = vmax.f32 %v5121_v3, 0.0  ;;  %v5094_v38 = vadd.f32 %v5069_v12, %v9767_v57 }
 0x392   :  { %v5388_v9 = vrot.slane %v5356_v19, 2  ;;  %v5389_v54 = vrot.slane %v5357_v11, 2  ;;  %v5326_v49 = vrot.slane %v5240_v0, 4  ;;  %v5327_v61 = vrot.slane %v5247_v34, 4  ;;  %v5077_v21 = vpop.f32.mrf.mxu1 }
 0x393   :  { %v5168_v52 = vcombine.low %v5136_v50, %v5137_v29  ;;  %v5169_v63 = vcombine.high %v5136_v50, %v5137_v29  ;;  %v5122_v16 = vadd.f32 %v9741_v4, %v5094_v38  ;;  %v5095_v1 = vadd.f32 %v5071_v13, %v9772_v8 }
 0x394   :  { %v5420_v36 = vmax.f32 %v5356_v19, %v5388_v9  ;;  %v5421_v27 = vmax.f32 %v5357_v11, %v5389_v54  ;;  %v5358_v51 = vmax.f32 %v5240_v0, %v5326_v49  ;;  %v5359_v39 = vmax.f32 %v5247_v34, %v5327_v61  ;;  %v5079_v60 = vpop.f32.mrf.mxu1 }
 0x395   :  { %v5254_v18 = vrot.slane %v5168_v52, %v8554_v62  ;;  %v5261_v10 = vrot.slane %v5169_v63, %v8554_v62  ;;  %v5138_v57 = vmax.f32 %v5122_v16, 0.0  ;;  %v5123_v41 = vadd.f32 %v9747_v44, %v5095_v1 }
 0x396   :  { %v5465_v53 = vcombine.low %v5420_v36, %v5421_v27  ;;  %v5390_v31 = vrot.slane %v5358_v51, 2  ;;  %v5391_v26 = vrot.slane %v5359_v39, 2  ;;  %v5096_v5 = vadd.f32 %v5075_v2, %v9774_v43  ;;  %v5081_v47 = vpop.f32.mrf.mxu1 }
 0x397   :  { %v5328_v30 = vrot.slane %v5254_v18, 4  ;;  %v5329_v22 = vrot.slane %v5261_v10, 4  ;;  %v5139_v8 = vmax.f32 %v5123_v41, 0.0  ;;  %v5097_v48 = vadd.f32 %v5077_v21, %v9776_v56 }
 0x398   :  { %v5422_v6 = vmax.f32 %v5358_v51, %v5390_v31  ;;  %v5423_v20 = vmax.f32 %v5359_v39, %v5391_v26  ;;  %v5124_v35 = vadd.f32 %v9741_v4, %v5096_v5  ;;  %v5098_v12 = vadd.f32 %v5079_v60, %v9782_v25 }
 0x399   :  { %v5360_v17 = vmax.f32 %v5254_v18, %v5328_v30  ;;  %v5361_v23 = vmax.f32 %v5261_v10, %v5329_v22  ;;  %v5170_v45 = vcombine.low %v5138_v57, %v5139_v8  ;;  %v5171_v32 = vcombine.high %v5138_v57, %v5139_v8 }
 0x39a   :  { %v5466_v15 = vcombine.low %v5422_v6, %v5423_v20  ;;  %v5125_v43 = vadd.f32 %v9747_v44, %v5097_v48  ;;  %v5126_v13 = vadd.f32 %v9741_v4, %v5098_v12  ;;  %v4841_v46 = vadd.f32 %v4823_v33, %v9779_v42 }
 0x39b   :  { %v5392_v56 = vrot.slane %v5360_v17, 2  ;;  %v5393_v59 = vrot.slane %v5361_v23, 2  ;;  %v5268_v58 = vrot.slane %v5170_v45, %v8554_v62  ;;  %v5275_v3 = vrot.slane %v5171_v32, %v8554_v62 }
 0x39c   :  { %v5140_v25 = vmax.f32 %v5124_v35, 0.0  ;;  %v5141_v19 = vmax.f32 %v5125_v43, 0.0  ;;  %v5099_v11 = vadd.f32 %v5081_v47, %v4841_v46  ;;  %v5456_v0 = vrot.slane %v5448_v37, %v8557_v24 }
 0x39d   :  { %v5424_v34 = vmax.f32 %v5360_v17, %v5392_v56  ;;  %v5425_v2 = vmax.f32 %v5361_v23, %v5393_v59  ;;  %v5330_v50 = vrot.slane %v5268_v58, 4  ;;  %v5331_v4 = vrot.slane %v5275_v3, 4 }
 0x39e   :  { %v5172_v29 = vcombine.low %v5140_v25, %v5141_v19  ;;  %v5173_v42 = vcombine.high %v5140_v25, %v5141_v19  ;;  %v5127_v38 = vadd.f32 %v9747_v44, %v5099_v11  ;;  %v5463_v9 = vrot.slane %v5449_v28, %v8557_v24 }
 0x39f   :  { %v5482_v54 = vcombine.low %v5424_v34, %v5425_v2  ;;  %v5362_v49 = vmax.f32 %v5268_v58, %v5330_v50  ;;  %v5363_v61 = vmax.f32 %v5275_v3, %v5331_v4  ;;  %v5142_v21 = vmax.f32 %v5126_v13, 0.0  ;;  %v6841_v4 = vld [vmem:[%s9921_s7 + $0x38] ss:$0 sps:$4 sm:$0xff]  }
 0x3a0   :  { %v5282_v52 = vrot.slane %v5172_v29, %v8554_v62  ;;  %v5289_v63 = vrot.slane %v5173_v42, %v8554_v62  ;;  %v5143_v55 = vmax.f32 %v5127_v38, 0.0  ;;  %v5464_v7 = vcombine.low %v5456_v0, %v5463_v9 }
 0x3a1   :  { %v5394_v37 = vrot.slane %v5362_v49, 2  ;;  %v5395_v16 = vrot.slane %v5363_v61, 2  ;;  %v5473_v1 = vrot.slane %v5465_v53, %v8557_v24  ;;  %v5480_v36 = vrot.slane %v5466_v15, %v8557_v24 }
 0x3a2   :  { %v5332_v27 = vrot.slane %v5282_v52, 4  ;;  %v5333_v44 = vrot.slane %v5289_v63, 4  ;;  %v5174_v51 = vcombine.low %v5142_v21, %v5143_v55  ;;  %v5175_v28 = vcombine.high %v5142_v21, %v5143_v55  ;;  %v6845_v55 = vld [vmem:[%s9921_s7 + $0x18] sm:$0xff]  }
 0x3a3   :  { %v5426_v39 = vmax.f32 %v5362_v49, %v5394_v37  ;;  %v5427_v18 = vmax.f32 %v5363_v61, %v5395_v16  ;;  %v5481_v10 = vcombine.low %v5473_v1, %v5480_v36  ;;  %v5526_v5 = vrot.slane %v5464_v7, %v9753_v40  ;;  %v6846_v7 = vld [vmem:[%s9921_s7 + $0x10] sm:$0xff]   ;;  %v6847_v37 = vld [vmem:[%s9921_s7 + $0x8] sm:$0xff]   ;;  %v6850_v36 = vld [vmem:[%s9923_s9 + $0x20] sm:$0xff]  }
 0x3a4   :  { %v5364_v57 = vmax.f32 %v5282_v52, %v5332_v27  ;;  %v5365_v41 = vmax.f32 %v5289_v63, %v5333_v44  ;;  %v5296_v60 = vrot.slane %v5174_v51, %v8554_v62  ;;  %v5303_v31 = vrot.slane %v5175_v28, %v8554_v62  ;;  %v6843_v52 = vld [vmem:[%s9921_s7 + $0x28] sm:$0xff]   ;;  %v6844_v63 = vld [vmem:[%s9921_s7 + $0x20] sm:$0xff]   ;;  %v6851_v44 = vld [vmem:[%s9923_s9 + $0x18] sm:$0xff]  }
 0x3a5   :  { %v5483_v26 = vcombine.low %v5426_v39, %v5427_v18  ;;  %v5533_v53 = vrot.slane %v5481_v10, %v9753_v40  ;;  %v5490_v6 = vrot.slane %v5482_v54, %v8557_v24  ;;  %v6014_v21 = vsel %vm6012_vm4, %v6841_v4, 0  ;;  %v6849_v16 = vld [vmem:[%s9923_s9 + $0x28] ss:$0 sps:$4 sm:$0x33]   ;;  %v6848_v27 = vld [vmem:[%s9921_s7] sm:$0xff]   ;;  %v6852_v51 = vld [vmem:[%s9923_s9 + $0x10] sm:$0xff]  }
 0x3a6   :  { %v5396_v30 = vrot.slane %v5364_v57, 2  ;;  %v5397_v22 = vrot.slane %v5365_v41, 2  ;;  %v5334_v8 = vrot.slane %v5296_v60, 4  ;;  %v5335_v48 = vrot.slane %v5303_v31, 4  ;;  %v6491_v18 = vld [vmem:[%s9920_s6] ss:$0 sm:$0xff] }
 0x3a7   :  { %v5497_v20 = vrot.slane %v5483_v26, %v8557_v24  ;;  %v5552_v35 = vcombine.low %v5526_v5, %v5533_v53  ;;  %v5553_v12 = vcombine.high %v5526_v5, %v5533_v53  ;;  %v6115_v1 = vsel %vm1751_vm11, %v6849_v16, 0 }
 0x3a8   :  { %v5428_v33 = vmax.f32 %v5364_v57, %v5396_v30  ;;  %v5429_v17 = vmax.f32 %v5365_v41, %v5397_v22  ;;  %v5366_v23 = vmax.f32 %v5296_v60, %v5334_v8  ;;  %v5367_v45 = vmax.f32 %v5303_v31, %v5335_v48 }
 0x3a9   :  { %v5498_v62 = vcombine.low %v5490_v6, %v5497_v20  ;;  %v5562_v0 = vrot.slane %v5552_v35, %v8557_v24  ;;  %v5569_v2 = vrot.slane %v5553_v12, %v8557_v24  ;;  %vm6008_vm11 = vcmask 982016   ;;  %v6853_v6 = vld [vmem:[%s9923_s9 + $0x8] sm:$0xff]   ;;  %v6854_v20 = vld [vmem:[%s9923_s9] sm:$0xff]  }
 0x3aa   :  { %v5499_v32 = vcombine.low %v5428_v33, %v5429_v17  ;;  %v5398_v47 = vrot.slane %v5366_v23, 2  ;;  %v5399_v15 = vrot.slane %v5367_v45, 2  ;;  %v6524_v35 = vld [vmem:[%s9922_s8] ss:$0 sm:$0xff] }
 0x3ab   :  { %v5540_v3 = vrot.slane %v5498_v62, %v9753_v40 }
 0x3ac   :  { %v5430_v43 = vmax.f32 %v5366_v23, %v5398_v47  ;;  %v5431_v13 = vmax.f32 %v5367_v45, %v5399_v15  ;;  %v5507_v56 = vrot.slane %v5499_v32, %v8557_v24  ;;  %v6534_v47 = vld [vmem:[%s9924_s10] ss:$0 sm:$0xff] }
 0x3ae   :  { %v5500_v46 = vcombine.low %v5430_v43, %v5431_v13 }
 0x3b0   :  { %v5514_v59 = vrot.slane %v5500_v46, %v8557_v24 }
 0x3b2   :  { %v5515_v58 = vcombine.low %v5507_v56, %v5514_v59 }
 0x3b4   :  { %v5547_v25 = vrot.slane %v5515_v58, %v9753_v40 }
 0x3b6   :  { %v5554_v19 = vcombine.low %v5540_v3, %v5547_v25  ;;  %v5555_v11 = vcombine.high %v5540_v3, %v5547_v25 }
 0x3b8   :  { %v5576_v34 = vrot.slane %v5554_v19, %v8557_v24  ;;  %v5583_v50 = vrot.slane %v5555_v11, %v8557_v24  ;;  %v6842_v24 = vld [vmem:[%s9921_s7 + $0x30] sm:$0xff]  }
 0x3ba   :  { %v5584_v29 = vcombine.low %v5562_v0, %v5576_v34  ;;  %v5585_v42 = vcombine.high %v5562_v0, %v5576_v34  ;;  %v5586_v38 = vcombine.low %v5569_v2, %v5583_v50  ;;  %v5587_v9 = vcombine.high %v5569_v2, %v5583_v50 }
 0x3bc   :  { %v5592_v40 = vpack.c.bf16 %v5584_v29, %v5584_v29  ;;  %v5593_v54 = vpack.c.bf16 %v5585_v42, %v5585_v42  ;;  %v5594_v49 = vpack.c.bf16 %v5586_v38, %v5586_v38  ;;  %v5595_v61 = vpack.c.bf16 %v5587_v9, %v5587_v9 }
 0x3be   :  { %5891 = vmatprep.mubr.bf16.mxu0 %v5593_v54  ;;  %5931 = vmatprep.mubr.bf16.mxu1 %v5595_v61 }
 0x3bf   :  { %5892 = vmatmul.mubr.bf16.vlgmr.msra.gmra.mxu0 %v5592_v40  ;;  %5932 = vmatmul.mubr.bf16.vlgmr.msra.gmra.mxu1 %v5594_v49 }
 0x3c0   :  { %6603 = vmatpush3.bf16.msra.mxu0 %v6014_v21  ;;  %6618 = vmatprep.mubr.msk.bf16.mxu0 %vm6917_vm5, %v6915_v14 }
 0x3c1   :  { %6604 = vmatprep.subr.bf16.mxu0 %v6915_v14  ;;  %6634 = vmatprep.mubr.msk.bf16.mxu1 %vm6917_vm5, %v6915_v14 }
 0x3c2   :  { %6623 = vmatpush3.bf16.msra.mxu1 %v6115_v1 }
 0x3c3   :  { %6624 = vmatprep.subr.bf16.mxu1 %v6915_v14 }
 0x3c4   :  { %6605 = vmatpush3.bf16.msra.mxu0 %v6842_v24 }
 0x3c5   :  { %6606 = vmatprep.subr.bf16.mxu0 %v6915_v14 }
 0x3c6   :  { %6625 = vmatpush3.bf16.msra.mxu1 %v6850_v36 }
 0x3c7   :  { %6626 = vmatprep.subr.bf16.mxu1 %v6915_v14 }
 0x3c8   :  { %6607 = vmatpush3.bf16.msra.mxu0 %v6843_v52 }
 0x3c9   :  { %6608 = vmatprep.subr.bf16.mxu0 %v6915_v14 }
 0x3ca   :  { %6627 = vmatpush3.bf16.msra.mxu1 %v6851_v44 }
 0x3cb   :  { %6628 = vmatprep.subr.bf16.mxu1 %v6915_v14 }
 0x3cc   :  { %6609 = vmatpush3.bf16.msra.mxu0 %v6844_v63 }
 0x3cd   :  { %6610 = vmatprep.subr.bf16.mxu0 %v6915_v14 }
 0x3ce   :  { %6629 = vmatpush3.bf16.msra.mxu1 %v6852_v51 }
 0x3cf   :  { %6630 = vmatprep.subr.bf16.mxu1 %v6915_v14 }
 0x3d0   :  { %6611 = vmatpush3.bf16.msra.mxu0 %v6845_v55 }
 0x3d1   :  { %6612 = vmatprep.subr.bf16.mxu0 %v6915_v14 }
 0x3d2   :  { %6631 = vmatpush3.bf16.msra.mxu1 %v6853_v6 }
 0x3d3   :  { %6632 = vmatprep.subr.bf16.mxu1 %v6915_v14 }
 0x3d4   :  { %6613 = vmatpush3.bf16.msra.mxu0 %v6846_v7 }
 0x3d5   :  { %6614 = vmatprep.subr.bf16.mxu0 %v6915_v14 }
 0x3d6   :  { %6633 = vmatpush3.bf16.msra.mxu1 %v6854_v20 }
 0x3d8   :  { %6615 = vmatpush3.bf16.msra.mxu0 %v6847_v37 }
 0x3d9   :  { %6616 = vmatprep.subr.bf16.mxu0 %v6915_v14 }
 0x3dc   :  { %6617 = vmatpush3.bf16.msra.mxu0 %v6848_v27 }
 0x47f   :  { %v6558_v28 = vpop.f32.mrf.mxu0  ;;  %v6580_v39 = vpop.f32.mrf.mxu1 }
 0x481   :  { %v6559_v10 = vpop.f32.mrf.mxu0  ;;  %v6581_v57 = vpop.f32.mrf.mxu1 }
 0x482   :  { %v6560_v41 = vadd.f32 %v6559_v10, %v6558_v28  ;;  %v6582_v5 = vadd.f32 %v6581_v57, %v6580_v39 }
 0x483   :  { %v6561_v60 = vpop.f32.mrf.mxu0  ;;  %v6583_v31 = vpop.f32.mrf.mxu1 }
 0x484   :  { %v5894_v26 = vadd.f32 %v6560_v41, %v6491_v18 }
 0x485   :  { %v6562_v53 = vpop.f32.mrf.mxu0  ;;  %v6584_v30 = vpop.f32.mrf.mxu1 }
 0x486   :  { %v5934_v22 = vadd.f32 %v6582_v5, %v5894_v26 }
 0x488   :  { %v5939_v8 = vmax.f32 %v5934_v22, 0.0 }
 0x48a   :  { %v5940_v48 = vpack.c.bf16 %v5939_v8, %v5939_v8 }
 0x48c   :  { %6619 = vmatmul.mubr.msk.bf16.vlgmr.msra.gmra.mxu0 %vm6008_vm11, %v5940_v48 }
 0x54c   :  { %v6050_v12 = vpop.f32.mrf.mxu0 }
 0x54d   :  { %v6051_v33 = vadd.f32 %v6524_v35, %v6050_v12 }
 0x54e   :  { %v6620_v17 = vpop.f32.mrf.mxu0 }
 0x54f   :  { %v6056_v23 = vmax.f32 %v6051_v33, 0.0 }
 0x550   :  { %v6053_v45 = vpop.f32.mrf.mxu0 }
 0x551   :  { %v6057_v62 = vpack.c.bf16 %v6056_v23, %v6056_v23 }
 0x552   :  { %v6621_v32 = vpop.f32.mrf.mxu0 }
 0x553   :  { %6635 = vmatmul.mubr.msk.bf16.vlgmr.msra.gmra.mxu1 %vm6109_vm6, %v6057_v62 }
 0x613   :  { %v6151_v15 = vpop.f32.mrf.mxu1 }
 0x614   :  { %v6152_v14 = vadd.f32 %v6534_v47, %v6151_v15 }
 0x615   :  { %v6636_v43 = vpop.f32.mrf.mxu1 }
 0x616   :  { %6158 = vst.msk [vmem:[%s9925_s11] sm:$0xff] %vm6157_vm7, %v6152_v14 }
 0x617   :  { %v6154_v13 = vpop.f32.mrf.mxu1 }
 0x619   :  { %v6637_v46 = vpop.f32.mrf.mxu1 }
 0x61a   :  { %6163 = vsyncpa [#allocation3], 1 }

</bundles_post_ra>
